<compile_context>
chip_gen: v7x
topology: tpu7x:2x2x1
jax: 0.10.0
libtpu: 0.0.40
codegen_flags: <defaults>
</compile_context>

<pallas_src>
import jax
import jax.numpy as jnp
from jax.experimental import pallas as pl
from jax.experimental.pallas import tpu as pltpu


# ----------------------------------------------------------------------------
# Kernel A/B: im2col GEMM + bias + tanh   (the stride-2 TanhBlock convs)
# ----------------------------------------------------------------------------
def _gemm_bias_tanh_kernel(a_ref, w_ref, b_ref, o_ref):
    acc = jnp.dot(a_ref[...], w_ref[...], preferred_element_type=jnp.float32)
    o_ref[...] = jnp.tanh(acc + b_ref[...]).astype(o_ref.dtype)


def gemm_bias_tanh(a, w, bias):
    """tanh(a @ w + bias); a:(M,K) bf16, w:(K,N) bf16, bias:(N,) f32 -> (M,N) bf16."""
    M, K = a.shape
    N = w.shape[1]
    tm = 256 if (M > 256 and M % 256 == 0) else M      # M-parallel grid when large
    grid = (M // tm,)
    bias2 = bias.reshape(1, N).astype(jnp.float32)
    cost = pl.CostEstimate(
        flops=2 * M * K * N,
        transcendentals=M * N,
        bytes_accessed=(M * K + K * N + M * N) * 2 + N * 4,
    )
    return pl.pallas_call(
        _gemm_bias_tanh_kernel,
        grid=grid,
        in_specs=[
            pl.BlockSpec((tm, K), lambda i: (i, 0)),
            pl.BlockSpec((K, N), lambda i: (0, 0)),
            pl.BlockSpec((1, N), lambda i: (0, 0)),
        ],
        out_specs=pl.BlockSpec((tm, N), lambda i: (i, 0)),
        out_shape=jax.ShapeDtypeStruct((M, N), jnp.bfloat16),
        compiler_params=pltpu.CompilerParams(dimension_semantics=("parallel",)),
        cost_estimate=cost,
    )(a, w, bias2)


# ----------------------------------------------------------------------------
# Kernel C: fused tanh3 + match_convs + global-average-pools + full head
# ----------------------------------------------------------------------------
def _fpn_head_kernel(p3_ref, w3_ref, b3_ref,
                     y2_ref, wm1_ref, bm1_ref,
                     y1_ref, wm2_ref, bm2_ref,
                     s3_ref, s2_ref, s1_ref,
                     l1w_ref, l1b_ref, l2w_ref, l2b_ref, l3w_ref, l3b_ref,
                     wo1_ref, wo2_ref, wo3_ref, bo_ref,
                     o_ref):
    f32 = jnp.float32
    bf16 = jnp.bfloat16

    # y3 = tanh(conv3(y2)); only its per-image mean (g3) is needed downstream.
    y3 = jnp.tanh(
        jnp.dot(p3_ref[...], w3_ref[...], preferred_element_type=f32) + b3_ref[...])
    g3 = jnp.dot(s3_ref[...], y3.astype(bf16), preferred_element_type=f32)

    # o22 = relu(match_conv1(y2)); GAP(o23) = GAP(upsample(y3)) + GAP(o22) = g3 + GAP(o22)
    m1 = jnp.maximum(
        jnp.dot(y2_ref[...], wm1_ref[...], preferred_element_type=f32) + bm1_ref[...],
        0.0)
    g2 = g3 + jnp.dot(s2_ref[...], m1.astype(bf16), preferred_element_type=f32)

    # o12 = relu(match_conv2(y1)); GAP(o11 + o12) = GAP(o23) + GAP(o12) = g2 + GAP(o12)
    m2 = jnp.maximum(
        jnp.dot(y1_ref[...], wm2_ref[...], preferred_element_type=f32) + bm2_ref[...],
        0.0)
    g1 = g2 + jnp.dot(s1_ref[...], m2.astype(bf16), preferred_element_type=f32)

    # heads: o3 = relu(linear1(g3)), o2 = relu(linear2(g2)), o1 = relu(linear3(g1))
    o3 = jnp.maximum(
        jnp.dot(g3.astype(bf16), l1w_ref[...], preferred_element_type=f32) + l1b_ref[...], 0.0)
    o2 = jnp.maximum(
        jnp.dot(g2.astype(bf16), l2w_ref[...], preferred_element_type=f32) + l2b_ref[...], 0.0)
    o1 = jnp.maximum(
        jnp.dot(g1.astype(bf16), l3w_ref[...], preferred_element_type=f32) + l3b_ref[...], 0.0)

    # out = log_softmax(concat([o1,o2,o3]) @ Wout + bout); Wout is passed pre-split
    # so the concat becomes a sum of three small GEMMs.
    logits = (jnp.dot(o1.astype(bf16), wo1_ref[...], preferred_element_type=f32)
              + jnp.dot(o2.astype(bf16), wo2_ref[...], preferred_element_type=f32)
              + jnp.dot(o3.astype(bf16), wo3_ref[...], preferred_element_type=f32)
              + bo_ref[...])
    mx = jnp.max(logits, axis=1, keepdims=True)
    lse = jnp.log(jnp.sum(jnp.exp(logits - mx), axis=1, keepdims=True)) + mx
    o_ref[...] = logits - lse


def fpn_head_fused(p3, w3, b3, y2f, wm1, bm1, y1f, wm2, bm2,
                   s3, s2, s1, l1w, l1b, l2w, l2b, l3w, l3b,
                   wo1, wo2, wo3, bo, batch, num_classes):
    args = (p3, w3, b3.reshape(1, -1).astype(jnp.float32),
            y2f, wm1, bm1.reshape(1, -1).astype(jnp.float32),
            y1f, wm2, bm2.reshape(1, -1).astype(jnp.float32),
            s3, s2, s1,
            l1w, l1b.reshape(1, -1).astype(jnp.float32),
            l2w, l2b.reshape(1, -1).astype(jnp.float32),
            l3w, l3b.reshape(1, -1).astype(jnp.float32),
            wo1, wo2, wo3, bo.reshape(1, -1).astype(jnp.float32))
    n3 = w3.shape[1]
    flops = 2 * (p3.shape[0] * p3.shape[1] * n3
                 + y2f.shape[0] * y2f.shape[1] * wm1.shape[1]
                 + y1f.shape[0] * y1f.shape[1] * wm2.shape[1]
                 + s3.size * n3 + s2.size * wm1.shape[1] + s1.size * wm2.shape[1]
                 + 3 * batch * l1w.shape[0] * l1w.shape[1]
                 + 3 * batch * wo1.shape[0] * num_classes)
    bytes_accessed = sum(int(a.size) * a.dtype.itemsize for a in args)
    bytes_accessed += batch * num_classes * 4
    cost = pl.CostEstimate(flops=flops,
                           transcendentals=p3.shape[0] * n3 + batch * num_classes,
                           bytes_accessed=bytes_accessed)
    return pl.pallas_call(
        _fpn_head_kernel,
        out_shape=jax.ShapeDtypeStruct((batch, num_classes), jnp.float32),
        cost_estimate=cost,
    )(*args)


# ----------------------------------------------------------------------------
# Wrapper glue: im2col for the stride-2 convs, weight reordering, GAP matrices
# ----------------------------------------------------------------------------
def im2col_s2(x, k, pad):
    """x: (B,H,W,C) NHWC -> (B*Ho*Wo, k*k*C) patches for a stride-2 conv."""
    B, H, W, C = x.shape
    xp = jnp.pad(x, ((0, 0), (pad, pad), (pad, pad), (0, 0)))
    Hp, Wp = H + 2 * pad, W + 2 * pad
    Ho, Wo = (Hp - k) // 2 + 1, (Wp - k) // 2 + 1
    cols = []
    for i in range(k):
        for j in range(k):
            cols.append(xp[:, i:i + 2 * (Ho - 1) + 1:2,
                           j:j + 2 * (Wo - 1) + 1:2, :])
    patches = jnp.stack(cols, axis=3)                    # (B,Ho,Wo,k*k,C)
    return patches.reshape(B * Ho * Wo, k * k * C), Ho, Wo


def conv_w_mat(w, k_pad_to=None):
    """(Cout,Cin,kh,kw) torch weight -> (kh*kw*Cin, Cout) bf16, K zero-padded."""
    Cout, Cin, kh, kw = w.shape
    m = jnp.transpose(w, (2, 3, 1, 0)).reshape(kh * kw * Cin, Cout)
    if k_pad_to is not None and k_pad_to > m.shape[0]:
        m = jnp.pad(m, ((0, k_pad_to - m.shape[0]), (0, 0)))
    return m.astype(jnp.bfloat16)


def seg_mean_matrix(batch, n):
    """(batch, batch*n) matrix so that S @ x implements per-image GAP as a GEMM."""
    r = jnp.arange(batch)[:, None]
    c = jnp.arange(batch * n)[None, :]
    return jnp.where(c // n == r, 1.0 / n, 0.0).astype(jnp.bfloat16)


def forward(x_nchw, p, num_classes=4):
    B = x_nchw.shape[0]
    x = jnp.transpose(x_nchw, (0, 2, 3, 1)).astype(jnp.float32)      # NCHW -> NHWC

    # ---- trunk: tanh1 (7x7/s2), tanh2 (5x5/s2); tanh3 is fused into kernel C ----
    a1, H1, W1 = im2col_s2(x, 7, 3)                                  # (B*H1*W1, 49)
    k1 = 56                                                          # pad K 49 -> 56
    a1 = jnp.pad(a1, ((0, 0), (0, k1 - a1.shape[1]))).astype(jnp.bfloat16)
    y1f = gemm_bias_tanh(a1, conv_w_mat(p["conv1_w"], k1), p["conv1_b"])  # (.,32) bf16

    y1 = y1f.reshape(B, H1, W1, 32)
    a2, H2, W2 = im2col_s2(y1, 5, 2)                                 # (B*H2*W2, 800)
    y2f = gemm_bias_tanh(a2.astype(jnp.bfloat16), conv_w_mat(p["conv2_w"]),
                         p["conv2_b"])                               # (.,128) bf16

    y2 = y2f.reshape(B, H2, W2, 128)
    a3, H3, W3 = im2col_s2(y2, 3, 1)                                 # (B*H3*W3, 1152)

    # ---- fused tanh3 + FPN (match convs, upsample-free pooling) + head ----
    bf = jnp.bfloat16
    out = fpn_head_fused(
        a3.astype(bf), conv_w_mat(p["conv3_w"]), p["conv3_b"],
        y2f, conv_w_mat(p["match1_w"]), p["match1_b"],
        y1f, conv_w_mat(p["match2_w"]), p["match2_b"],
        seg_mean_matrix(B, H3 * W3), seg_mean_matrix(B, H2 * W2),
        seg_mean_matrix(B, H1 * W1),
        p["lin1_w"].astype(bf), p["lin1_b"],
        p["lin2_w"].astype(bf), p["lin2_b"],
        p["lin3_w"].astype(bf), p["lin3_b"],
        p["out_w"][0:32].astype(bf),     # multiplies o1
        p["out_w"][32:64].astype(bf),    # multiplies o2
        p["out_w"][64:96].astype(bf),    # multiplies o3
        p["out_b"],
        batch=B, num_classes=num_classes)
    return out


# ----------------------------------------------------------------------------
# Deterministic synthetic parameters
# ----------------------------------------------------------------------------
class ParamGen:
    def __init__(self, seed=0):
        self.key = jax.random.PRNGKey(seed)
        self.i = 0

    def next(self, shape, scale=1.0):
        self.i += 1
        k = jax.random.fold_in(self.key, self.i)
        return scale * jax.random.normal(k, shape, dtype=jnp.float32)


def make_params(pg, in_channels=1, num_classes=4):
    def conv(cout, cin, k):
        fan_in = cin * k * k
        return pg.next((cout, cin, k, k), (2.0 / fan_in) ** 0.5), 0.01 * pg.next((cout,))

    def linear(cin, cout):
        return pg.next((cin, cout), (2.0 / cin) ** 0.5), 0.01 * pg.next((cout,))

    p = {}
    p["conv1_w"], p["conv1_b"] = conv(32, in_channels, 7)
    p["conv2_w"], p["conv2_b"] = conv(128, 32, 5)
    p["conv3_w"], p["conv3_b"] = conv(256, 128, 3)
    p["match1_w"], p["match1_b"] = conv(256, 128, 1)
    p["match2_w"], p["match2_b"] = conv(256, 32, 1)
    p["lin1_w"], p["lin1_b"] = linear(256, 32)
    p["lin2_w"], p["lin2_b"] = linear(256, 32)
    p["lin3_w"], p["lin3_b"] = linear(256, 32)
    p["out_w"], p["out_b"] = linear(96, num_classes)
    return p


if __name__ == "__main__":
    key = jax.random.PRNGKey(0)
    x = jax.random.normal(key, (2, 1, 32, 32), dtype=jnp.float32)   # in_channels=1

    params = make_params(ParamGen(0), in_channels=1, num_classes=4)

    out = jax.jit(lambda inp: forward(inp, params, num_classes=4))(x)
    out = jax.block_until_ready(out)

    assert out.shape == (2, 4), out.shape
    assert bool(jnp.all(jnp.isfinite(out)))
    # log_softmax rows must exponentiate to probability distributions
    assert bool(jnp.allclose(jnp.sum(jnp.exp(out), axis=1), 1.0, atol=1e-4))
    print("KERNEL_OK")
</pallas_src>

<mosaic_0001>
module attributes {stable_mosaic.version = 11 : i64} {
  func.func @_gemm_bias_tanh_kernel(%arg0: i32, %arg1: memref<256x56xbf16, #tpu.memory_space<vmem>>, %arg2: memref<56x32xbf16, #tpu.memory_space<vmem>>, %arg3: memref<1x32xf32, #tpu.memory_space<vmem>>, %arg4: memref<256x32xbf16, #tpu.memory_space<vmem>>) attributes {dimension_semantics = [#tpu.dimension_semantics<parallel>], iteration_bounds = array<i64: 2>, scalar_prefetch = 0 : i64, scratch_operands = 0 : i64, tpu.core_type = #tpu.core_type<tc>, window_params = [{transform_indices = @transform_0, window_bounds = array<i64: 256, 56>}, {pipeline_mode = #tpu.pipeline_mode<synchronous>, transform_indices = @transform_1, window_bounds = array<i64: 56, 32>}, {pipeline_mode = #tpu.pipeline_mode<synchronous>, transform_indices = @transform_2, window_bounds = array<i64: 1, 32>}, {transform_indices = @transform_3, window_bounds = array<i64: 256, 32>}]} {
    %c0 = arith.constant 0 : index
    %c0_0 = arith.constant 0 : index
    %0 = vector.load %arg1[%c0, %c0_0] : memref<256x56xbf16, #tpu.memory_space<vmem>>, vector<256x56xbf16>
    %c0_1 = arith.constant 0 : index
    %c0_2 = arith.constant 0 : index
    %1 = vector.load %arg2[%c0_1, %c0_2] : memref<56x32xbf16, #tpu.memory_space<vmem>>, vector<56x32xbf16>
    %cst = arith.constant dense<0.000000e+00> : vector<256x32xf32>
    %2 = tpu.matmul %0, %1, %cst {dimension_numbers = #tpu.dot_dimension_numbers<[1], [0], [0], [1], [0, 0, 1, 1], [], []>} : vector<256x56xbf16>, vector<56x32xbf16>, vector<256x32xf32> -> vector<256x32xf32>
    %c0_3 = arith.constant 0 : index
    %c0_4 = arith.constant 0 : index
    %3 = vector.load %arg3[%c0_3, %c0_4] : memref<1x32xf32, #tpu.memory_space<vmem>>, vector<1x32xf32>
    %4 = vector.broadcast %3 : vector<1x32xf32> to vector<256x32xf32>
    %5 = arith.addf %2, %4 : vector<256x32xf32>
    %6 = math.tanh %5 : vector<256x32xf32>
    %7 = arith.truncf %6 : vector<256x32xf32> to vector<256x32xbf16>
    %c0_5 = arith.constant 0 : index
    %c0_6 = arith.constant 0 : index
    %8 = vector.load %arg4[%c0_5, %c0_6] : memref<256x32xbf16, #tpu.memory_space<vmem>>, vector<256x32xbf16>
    tpu.vector_store %arg4[%c0_5, %c0_6], %7 {strides = array<i32>} : memref<256x32xbf16, #tpu.memory_space<vmem>>, vector<256x32xbf16>,
    return
  }
  func.func @transform_0(%arg0: i32) -> (i32, i32) {
    %c0_i32 = arith.constant 0 : i32
    %c0_i32_0 = arith.constant 0 : i32
    return %arg0, %c0_i32 : i32, i32
  }
  func.func @transform_1(%arg0: i32) -> (i32, i32) {
    %c0_i32 = arith.constant 0 : i32
    %c0_i32_0 = arith.constant 0 : i32
    %c0_i32_1 = arith.constant 0 : i32
    return %c0_i32, %c0_i32_0 : i32, i32
  }
  func.func @transform_2(%arg0: i32) -> (i32, i32) {
    %c0_i32 = arith.constant 0 : i32
    %c0_i32_0 = arith.constant 0 : i32
    %c0_i32_1 = arith.constant 0 : i32
    return %c0_i32, %c0_i32_0 : i32, i32
  }
  func.func @transform_3(%arg0: i32) -> (i32, i32) {
    %c0_i32 = arith.constant 0 : i32
    %c0_i32_0 = arith.constant 0 : i32
    return %arg0, %c0_i32 : i32, i32
  }
}

module attributes {stable_mosaic.version = 11 : i64} {
  func.func @_gemm_bias_tanh_kernel(%arg0: i32, %arg1: memref<128x800xbf16, #tpu.memory_space<vmem>>, %arg2: memref<800x128xbf16, #tpu.memory_space<vmem>>, %arg3: memref<1x128xf32, #tpu.memory_space<vmem>>, %arg4: memref<128x128xbf16, #tpu.memory_space<vmem>>) attributes {dimension_semantics = [#tpu.dimension_semantics<parallel>], iteration_bounds = array<i64: 1>, scalar_prefetch = 0 : i64, scratch_operands = 0 : i64, tpu.core_type = #tpu.core_type<tc>, window_params = [{transform_indices = @transform_0, window_bounds = array<i64: 128, 800>}, {pipeline_mode = #tpu.pipeline_mode<synchronous>, transform_indices = @transform_1, window_bounds = array<i64: 800, 128>}, {pipeline_mode = #tpu.pipeline_mode<synchronous>, transform_indices = @transform_2, window_bounds = array<i64: 1, 128>}, {transform_indices = @transform_3, window_bounds = array<i64: 128, 128>}]} {
    %c0 = arith.constant 0 : index
    %c0_0 = arith.constant 0 : index
    %0 = vector.load %arg1[%c0, %c0_0] : memref<128x800xbf16, #tpu.memory_space<vmem>>, vector<128x800xbf16>
    %c0_1 = arith.constant 0 : index
    %c0_2 = arith.constant 0 : index
    %1 = vector.load %arg2[%c0_1, %c0_2] : memref<800x128xbf16, #tpu.memory_space<vmem>>, vector<800x128xbf16>
    %cst = arith.constant dense<0.000000e+00> : vector<128x128xf32>
    %2 = tpu.matmul %0, %1, %cst {dimension_numbers = #tpu.dot_dimension_numbers<[1], [0], [0], [1], [0, 0, 1, 1], [], []>} : vector<128x800xbf16>, vector<800x128xbf16>, vector<128x128xf32> -> vector<128x128xf32>
    %c0_3 = arith.constant 0 : index
    %c0_4 = arith.constant 0 : index
    %3 = vector.load %arg3[%c0_3, %c0_4] : memref<1x128xf32, #tpu.memory_space<vmem>>, vector<1x128xf32>
    %4 = vector.broadcast %3 : vector<1x128xf32> to vector<128x128xf32>
    %5 = arith.addf %2, %4 : vector<128x128xf32>
    %6 = math.tanh %5 : vector<128x128xf32>
    %7 = arith.truncf %6 : vector<128x128xf32> to vector<128x128xbf16>
    %c0_5 = arith.constant 0 : index
    %c0_6 = arith.constant 0 : index
    %8 = vector.load %arg4[%c0_5, %c0_6] : memref<128x128xbf16, #tpu.memory_space<vmem>>, vector<128x128xbf16>
    tpu.vector_store %arg4[%c0_5, %c0_6], %7 {strides = array<i32>} : memref<128x128xbf16, #tpu.memory_space<vmem>>, vector<128x128xbf16>,
    return
  }
  func.func @transform_0(%arg0: i32) -> (i32, i32) {
    %c0_i32 = arith.constant 0 : i32
    %c0_i32_0 = arith.constant 0 : i32
    return %arg0, %c0_i32 : i32, i32
  }
  func.func @transform_1(%arg0: i32) -> (i32, i32) {
    %c0_i32 = arith.constant 0 : i32
    %c0_i32_0 = arith.constant 0 : i32
    %c0_i32_1 = arith.constant 0 : i32
    return %c0_i32, %c0_i32_0 : i32, i32
  }
  func.func @transform_2(%arg0: i32) -> (i32, i32) {
    %c0_i32 = arith.constant 0 : i32
    %c0_i32_0 = arith.constant 0 : i32
    %c0_i32_1 = arith.constant 0 : i32
    return %c0_i32, %c0_i32_0 : i32, i32
  }
  func.func @transform_3(%arg0: i32) -> (i32, i32) {
    %c0_i32 = arith.constant 0 : i32
    %c0_i32_0 = arith.constant 0 : i32
    return %arg0, %c0_i32 : i32, i32
  }
}

module attributes {stable_mosaic.version = 11 : i64} {
  func.func @_fpn_head_kernel(%arg0: memref<32x1152xbf16, #tpu.memory_space<vmem>>, %arg1: memref<1152x256xbf16, #tpu.memory_space<vmem>>, %arg2: memref<1x256xf32, #tpu.memory_space<vmem>>, %arg3: memref<128x128xbf16, #tpu.memory_space<vmem>>, %arg4: memref<128x256xbf16, #tpu.memory_space<vmem>>, %arg5: memref<1x256xf32, #tpu.memory_space<vmem>>, %arg6: memref<512x32xbf16, #tpu.memory_space<vmem>>, %arg7: memref<32x256xbf16, #tpu.memory_space<vmem>>, %arg8: memref<1x256xf32, #tpu.memory_space<vmem>>, %arg9: memref<2x32xbf16, #tpu.memory_space<vmem>>, %arg10: memref<2x128xbf16, #tpu.memory_space<vmem>>, %arg11: memref<2x512xbf16, #tpu.memory_space<vmem>>, %arg12: memref<256x32xbf16, #tpu.memory_space<vmem>>, %arg13: memref<1x32xf32, #tpu.memory_space<vmem>>, %arg14: memref<256x32xbf16, #tpu.memory_space<vmem>>, %arg15: memref<1x32xf32, #tpu.memory_space<vmem>>, %arg16: memref<256x32xbf16, #tpu.memory_space<vmem>>, %arg17: memref<1x32xf32, #tpu.memory_space<vmem>>, %arg18: memref<32x4xbf16, #tpu.memory_space<vmem>>, %arg19: memref<32x4xbf16, #tpu.memory_space<vmem>>, %arg20: memref<32x4xbf16, #tpu.memory_space<vmem>>, %arg21: memref<1x4xf32, #tpu.memory_space<vmem>>, %arg22: memref<2x4xf32, #tpu.memory_space<vmem>>) attributes {dimension_semantics = [], scalar_prefetch = 0 : i64, scratch_operands = 0 : i64, tpu.core_type = #tpu.core_type<tc>} {
    %c0 = arith.constant 0 : index
    %c0_0 = arith.constant 0 : index
    %0 = vector.load %arg0[%c0, %c0_0] : memref<32x1152xbf16, #tpu.memory_space<vmem>>, vector<32x1152xbf16>
    %c0_1 = arith.constant 0 : index
    %c0_2 = arith.constant 0 : index
    %1 = vector.load %arg1[%c0_1, %c0_2] : memref<1152x256xbf16, #tpu.memory_space<vmem>>, vector<1152x256xbf16>
    %cst = arith.constant dense<0.000000e+00> : vector<32x256xf32>
    %2 = tpu.matmul %0, %1, %cst {dimension_numbers = #tpu.dot_dimension_numbers<[1], [0], [0], [1], [0, 0, 1, 1], [], []>} : vector<32x1152xbf16>, vector<1152x256xbf16>, vector<32x256xf32> -> vector<32x256xf32>
    %c0_3 = arith.constant 0 : index
    %c0_4 = arith.constant 0 : index
    %3 = vector.load %arg2[%c0_3, %c0_4] : memref<1x256xf32, #tpu.memory_space<vmem>>, vector<1x256xf32>
    %4 = vector.broadcast %3 : vector<1x256xf32> to vector<32x256xf32>
    %5 = arith.addf %2, %4 : vector<32x256xf32>
    %6 = math.tanh %5 : vector<32x256xf32>
    %c0_5 = arith.constant 0 : index
    %c0_6 = arith.constant 0 : index
    %7 = vector.load %arg9[%c0_5, %c0_6] : memref<2x32xbf16, #tpu.memory_space<vmem>>, vector<2x32xbf16>
    %8 = arith.truncf %6 : vector<32x256xf32> to vector<32x256xbf16>
    %cst_7 = arith.constant dense<0.000000e+00> : vector<2x256xf32>
    %9 = tpu.matmul %7, %8, %cst_7 {dimension_numbers = #tpu.dot_dimension_numbers<[1], [0], [0], [1], [0, 0, 1, 1], [], []>} : vector<2x32xbf16>, vector<32x256xbf16>, vector<2x256xf32> -> vector<2x256xf32>
    %c0_8 = arith.constant 0 : index
    %c0_9 = arith.constant 0 : index
    %10 = vector.load %arg3[%c0_8, %c0_9] : memref<128x128xbf16, #tpu.memory_space<vmem>>, vector<128x128xbf16>
    %c0_10 = arith.constant 0 : index
    %c0_11 = arith.constant 0 : index
    %11 = vector.load %arg4[%c0_10, %c0_11] : memref<128x256xbf16, #tpu.memory_space<vmem>>, vector<128x256xbf16>
    %cst_12 = arith.constant dense<0.000000e+00> : vector<128x256xf32>
    %12 = tpu.matmul %10, %11, %cst_12 {dimension_numbers = #tpu.dot_dimension_numbers<[1], [0], [0], [1], [0, 0, 1, 1], [], []>} : vector<128x128xbf16>, vector<128x256xbf16>, vector<128x256xf32> -> vector<128x256xf32>
    %c0_13 = arith.constant 0 : index
    %c0_14 = arith.constant 0 : index
    %13 = vector.load %arg5[%c0_13, %c0_14] : memref<1x256xf32, #tpu.memory_space<vmem>>, vector<1x256xf32>
    %14 = vector.broadcast %13 : vector<1x256xf32> to vector<128x256xf32>
    %15 = arith.addf %12, %14 : vector<128x256xf32>
    %cst_15 = arith.constant 0.000000e+00 : f32
    %16 = vector.broadcast %cst_15 : f32 to vector<128x256xf32>
    %17 = arith.maximumf %15, %16 : vector<128x256xf32>
    %c0_16 = arith.constant 0 : index
    %c0_17 = arith.constant 0 : index
    %18 = vector.load %arg10[%c0_16, %c0_17] : memref<2x128xbf16, #tpu.memory_space<vmem>>, vector<2x128xbf16>
    %19 = arith.truncf %17 : vector<128x256xf32> to vector<128x256xbf16>
    %cst_18 = arith.constant dense<0.000000e+00> : vector<2x256xf32>
    %20 = tpu.matmul %18, %19, %cst_18 {dimension_numbers = #tpu.dot_dimension_numbers<[1], [0], [0], [1], [0, 0, 1, 1], [], []>} : vector<2x128xbf16>, vector<128x256xbf16>, vector<2x256xf32> -> vector<2x256xf32>
    %21 = arith.addf %9, %20 : vector<2x256xf32>
    %c0_19 = arith.constant 0 : index
    %c0_20 = arith.constant 0 : index
    %22 = vector.load %arg6[%c0_19, %c0_20] : memref<512x32xbf16, #tpu.memory_space<vmem>>, vector<512x32xbf16>
    %c0_21 = arith.constant 0 : index
    %c0_22 = arith.constant 0 : index
    %23 = vector.load %arg7[%c0_21, %c0_22] : memref<32x256xbf16, #tpu.memory_space<vmem>>, vector<32x256xbf16>
    %cst_23 = arith.constant dense<0.000000e+00> : vector<512x256xf32>
    %24 = tpu.matmul %22, %23, %cst_23 {dimension_numbers = #tpu.dot_dimension_numbers<[1], [0], [0], [1], [0, 0, 1, 1], [], []>} : vector<512x32xbf16>, vector<32x256xbf16>, vector<512x256xf32> -> vector<512x256xf32>
    %c0_24 = arith.constant 0 : index
    %c0_25 = arith.constant 0 : index
    %25 = vector.load %arg8[%c0_24, %c0_25] : memref<1x256xf32, #tpu.memory_space<vmem>>, vector<1x256xf32>
    %26 = vector.broadcast %25 : vector<1x256xf32> to vector<512x256xf32>
    %27 = arith.addf %24, %26 : vector<512x256xf32>
    %cst_26 = arith.constant 0.000000e+00 : f32
    %28 = vector.broadcast %cst_26 : f32 to vector<512x256xf32>
    %29 = arith.maximumf %27, %28 : vector<512x256xf32>
    %c0_27 = arith.constant 0 : index
    %c0_28 = arith.constant 0 : index
    %30 = vector.load %arg11[%c0_27, %c0_28] : memref<2x512xbf16, #tpu.memory_space<vmem>>, vector<2x512xbf16>
    %31 = arith.truncf %29 : vector<512x256xf32> to vector<512x256xbf16>
    %cst_29 = arith.constant dense<0.000000e+00> : vector<2x256xf32>
    %32 = tpu.matmul %30, %31, %cst_29 {dimension_numbers = #tpu.dot_dimension_numbers<[1], [0], [0], [1], [0, 0, 1, 1], [], []>} : vector<2x512xbf16>, vector<512x256xbf16>, vector<2x256xf32> -> vector<2x256xf32>
    %33 = arith.addf %21, %32 : vector<2x256xf32>
    %34 = arith.truncf %9 : vector<2x256xf32> to vector<2x256xbf16>
    %c0_30 = arith.constant 0 : index
    %c0_31 = arith.constant 0 : index
    %35 = vector.load %arg12[%c0_30, %c0_31] : memref<256x32xbf16, #tpu.memory_space<vmem>>, vector<256x32xbf16>
    %cst_32 = arith.constant dense<0.000000e+00> : vector<2x32xf32>
    %36 = tpu.matmul %34, %35, %cst_32 {dimension_numbers = #tpu.dot_dimension_numbers<[1], [0], [0], [1], [0, 0, 1, 1], [], []>} : vector<2x256xbf16>, vector<256x32xbf16>, vector<2x32xf32> -> vector<2x32xf32>
    %c0_33 = arith.constant 0 : index
    %c0_34 = arith.constant 0 : index
    %37 = vector.load %arg13[%c0_33, %c0_34] : memref<1x32xf32, #tpu.memory_space<vmem>>, vector<1x32xf32>
    %38 = vector.broadcast %37 : vector<1x32xf32> to vector<2x32xf32>
    %39 = arith.addf %36, %38 : vector<2x32xf32>
    %cst_35 = arith.constant 0.000000e+00 : f32
    %40 = vector.broadcast %cst_35 : f32 to vector<2x32xf32>
    %41 = arith.maximumf %39, %40 : vector<2x32xf32>
    %42 = arith.truncf %21 : vector<2x256xf32> to vector<2x256xbf16>
    %c0_36 = arith.constant 0 : index
    %c0_37 = arith.constant 0 : index
    %43 = vector.load %arg14[%c0_36, %c0_37] : memref<256x32xbf16, #tpu.memory_space<vmem>>, vector<256x32xbf16>
    %cst_38 = arith.constant dense<0.000000e+00> : vector<2x32xf32>
    %44 = tpu.matmul %42, %43, %cst_38 {dimension_numbers = #tpu.dot_dimension_numbers<[1], [0], [0], [1], [0, 0, 1, 1], [], []>} : vector<2x256xbf16>, vector<256x32xbf16>, vector<2x32xf32> -> vector<2x32xf32>
    %c0_39 = arith.constant 0 : index
    %c0_40 = arith.constant 0 : index
    %45 = vector.load %arg15[%c0_39, %c0_40] : memref<1x32xf32, #tpu.memory_space<vmem>>, vector<1x32xf32>
    %46 = vector.broadcast %45 : vector<1x32xf32> to vector<2x32xf32>
    %47 = arith.addf %44, %46 : vector<2x32xf32>
    %cst_41 = arith.constant 0.000000e+00 : f32
    %48 = vector.broadcast %cst_41 : f32 to vector<2x32xf32>
    %49 = arith.maximumf %47, %48 : vector<2x32xf32>
    %50 = arith.truncf %33 : vector<2x256xf32> to vector<2x256xbf16>
    %c0_42 = arith.constant 0 : index
    %c0_43 = arith.constant 0 : index
    %51 = vector.load %arg16[%c0_42, %c0_43] : memref<256x32xbf16, #tpu.memory_space<vmem>>, vector<256x32xbf16>
    %cst_44 = arith.constant dense<0.000000e+00> : vector<2x32xf32>
    %52 = tpu.matmul %50, %51, %cst_44 {dimension_numbers = #tpu.dot_dimension_numbers<[1], [0], [0], [1], [0, 0, 1, 1], [], []>} : vector<2x256xbf16>, vector<256x32xbf16>, vector<2x32xf32> -> vector<2x32xf32>
    %c0_45 = arith.constant 0 : index
    %c0_46 = arith.constant 0 : index
    %53 = vector.load %arg17[%c0_45, %c0_46] : memref<1x32xf32, #tpu.memory_space<vmem>>, vector<1x32xf32>
    %54 = vector.broadcast %53 : vector<1x32xf32> to vector<2x32xf32>
    %55 = arith.addf %52, %54 : vector<2x32xf32>
    %cst_47 = arith.constant 0.000000e+00 : f32
    %56 = vector.broadcast %cst_47 : f32 to vector<2x32xf32>
    %57 = arith.maximumf %55, %56 : vector<2x32xf32>
    %58 = arith.truncf %57 : vector<2x32xf32> to vector<2x32xbf16>
    %c0_48 = arith.constant 0 : index
    %c0_49 = arith.constant 0 : index
    %59 = vector.load %arg18[%c0_48, %c0_49] : memref<32x4xbf16, #tpu.memory_space<vmem>>, vector<32x4xbf16>
    %cst_50 = arith.constant dense<0.000000e+00> : vector<2x4xf32>
    %60 = tpu.matmul %58, %59, %cst_50 {dimension_numbers = #tpu.dot_dimension_numbers<[1], [0], [0], [1], [0, 0, 1, 1], [], []>} : vector<2x32xbf16>, vector<32x4xbf16>, vector<2x4xf32> -> vector<2x4xf32>
    %61 = arith.truncf %49 : vector<2x32xf32> to vector<2x32xbf16>
    %c0_51 = arith.constant 0 : index
    %c0_52 = arith.constant 0 : index
    %62 = vector.load %arg19[%c0_51, %c0_52] : memref<32x4xbf16, #tpu.memory_space<vmem>>, vector<32x4xbf16>
    %cst_53 = arith.constant dense<0.000000e+00> : vector<2x4xf32>
    %63 = tpu.matmul %61, %62, %cst_53 {dimension_numbers = #tpu.dot_dimension_numbers<[1], [0], [0], [1], [0, 0, 1, 1], [], []>} : vector<2x32xbf16>, vector<32x4xbf16>, vector<2x4xf32> -> vector<2x4xf32>
    %64 = arith.addf %60, %63 : vector<2x4xf32>
    %65 = arith.truncf %41 : vector<2x32xf32> to vector<2x32xbf16>
    %c0_54 = arith.constant 0 : index
    %c0_55 = arith.constant 0 : index
    %66 = vector.load %arg20[%c0_54, %c0_55] : memref<32x4xbf16, #tpu.memory_space<vmem>>, vector<32x4xbf16>
    %cst_56 = arith.constant dense<0.000000e+00> : vector<2x4xf32>
    %67 = tpu.matmul %65, %66, %cst_56 {dimension_numbers = #tpu.dot_dimension_numbers<[1], [0], [0], [1], [0, 0, 1, 1], [], []>} : vector<2x32xbf16>, vector<32x4xbf16>, vector<2x4xf32> -> vector<2x4xf32>
    %68 = arith.addf %64, %67 : vector<2x4xf32>
    %c0_57 = arith.constant 0 : index
    %c0_58 = arith.constant 0 : index
    %69 = vector.load %arg21[%c0_57, %c0_58] : memref<1x4xf32, #tpu.memory_space<vmem>>, vector<1x4xf32>
    %70 = vector.broadcast %69 : vector<1x4xf32> to vector<2x4xf32>
    %71 = arith.addf %68, %70 : vector<2x4xf32>
    %cst_59 = arith.constant dense<0xFF800000> : vector<2xf32>
    %72 = vector.multi_reduction <maximumf>, %71, %cst_59 [1] : vector<2x4xf32> to vector<2xf32>
    %73 = vector.shape_cast %72 : vector<2xf32> to vector<2x1xf32>
    %74 = vector.broadcast %73 : vector<2x1xf32> to vector<2x4xf32>
    %75 = arith.subf %71, %74 : vector<2x4xf32>
    %76 = math.exp %75 : vector<2x4xf32>
    %cst_60 = arith.constant dense<0.000000e+00> : vector<2xf32>
    %77 = vector.multi_reduction <add>, %76, %cst_60 [1] : vector<2x4xf32> to vector<2xf32>
    %78 = vector.shape_cast %77 : vector<2xf32> to vector<2x1xf32>
    %79 = math.log %78 : vector<2x1xf32>
    %80 = arith.addf %79, %73 : vector<2x1xf32>
    %81 = vector.broadcast %80 : vector<2x1xf32> to vector<2x4xf32>
    %82 = arith.subf %71, %81 : vector<2x4xf32>
    %c0_61 = arith.constant 0 : index
    %c0_62 = arith.constant 0 : index
    %83 = vector.load %arg22[%c0_61, %c0_62] : memref<2x4xf32, #tpu.memory_space<vmem>>, vector<2x4xf32>
    tpu.vector_store %arg22[%c0_61, %c0_62], %82 {strides = array<i32>} : memref<2x4xf32, #tpu.memory_space<vmem>>, vector<2x4xf32>,
    return
  }
}

</mosaic_0001>

<bundles_post_ra>
// kernel: _lambda_.3
= control target key start
LH: loop header
LB: loop body
LE: loop exit
PB: predicated region body
PF: predicated region fallthrough
CT: control target
= control target key end

     0   :  { %s1087_s12 = smov 0   ;;  %s1260_s0 = inlined_call_operand.vmem [shape: bf16[512,56], index: 0, kind: input, shape index: {}]   ;;  %s1261_s1 = inlined_call_operand.vmem [shape: bf16[56,32], index: 1, kind: input, shape index: {}]   ;;  %s1262_s2 = inlined_call_operand.vmem [shape: f32[1,32], index: 2, kind: input, shape index: {}]   ;;  %s1263_s3 = inlined_call_operand.vmem [shape: bf16[512,32], index: 3, kind: output, shape index: {}]  }
   0x1 LB: > { %s785_s13 = sadd.s32 4294967295, %s1065_s12   ;;  %p789_p0 = scmp.ge.s32.totalorder %s1065_s12, 1  ;;  %s1065_s12 = sphi %s1087_s12, %s13_s12  }
   0x2   : > { %p138_p1 = scmp.lt.s32.totalorder %s1065_s12, 3 }
   0x4   : > { %p139_p2 = pnand %p789_p0, %p138_p1 }
   0x5   : > { %v975_v0 = vld [vmem:[%s1261_s1] sm:$0xff] (!%p139_p2)   ;;  %v976_v1 = vld [vmem:[%s1261_s1 + $0x8] sm:$0xff] (!%p139_p2)   ;;  %s790_s18 = sshll.u32 (!%p139_p2), %s785_s13, 5  ;;  %v977_v2 = vld [vmem:[%s1261_s1 + $0x10] sm:$0xff] (!%p139_p2)   ;;  %vm322_vm0 = vcmask (!%p139_p2), 457728   ;;  %vm371_vm1 = vcmask (!%p139_p2), 1043456  }
   0x6   : > { %142 = sbr.rel (%p139_p2) target bundleno = 284 (0x11c), region = 32  ;;  %917 = vmatprep.subr.bf16.mxu0 (!%p139_p2), %v975_v0  ;;  %957 = vmatprep.subr.bf16.mxu1 (!%p139_p2), %v975_v0  ;;  %p163_p3 = scmp.lt.s32.totalorder (!%p139_p2), %s790_s18, 63  ;;  %v978_v3 = vld [vmem:[%s1261_s1 + $0x18] ss:$0 sps:$4 sm:$0xff] (!%p139_p2)   ;;  %v1152_v21 = vld [vmem:[%s1262_s2] ss:$0 sm:$0xff] (!%p139_p2) }
   0x7   : > { %918 = vmatpush3.bf16.msra.mxu0 (!%p139_p2), %v975_v0  ;;  %961 = vmatpush3.bf16.msra.mxu1 (!%p139_p2), %v975_v0  ;;  %v373_v6 = vsel (!%p139_p2), %vm371_vm1, %v978_v3, 0  ;;  %vm696_vm2 = vcmask (!%p139_p2), 257024  }
   0x8   : > { %919 = vmatprep.subr.bf16.mxu0 (!%p139_p2), %v976_v1  ;;  %958 = vmatprep.subr.bf16.mxu1 (!%p139_p2), %v976_v1 }
   0xb   : > { %920 = vmatpush3.bf16.msra.mxu0 (!%p139_p2), %v976_v1  ;;  %962 = vmatpush3.bf16.msra.mxu1 (!%p139_p2), %v976_v1 }
   0xc   : > { %921 = vmatprep.subr.bf16.mxu0 (!%p139_p2), %v977_v2  ;;  %959 = vmatprep.subr.bf16.mxu1 (!%p139_p2), %v977_v2 }
   0xd   : > { %s1265_s18 = smov (!%p163_p3, %s790_s18), 63 }
   0xe   : > { %s791_s21 = sshll.u32 %s1265_s18, 2 }
   0xf   : > { %s1115_s26 = scalar_lea.vmem %s1260_s0, %s791_s21  ;;  %922 = vmatpush3.bf16.msra.mxu0 %v977_v2  ;;  %963 = vmatpush3.bf16.msra.mxu1 %v977_v2  ;;  %s1173_s4 = scalar_lea.vmem %s1263_s3, %s791_s21 }
  0x10   : > { %v979_v4 = vld [vmem:[%s1115_s26] sm:$0xff]   ;;  %965 = vmatprep.subr.msk.bf16.mxu0 %vm371_vm1, %v978_v3  ;;  %966 = vmatprep.subr.msk.bf16.mxu1 %vm371_vm1, %v978_v3  ;;  %v981_v7 = vld [vmem:[%s1115_s26 + $0x8] sm:$0xff]   ;;  %v983_v9 = vld [vmem:[%s1115_s26 + $0x10] sm:$0xff]  }
  0x11   : > { %v980_v5 = vld [vmem:[%s1115_s26 + $0x40] sm:$0xff]   ;;  %925 = vmatprep.mubr.msk.bf16.mxu0 %vm322_vm0, %v979_v4  ;;  %v982_v8 = vld [vmem:[%s1115_s26 + $0x48] sm:$0xff]   ;;  %v984_v10 = vld [vmem:[%s1115_s26 + $0x50] sm:$0xff]  }
  0x12   : > { %941 = vmatprep.mubr.msk.bf16.mxu1 %vm322_vm0, %v980_v5  ;;  %v985_v11 = vld [vmem:[%s1115_s26 + $0x18] sm:$0xff]   ;;  %v987_v13 = vld [vmem:[%s1115_s26 + $0x20] sm:$0xff]   ;;  %v989_v15 = vld [vmem:[%s1115_s26 + $0x28] sm:$0xff]  }
  0x13   : > { %924 = vmatpush3.bf16.msra.mxu0 %v373_v6  ;;  %964 = vmatpush3.bf16.msra.mxu1 %v373_v6  ;;  %v986_v12 = vld [vmem:[%s1115_s26 + $0x58] sm:$0xff]   ;;  %v988_v14 = vld [vmem:[%s1115_s26 + $0x60] sm:$0xff]   ;;  %v990_v16 = vld [vmem:[%s1115_s26 + $0x68] sm:$0xff]  }
  0x14   : > { %v991_v17 = vld [vmem:[%s1115_s26 + $0x30] sm:$0xff]   ;;  %v993_v19 = vld [vmem:[%s1115_s26 + $0x38] sm:$0xff]  }
  0x15   : > { %v992_v18 = vld [vmem:[%s1115_s26 + $0x70] sm:$0xff]   ;;  %v994_v20 = vld [vmem:[%s1115_s26 + $0x78] sm:$0xff]  }
  0x16   : > { %926 = vmatmul.mubr.msk.bf16.vlgmr.msra.gmra.mrb[0].mxu0 %vm322_vm0, %v981_v7  ;;  %942 = vmatmul.mubr.msk.bf16.vlgmr.msra.gmra.mrb[0].mxu1 %vm322_vm0, %v982_v8 }
  0x17   : > { %929 = vmatprep.mubr.msk.bf16.mxu0 %vm322_vm0, %v983_v9  ;;  %945 = vmatprep.mubr.msk.bf16.mxu1 %vm322_vm0, %v984_v10 }
  0x1e   : > { %930 = vmatmul.mubr.msk.bf16.gmra.mrb[4].mxu0 %vm322_vm0, %v985_v11  ;;  %946 = vmatmul.mubr.msk.bf16.gmra.mrb[4].mxu1 %vm322_vm0, %v986_v12 }
  0x1f   : > { %933 = vmatprep.mubr.msk.bf16.mxu0 %vm322_vm0, %v987_v13  ;;  %949 = vmatprep.mubr.msk.bf16.mxu1 %vm322_vm0, %v988_v14 }
  0x26   : > { %934 = vmatmul.mubr.msk.bf16.gmra.mrb[8].mxu0 %vm322_vm0, %v989_v15  ;;  %950 = vmatmul.mubr.msk.bf16.gmra.mrb[8].mxu1 %vm322_vm0, %v990_v16 }
  0x27   : > { %937 = vmatprep.mubr.msk.bf16.mxu0 %vm322_vm0, %v991_v17  ;;  %953 = vmatprep.mubr.msk.bf16.mxu1 %vm322_vm0, %v992_v18 }
  0x2e   : > { %938 = vmatmul.mubr.msk.bf16.gmra.mrb[12].mxu0 %vm322_vm0, %v993_v19  ;;  %954 = vmatmul.mubr.msk.bf16.gmra.mrb[12].mxu1 %vm322_vm0, %v994_v20 }
  0xe9   : > { %v927_v22 = vpop.f32.mrb[0].mxu0  ;;  %v943_v23 = vpop.f32.mrb[0].mxu1 }
  0xea   : > { %v418_v24 = vadd.f32 %v927_v22, %v1152_v21  ;;  %v482_v25 = vadd.f32 %v943_v23, %v1152_v21  ;;  %v409_v26 = vpop.f32.mrb[1].mxu0  ;;  %v473_v27 = vpop.f32.mrb[1].mxu1 }
  0xeb   : > { %v410_v28 = vadd.f32 %v1152_v21, %v409_v26  ;;  %v474_v29 = vadd.f32 %v1152_v21, %v473_v27  ;;  %v928_v30 = vpop.f32.mrb[2].mxu0  ;;  %v944_v31 = vpop.f32.mrb[2].mxu1 }
  0xec   : > { %995 = vtanh.f32 %v418_v24  ;;  %v421_v32 = vadd.f32 %v928_v30, %v1152_v21  ;;  %v412_v33 = vpop.f32.mrb[3].mxu0  ;;  %v476_v34 = vpop.f32.mrb[3].mxu1  ;;  %v485_v35 = vadd.f32 %v944_v31, %v1152_v21 }
  0xed   : > { %997 = vtanh.f32 %v482_v25  ;;  %v413_v36 = vadd.f32 %v1152_v21, %v412_v33  ;;  %v477_v37 = vadd.f32 %v1152_v21, %v476_v34 }
  0xee   : > { %999 = vtanh.f32 %v410_v28 }
  0xef   : > { %1001 = vtanh.f32 %v474_v29 }
  0xf0   : > { %1003 = vtanh.f32 %v421_v32 }
  0xf1   : > { %1005 = vtanh.f32 %v485_v35  ;;  %v931_v38 = vpop.f32.mrb[4].mxu0  ;;  %v947_v39 = vpop.f32.mrb[4].mxu1 }
  0xf2   : > { %1007 = vtanh.f32 %v413_v36  ;;  %v434_v40 = vadd.f32 %v931_v38, %v1152_v21  ;;  %v498_v41 = vadd.f32 %v947_v39, %v1152_v21  ;;  %v425_v42 = vpop.f32.mrb[5].mxu0  ;;  %v489_v43 = vpop.f32.mrb[5].mxu1 }
  0xf3   : > { %1009 = vtanh.f32 %v477_v37  ;;  %v426_v44 = vadd.f32 %v1152_v21, %v425_v42  ;;  %v490_v45 = vadd.f32 %v1152_v21, %v489_v43  ;;  %v932_v46 = vpop.f32.mrb[6].mxu0  ;;  %v948_v47 = vpop.f32.mrb[6].mxu1 }
  0xf4   : > { %1011 = vtanh.f32 %v434_v40  ;;  %v437_v48 = vadd.f32 %v932_v46, %v1152_v21  ;;  %v428_v49 = vpop.f32.mrb[7].mxu0  ;;  %v492_v50 = vpop.f32.mrb[7].mxu1  ;;  %v501_v51 = vadd.f32 %v948_v47, %v1152_v21 }
  0xf5   : > { %1013 = vtanh.f32 %v498_v41  ;;  %v429_v53 = vadd.f32 %v1152_v21, %v428_v49  ;;  %v493_v56 = vadd.f32 %v1152_v21, %v492_v50 }
  0xf6   : > { %v996_v52 = vpop.eup %995  ;;  %1015 = vtanh.f32 %v426_v44 }
  0xf7   : > { %v998_v54 = vpop.eup %997  ;;  %v867_v55 = vpack.c.bf16 %v996_v52, %v996_v52  ;;  %1017 = vtanh.f32 %v490_v45 }
  0xf8   : > { %v1000_v57 = vpop.eup %999  ;;  %v883_v58 = vpack.c.bf16 %v998_v54, %v998_v54  ;;  %1019 = vtanh.f32 %v437_v48 }
  0xf9   : > { %v1002_v59 = vpop.eup %1001  ;;  %699 = vst.msk [vmem:[%s1173_s4 + $0x8] sm:$0xf] %vm696_vm2, %v867_v55  ;;  %v865_v60 = vpack.c.bf16 %v1000_v57, %v1000_v57  ;;  %1021 = vtanh.f32 %v501_v51  ;;  %v935_v61 = vpop.f32.mrb[8].mxu0 }
  0xfa   : > { %v951_v62 = vpop.f32.mrb[8].mxu1  ;;  %v1004_v63 = vpop.eup %1003  ;;  %715 = vst.msk [vmem:[%s1173_s4 + $0x48] sm:$0xf] %vm696_vm2, %v883_v58  ;;  %v881_v0 = vpack.c.bf16 %v1002_v59, %v1002_v59  ;;  %1023 = vtanh.f32 %v429_v53  ;;  %v450_v1 = vadd.f32 %v935_v61, %v1152_v21 }
  0xfb   : > { %v514_v2 = vadd.f32 %v951_v62, %v1152_v21  ;;  %v441_v3 = vpop.f32.mrb[9].mxu0  ;;  %v505_v4 = vpop.f32.mrb[9].mxu1  ;;  %697 = vst.msk [vmem:[%s1173_s4] sm:$0xf] %vm696_vm2, %v865_v60  ;;  %v868_v6 = vpack.c.bf16 %v1004_v63, %v1004_v63  ;;  %1025 = vtanh.f32 %v493_v56 }
  0xfc   : > { %v1006_v5 = vpop.eup %1005  ;;  %v442_v7 = vadd.f32 %v1152_v21, %v441_v3  ;;  %v506_v8 = vadd.f32 %v1152_v21, %v505_v4  ;;  %v936_v9 = vpop.f32.mrb[10].mxu0  ;;  %713 = vst.msk [vmem:[%s1173_s4 + $0x40] sm:$0xf] %vm696_vm2, %v881_v0  ;;  %1027 = vtanh.f32 %v450_v1 }
  0xfd   : > { %v952_v10 = vpop.f32.mrb[10].mxu1  ;;  %v1008_v11 = vpop.eup %1007  ;;  %v884_v12 = vpack.c.bf16 %v1006_v5, %v1006_v5  ;;  %v453_v13 = vadd.f32 %v936_v9, %v1152_v21  ;;  %700 = vst.msk [vmem:[%s1173_s4 + $0xc] sm:$0xf] %vm696_vm2, %v868_v6  ;;  %1029 = vtanh.f32 %v514_v2 }
  0xfe   : > { %v444_v14 = vpop.f32.mrb[11].mxu0  ;;  %v508_v15 = vpop.f32.mrb[11].mxu1  ;;  %v866_v17 = vpack.c.bf16 %v1008_v11, %v1008_v11  ;;  %v517_v18 = vadd.f32 %v952_v10, %v1152_v21  ;;  %1031 = vtanh.f32 %v442_v7 }
  0xff   : > { %v1010_v16 = vpop.eup %1009  ;;  %716 = vst.msk [vmem:[%s1173_s4 + $0x4c] sm:$0xf] %vm696_vm2, %v884_v12  ;;  %v445_v22 = vadd.f32 %v1152_v21, %v444_v14  ;;  %1033 = vtanh.f32 %v506_v8  ;;  %v509_v25 = vadd.f32 %v1152_v21, %v508_v15 }
 0x100   : > { %v1012_v19 = vpop.eup %1011  ;;  %v882_v20 = vpack.c.bf16 %v1010_v16, %v1010_v16  ;;  %698 = vst.msk [vmem:[%s1173_s4 + $0x4] sm:$0xf] %vm696_vm2, %v866_v17  ;;  %1035 = vtanh.f32 %v453_v13 }
 0x101   : > { %v1014_v23 = vpop.eup %1013  ;;  %v871_v24 = vpack.c.bf16 %v1012_v19, %v1012_v19  ;;  %1037 = vtanh.f32 %v517_v18  ;;  %v939_v30 = vpop.f32.mrb[12].mxu0 }
 0x102   : > { %v1016_v26 = vpop.eup %1015  ;;  %714 = vst.msk [vmem:[%s1173_s4 + $0x44] sm:$0xf] %vm696_vm2, %v882_v20  ;;  %v887_v27 = vpack.c.bf16 %v1014_v23, %v1014_v23  ;;  %v955_v31 = vpop.f32.mrb[12].mxu1  ;;  %1039 = vtanh.f32 %v445_v22  ;;  %v466_v34 = vadd.f32 %v939_v30, %v1152_v21 }
 0x103   : > { %v1018_v28 = vpop.eup %1017  ;;  %703 = vst.msk [vmem:[%s1173_s4 + $0x18] sm:$0xf] %vm696_vm2, %v871_v24  ;;  %v869_v29 = vpack.c.bf16 %v1016_v26, %v1016_v26  ;;  %v530_v35 = vadd.f32 %v955_v31, %v1152_v21  ;;  %v457_v36 = vpop.f32.mrb[13].mxu0  ;;  %1041 = vtanh.f32 %v509_v25 }
 0x104   : > { %v1020_v32 = vpop.eup %1019  ;;  %719 = vst.msk [vmem:[%s1173_s4 + $0x58] sm:$0xf] %vm696_vm2, %v887_v27  ;;  %v885_v33 = vpack.c.bf16 %v1018_v28, %v1018_v28  ;;  %v521_v37 = vpop.f32.mrb[13].mxu1  ;;  %v458_v40 = vadd.f32 %v1152_v21, %v457_v36  ;;  %1043 = vtanh.f32 %v466_v34 }
 0x105   : > { %v1022_v38 = vpop.eup %1021  ;;  %701 = vst.msk [vmem:[%s1173_s4 + $0x10] sm:$0xf] %vm696_vm2, %v869_v29  ;;  %v872_v39 = vpack.c.bf16 %v1020_v32, %v1020_v32  ;;  %v522_v41 = vadd.f32 %v1152_v21, %v521_v37  ;;  %v940_v42 = vpop.f32.mrb[14].mxu0  ;;  %1045 = vtanh.f32 %v530_v35 }
 0x106   : > { %v956_v43 = vpop.f32.mrb[14].mxu1  ;;  %v1024_v44 = vpop.eup %1023  ;;  %717 = vst.msk [vmem:[%s1173_s4 + $0x50] sm:$0xf] %vm696_vm2, %v885_v33  ;;  %v888_v45 = vpack.c.bf16 %v1022_v38, %v1022_v38  ;;  %v469_v46 = vadd.f32 %v940_v42, %v1152_v21  ;;  %1047 = vtanh.f32 %v458_v40 }
 0x107   : > { %v460_v47 = vpop.f32.mrb[15].mxu0  ;;  %v524_v48 = vpop.f32.mrb[15].mxu1  ;;  %704 = vst.msk [vmem:[%s1173_s4 + $0x1c] sm:$0xf] %vm696_vm2, %v872_v39  ;;  %v870_v50 = vpack.c.bf16 %v1024_v44, %v1024_v44  ;;  %v533_v51 = vadd.f32 %v956_v43, %v1152_v21  ;;  %1049 = vtanh.f32 %v522_v41 }
 0x108   : > { %v1026_v49 = vpop.eup %1025  ;;  %720 = vst.msk [vmem:[%s1173_s4 + $0x5c] sm:$0xf] %vm696_vm2, %v888_v45  ;;  %v461_v54 = vadd.f32 %v1152_v21, %v460_v47  ;;  %v525_v57 = vadd.f32 %v1152_v21, %v524_v48  ;;  %1051 = vtanh.f32 %v469_v46 }
 0x109   : > { %v1028_v52 = vpop.eup %1027  ;;  %v886_v53 = vpack.c.bf16 %v1026_v49, %v1026_v49  ;;  %702 = vst.msk [vmem:[%s1173_s4 + $0x14] sm:$0xf] %vm696_vm2, %v870_v50  ;;  %1053 = vtanh.f32 %v533_v51 }
 0x10a   : > { %v1030_v55 = vpop.eup %1029  ;;  %v875_v56 = vpack.c.bf16 %v1028_v52, %v1028_v52  ;;  %1055 = vtanh.f32 %v461_v54 }
 0x10b   : > { %v1032_v58 = vpop.eup %1031  ;;  %718 = vst.msk [vmem:[%s1173_s4 + $0x54] sm:$0xf] %vm696_vm2, %v886_v53  ;;  %v891_v59 = vpack.c.bf16 %v1030_v55, %v1030_v55  ;;  %1057 = vtanh.f32 %v525_v57 }
 0x10c   : > { %v1034_v60 = vpop.eup %1033  ;;  %707 = vst.msk [vmem:[%s1173_s4 + $0x28] sm:$0xf] %vm696_vm2, %v875_v56  ;;  %v873_v61 = vpack.c.bf16 %v1032_v58, %v1032_v58 }
 0x10d   : > { %v1036_v62 = vpop.eup %1035  ;;  %723 = vst.msk [vmem:[%s1173_s4 + $0x68] sm:$0xf] %vm696_vm2, %v891_v59  ;;  %v889_v63 = vpack.c.bf16 %v1034_v60, %v1034_v60 }
 0x10e   : > { %v1038_v21 = vpop.eup %1037  ;;  %705 = vst.msk [vmem:[%s1173_s4 + $0x20] sm:$0xf] %vm696_vm2, %v873_v61  ;;  %v876_v0 = vpack.c.bf16 %v1036_v62, %v1036_v62 }
 0x10f   : > { %v1040_v1 = vpop.eup %1039  ;;  %721 = vst.msk [vmem:[%s1173_s4 + $0x60] sm:$0xf] %vm696_vm2, %v889_v63  ;;  %v892_v2 = vpack.c.bf16 %v1038_v21, %v1038_v21 }
 0x110   : > { %v1042_v3 = vpop.eup %1041  ;;  %708 = vst.msk [vmem:[%s1173_s4 + $0x2c] sm:$0xf] %vm696_vm2, %v876_v0  ;;  %v874_v4 = vpack.c.bf16 %v1040_v1, %v1040_v1 }
 0x111   : > { %v1044_v5 = vpop.eup %1043  ;;  %724 = vst.msk [vmem:[%s1173_s4 + $0x6c] sm:$0xf] %vm696_vm2, %v892_v2  ;;  %v890_v6 = vpack.c.bf16 %v1042_v3, %v1042_v3 }
 0x112   : > { %v1046_v7 = vpop.eup %1045  ;;  %706 = vst.msk [vmem:[%s1173_s4 + $0x24] sm:$0xf] %vm696_vm2, %v874_v4  ;;  %v879_v8 = vpack.c.bf16 %v1044_v5, %v1044_v5 }
 0x113   : > { %v1048_v9 = vpop.eup %1047  ;;  %722 = vst.msk [vmem:[%s1173_s4 + $0x64] sm:$0xf] %vm696_vm2, %v890_v6  ;;  %v895_v10 = vpack.c.bf16 %v1046_v7, %v1046_v7 }
 0x114   : > { %v1050_v11 = vpop.eup %1049  ;;  %711 = vst.msk [vmem:[%s1173_s4 + $0x38] sm:$0xf] %vm696_vm2, %v879_v8  ;;  %v877_v12 = vpack.c.bf16 %v1048_v9, %v1048_v9 }
 0x115   : > { %v1052_v13 = vpop.eup %1051  ;;  %727 = vst.msk [vmem:[%s1173_s4 + $0x78] sm:$0xf] %vm696_vm2, %v895_v10  ;;  %v893_v14 = vpack.c.bf16 %v1050_v11, %v1050_v11 }
 0x116   : > { %v1054_v15 = vpop.eup %1053  ;;  %709 = vst.msk [vmem:[%s1173_s4 + $0x30] sm:$0xf] %vm696_vm2, %v877_v12  ;;  %v880_v16 = vpack.c.bf16 %v1052_v13, %v1052_v13 }
 0x117   : > { %v1056_v17 = vpop.eup %1055  ;;  %725 = vst.msk [vmem:[%s1173_s4 + $0x70] sm:$0xf] %vm696_vm2, %v893_v14  ;;  %v896_v18 = vpack.c.bf16 %v1054_v15, %v1054_v15 }
 0x118   : > { %v1058_v19 = vpop.eup %1057  ;;  %712 = vst.msk [vmem:[%s1173_s4 + $0x3c] sm:$0xf] %vm696_vm2, %v880_v16  ;;  %v878_v20 = vpack.c.bf16 %v1056_v17, %v1056_v17 }
 0x119   : > { %728 = vst.msk [vmem:[%s1173_s4 + $0x7c] sm:$0xf] %vm696_vm2, %v896_v18  ;;  %v894_v22 = vpack.c.bf16 %v1058_v19, %v1058_v19 }
 0x11a   : > { %710 = vst.msk [vmem:[%s1173_s4 + $0x34] sm:$0xf] %vm696_vm2, %v878_v20 }
 0x11b   : > { %726 = vst.msk [vmem:[%s1173_s4 + $0x74] sm:$0xf] %vm696_vm2, %v894_v22 }
 0x11c PF: > { %s13_s12 = sadd.s32 1, %s1065_s12  }
 0x11d   : > { %p10_p4 = scmp.ge.s32.totalorder %s13_s12, 4  }
 0x11f   :  { %12 = sbr.rel (!%p10_p4) target bundleno = 1 (0x1), region = 62 }

// kernel: _lambda_.4
= control target key start
LH: loop header
LB: loop body
LE: loop exit
PB: predicated region body
PF: predicated region fallthrough
CT: control target
= control target key end

     0   :  { %vm766_vm0 = vcmask 261120   ;;  %s2312_s1 = inlined_call_operand.vmem [shape: bf16[800,128], index: 1, kind: input, shape index: {}]   ;;  %s2313_s0 = inlined_call_operand.vmem [shape: bf16[128,800], index: 0, kind: input, shape index: {}]   ;;  %s2314_s2 = inlined_call_operand.vmem [shape: f32[1,128], index: 2, kind: input, shape index: {}]   ;;  %s2315_s3 = inlined_call_operand.vmem [shape: bf16[128,128], index: 3, kind: output, shape index: {}]  }
   0x1   :  { %v1711_v0 = vld [vmem:[%s2312_s1 + $0x40] sm:$0xff]   ;;  %v1715_v4 = vld [vmem:[%s2312_s1 + $0x48] sm:$0xff]   ;;  %v1719_v8 = vld [vmem:[%s2312_s1 + $0x50] sm:$0xff]  }
   0x2   :  { %v1712_v1 = vld [vmem:[%s2312_s1 + $0xc0] sm:$0xff]   ;;  %1473 = vmatprep.subr.bf16.mxu0 %v1711_v0  ;;  %v1716_v5 = vld [vmem:[%s2312_s1 + $0xc8] sm:$0xff]   ;;  %v1720_v9 = vld [vmem:[%s2312_s1 + $0xd0] sm:$0xff]  }
   0x3   :  { %v1713_v2 = vld [vmem:[%s2312_s1] sm:$0xff]   ;;  %1537 = vmatprep.subr.bf16.mxu1 %v1712_v1  ;;  %v1717_v6 = vld [vmem:[%s2312_s1 + $0x8] sm:$0xff]   ;;  %v1721_v10 = vld [vmem:[%s2312_s1 + $0x10] sm:$0xff]  }
   0x4   :  { %v1714_v3 = vld [vmem:[%s2312_s1 + $0x80] sm:$0xff]   ;;  %1474 = vmatpush3.bf16.msra.mxu0 %v1713_v2  ;;  %v1718_v7 = vld [vmem:[%s2312_s1 + $0x88] sm:$0xff]   ;;  %v1722_v11 = vld [vmem:[%s2312_s1 + $0x90] sm:$0xff]  }
   0x5   :  { %1538 = vmatpush3.bf16.msra.mxu1 %v1714_v3  ;;  %1475 = vmatprep.subr.bf16.mxu0 %v1715_v4  ;;  %v1723_v12 = vld [vmem:[%s2312_s1 + $0x58] sm:$0xff]   ;;  %v1727_v16 = vld [vmem:[%s2312_s1 + $0x60] sm:$0xff]   ;;  %v1731_v20 = vld [vmem:[%s2312_s1 + $0x68] sm:$0xff]  }
   0x6   :  { %1539 = vmatprep.subr.bf16.mxu1 %v1716_v5  ;;  %v1724_v13 = vld [vmem:[%s2312_s1 + $0xd8] sm:$0xff]   ;;  %v1728_v17 = vld [vmem:[%s2312_s1 + $0xe0] sm:$0xff]   ;;  %v1732_v21 = vld [vmem:[%s2312_s1 + $0xe8] sm:$0xff]  }
   0x7   :  { %v1725_v14 = vld [vmem:[%s2312_s1 + $0x18] sm:$0xff]   ;;  %v1729_v18 = vld [vmem:[%s2312_s1 + $0x20] sm:$0xff]   ;;  %v1733_v22 = vld [vmem:[%s2312_s1 + $0x28] sm:$0xff]  }
   0x8   :  { %1476 = vmatpush3.bf16.msra.mxu0 %v1717_v6  ;;  %v1726_v15 = vld [vmem:[%s2312_s1 + $0x98] sm:$0xff]   ;;  %v1730_v19 = vld [vmem:[%s2312_s1 + $0xa0] sm:$0xff]   ;;  %v1734_v23 = vld [vmem:[%s2312_s1 + $0xa8] sm:$0xff]  }
   0x9   :  { %1540 = vmatpush3.bf16.msra.mxu1 %v1718_v7  ;;  %1477 = vmatprep.subr.bf16.mxu0 %v1719_v8  ;;  %v1735_v24 = vld [vmem:[%s2312_s1 + $0x70] sm:$0xff]   ;;  %v1739_v28 = vld [vmem:[%s2312_s1 + $0x78] sm:$0xff]   ;;  %v1745_v33 = vld [vmem:[%s2313_s0 + $0x4] ss:$28 sps:$4 sm:$0xff]  }
   0xa   :  { %1541 = vmatprep.subr.bf16.mxu1 %v1720_v9  ;;  %v1736_v25 = vld [vmem:[%s2312_s1 + $0xf0] sm:$0xff]   ;;  %v1740_v29 = vld [vmem:[%s2312_s1 + $0xf8] sm:$0xff]   ;;  %v1746_v34 = vld [vmem:[%s2313_s0 + $0x8] ss:$28 sps:$4 sm:$0xff]   ;;  %823 = vmatprep.mubr.bf16.mxu0 %v1745_v33 }
   0xb   :  { %v1737_v26 = vld [vmem:[%s2312_s1 + $0x30] sm:$0xff]   ;;  %v1741_v30 = vld [vmem:[%s2312_s1 + $0x38] sm:$0xff]   ;;  %v1748_v35 = vld [vmem:[%s2313_s0 + $0xc] ss:$28 sps:$4 sm:$0xff]  }
   0xc   :  { %1478 = vmatpush3.bf16.msra.mxu0 %v1721_v10  ;;  %v1738_v27 = vld [vmem:[%s2312_s1 + $0xb0] sm:$0xff]   ;;  %v1742_v31 = vld [vmem:[%s2312_s1 + $0xb8] sm:$0xff]   ;;  %v1749_v36 = vld [vmem:[%s2312_s1 + $0x140] sm:$0xff]   ;;  %920 = vmatprep.mubr.bf16.mxu1 %v1748_v35 }
   0xd   :  { %1542 = vmatpush3.bf16.msra.mxu1 %v1722_v11  ;;  %1479 = vmatprep.subr.bf16.mxu0 %v1723_v12  ;;  %v1743_v32 = vld [vmem:[%s2313_s0] ss:$28 sps:$4 sm:$0xff]   ;;  %v1755_v40 = vld [vmem:[%s2313_s0 + $0x38] ss:$28 sps:$4 sm:$0xff]   ;;  %v1757_v42 = vld [vmem:[%s2312_s1 + $0x148] sm:$0xff]  }
   0xe   :  { %1543 = vmatprep.subr.bf16.mxu1 %v1724_v13  ;;  %v1750_v37 = vld [vmem:[%s2312_s1 + $0x100] sm:$0xff]   ;;  %v1751_v38 = vld [vmem:[%s2313_s0 + $0x3c] ss:$28 sps:$4 sm:$0xff]   ;;  %v1758_v43 = vld [vmem:[%s2312_s1 + $0x108] sm:$0xff]  }
   0xf   :  { %v1753_v39 = vld [vmem:[%s2313_s0 + $0x44] ss:$28 sps:$4 sm:$0xff]   ;;  %v1759_v44 = vld [vmem:[%s2313_s0 + $0x74] ss:$28 sps:$4 sm:$0xff]   ;;  %v1761_v45 = vld [vmem:[%s2313_s0 + $0x7c] ss:$28 sps:$4 sm:$0xff]  }
  0x10   :  { %1480 = vmatpush3.bf16.msra.mxu0 %v1725_v14  ;;  %v1756_v41 = vld [vmem:[%s2313_s0 + $0x40] ss:$28 sps:$4 sm:$0xff]   ;;  %v1765_v46 = vld [vmem:[%s2312_s1 + $0x150] sm:$0xff]   ;;  %v1767_v50 = vld [vmem:[%s2313_s0 + $0xac] ss:$28 sps:$4 sm:$0xff]  }
  0x11   :  { %1544 = vmatpush3.bf16.msra.mxu1 %v1726_v15  ;;  %1481 = vmatprep.subr.bf16.mxu0 %v1727_v16  ;;  %v1766_v47 = vld [vmem:[%s2312_s1 + $0x110] sm:$0xff]   ;;  %v1773_v52 = vld [vmem:[%s2312_s1 + $0x158] sm:$0xff]   ;;  %v1781_v54 = vld [vmem:[%s2312_s1 + $0x160] sm:$0xff]  }
  0x12   :  { %1545 = vmatprep.subr.bf16.mxu1 %v1728_v17  ;;  %v1763_v48 = vld [vmem:[%s2313_s0 + $0x70] ss:$28 sps:$4 sm:$0xff]   ;;  %v1764_v49 = vld [vmem:[%s2313_s0 + $0x78] ss:$28 sps:$4 sm:$0xff]   ;;  %v1782_v55 = vld [vmem:[%s2312_s1 + $0x120] sm:$0xff]  }
  0x13   :  { %v1769_v51 = vld [vmem:[%s2313_s0 + $0xb4] ss:$28 sps:$4 sm:$0xff]   ;;  %v1774_v53 = vld [vmem:[%s2312_s1 + $0x118] sm:$0xff]   ;;  %v1771_v56 = vld [vmem:[%s2313_s0 + $0xa8] ss:$28 sps:$4 sm:$0xff]  }
  0x14   :  { %1482 = vmatpush3.bf16.msra.mxu0 %v1729_v18  ;;  %v1772_v57 = vld [vmem:[%s2313_s0 + $0xb0] ss:$28 sps:$4 sm:$0xff]   ;;  %v1775_v58 = vld [vmem:[%s2313_s0 + $0xe4] ss:$28 sps:$4 sm:$0xff]   ;;  %v1783_v2 = vld [vmem:[%s2313_s0 + $0x11c] ss:$28 sps:$4 sm:$0xff]  }
  0x15   :  { %1546 = vmatpush3.bf16.msra.mxu1 %v1730_v19  ;;  %1483 = vmatprep.subr.bf16.mxu0 %v1731_v20  ;;  %v1777_v59 = vld [vmem:[%s2313_s0 + $0xec] ss:$28 sps:$4 sm:$0xff]   ;;  %v1779_v62 = vld [vmem:[%s2313_s0 + $0xe0] ss:$28 sps:$4 sm:$0xff]   ;;  %v1797_v0 = vld [vmem:[%s2312_s1 + $0x170] sm:$0xff]  }
  0x16   :  { %1547 = vmatprep.subr.bf16.mxu1 %v1732_v21  ;;  %v1789_v60 = vld [vmem:[%s2312_s1 + $0x168] sm:$0xff]   ;;  %v1798_v1 = vld [vmem:[%s2312_s1 + $0x130] sm:$0xff]   ;;  %v1785_v3 = vld [vmem:[%s2313_s0 + $0x124] ss:$28 sps:$4 sm:$0xff]  }
  0x17   :  { %v1790_v61 = vld [vmem:[%s2312_s1 + $0x128] sm:$0xff]   ;;  %v1805_v4 = vld [vmem:[%s2312_s1 + $0x178] sm:$0xff]   ;;  %v1813_v8 = vld [vmem:[%s2312_s1 + $0x180] sm:$0xff]  }
  0x18   :  { %1484 = vmatpush3.bf16.msra.mxu0 %v1733_v22  ;;  %v1780_v63 = vld [vmem:[%s2313_s0 + $0xe8] ss:$28 sps:$4 sm:$0xff]   ;;  %v1806_v5 = vld [vmem:[%s2312_s1 + $0x138] sm:$0xff]   ;;  %v1791_v9 = vld [vmem:[%s2313_s0 + $0x154] ss:$28 sps:$4 sm:$0xff]  }
  0x19   :  { %1548 = vmatpush3.bf16.msra.mxu1 %v1734_v23  ;;  %1485 = vmatprep.subr.bf16.mxu0 %v1735_v24  ;;  %v1787_v6 = vld [vmem:[%s2313_s0 + $0x118] ss:$28 sps:$4 sm:$0xff]   ;;  %v1788_v7 = vld [vmem:[%s2313_s0 + $0x120] ss:$28 sps:$4 sm:$0xff]   ;;  %v1795_v11 = vld [vmem:[%s2313_s0 + $0x150] ss:$28 sps:$4 sm:$0xff]  }
  0x1a   :  { %1549 = vmatprep.subr.bf16.mxu1 %v1736_v25  ;;  %v1793_v10 = vld [vmem:[%s2313_s0 + $0x15c] ss:$28 sps:$4 sm:$0xff]   ;;  %v1799_v13 = vld [vmem:[%s2313_s0 + $0x18c] ss:$28 sps:$4 sm:$0xff]   ;;  %v1801_v14 = vld [vmem:[%s2313_s0 + $0x194] ss:$28 sps:$4 sm:$0xff]  }
  0x1b   :  { %v1796_v12 = vld [vmem:[%s2313_s0 + $0x158] ss:$28 sps:$4 sm:$0xff]   ;;  %v1803_v15 = vld [vmem:[%s2313_s0 + $0x188] ss:$28 sps:$4 sm:$0xff]   ;;  %v1804_v16 = vld [vmem:[%s2313_s0 + $0x190] ss:$28 sps:$4 sm:$0xff]  }
  0x1c   :  { %1486 = vmatpush3.bf16.msra.mxu0 %v1737_v26  ;;  %v1809_v17 = vld [vmem:[%s2313_s0 + $0x14] ss:$28 sps:$4 sm:$0xff]   ;;  %v1812_v18 = vld [vmem:[%s2313_s0 + $0x164] ss:$28 sps:$4 sm:$0xff]   ;;  %v1814_v21 = vld [vmem:[%s2313_s0 + $0x4c] ss:$28 sps:$4 sm:$0xff]  }
  0x1d   :  { %1550 = vmatpush3.bf16.msra.mxu1 %v1738_v27  ;;  %1487 = vmatprep.subr.bf16.mxu0 %v1739_v28  ;;  %v1807_v19 = vld [vmem:[%s2313_s0 + $0x10] ss:$28 sps:$4 sm:$0xff]   ;;  %v1810_v20 = vld [vmem:[%s2313_s0 + $0x160] ss:$28 sps:$4 sm:$0xff]   ;;  %v1818_v24 = vld [vmem:[%s2313_s0 + $0x48] ss:$28 sps:$4 sm:$0xff]  }
  0x1e   :  { %1551 = vmatprep.subr.bf16.mxu1 %v1740_v29  ;;  %v1816_v22 = vld [vmem:[%s2313_s0 + $0x19c] ss:$28 sps:$4 sm:$0xff]   ;;  %v1820_v23 = vld [vmem:[%s2312_s1 + $0x188] sm:$0xff]   ;;  %v1821_v26 = vld [vmem:[%s2313_s0 + $0x84] ss:$28 sps:$4 sm:$0xff]  }
  0x1f   :  { %v1819_v25 = vld [vmem:[%s2313_s0 + $0x198] ss:$28 sps:$4 sm:$0xff]   ;;  %v1824_v28 = vld [vmem:[%s2313_s0 + $0x80] ss:$28 sps:$4 sm:$0xff]   ;;  %v1825_v29 = vld [vmem:[%s2313_s0 + $0x50] ss:$28 sps:$4 sm:$0xff]  }
  0x20   :  { %1488 = vmatpush3.bf16.msra.mxu0 %v1741_v30  ;;  %v1823_v27 = vld [vmem:[%s2313_s0 + $0x18] ss:$28 sps:$4 sm:$0xff]   ;;  %v1830_v33 = vld [vmem:[%s2313_s0 + $0xc0] ss:$28 sps:$4 sm:$0xff]  }
  0x21   :  { %1552 = vmatpush3.bf16.msra.mxu1 %v1742_v31  ;;  %1601 = vmatprep.subr.bf16.mxu0 %v1749_v36  ;;  %v1826_v30 = vld [vmem:[%s2313_s0 + $0xbc] ss:$28 sps:$4 sm:$0xff]   ;;  %v1828_v31 = vld [vmem:[%s2313_s0 + $0x88] ss:$28 sps:$4 sm:$0xff]  }
  0x22   :  { %1695 = vmatprep.subr.bf16.mxu1 %v1749_v36  ;;  %v1833_v35 = vld [vmem:[%s2313_s0 + $0xf8] ss:$28 sps:$4 sm:$0xff]   ;;  %v1834_v36 = vld [vmem:[%s2313_s0 + $0xf0] ss:$28 sps:$4 sm:$0xff]  }
  0x23   :  { %824 = vmatmul.mubr.bf16.vlgmr.msra.gmra.mrb[0].mxu0 %v1743_v32  ;;  %v1829_v32 = vld [vmem:[%s2313_s0 + $0xb8] ss:$28 sps:$4 sm:$0xff]  }
  0x24   :  { %921 = vmatmul.mubr.bf16.vlgmr.msra.gmra.mrb[0].mxu1 %v1746_v34  ;;  %1602 = vmatpush3.bf16.msra.mxu0 %v1750_v37  ;;  %v1831_v34 = vld [vmem:[%s2313_s0 + $0xf4] ss:$28 sps:$4 sm:$0xff]  }
  0x25   :  { %1703 = vmatpush3.bf16.msra.mxu1 %v1750_v37  ;;  %831 = vmatprep.mubr.bf16.mxu0 %v1751_v38  ;;  %v1835_v37 = vld [vmem:[%s2313_s0 + $0x130] ss:$28 sps:$4 sm:$0xff]  }
  0x26   :  { %928 = vmatprep.mubr.bf16.mxu1 %v1753_v39  ;;  %1603 = vmatprep.subr.bf16.mxu0 %v1757_v42  ;;  %v1836_v38 = vld [vmem:[%s2313_s0 + $0x12c] ss:$28 sps:$4 sm:$0xff]  }
  0x27   :  { %1696 = vmatprep.subr.bf16.mxu1 %v1757_v42  ;;  %v1838_v39 = vld [vmem:[%s2313_s0 + $0x168] ss:$28 sps:$4 sm:$0xff]  }
  0x28   :  { %1604 = vmatpush3.bf16.msra.mxu0 %v1758_v43 }
  0x29   :  { %1704 = vmatpush3.bf16.msra.mxu1 %v1758_v43  ;;  %1605 = vmatprep.subr.bf16.mxu0 %v1765_v46  ;;  %v2222_v43 = vld [vmem:[%s2314_s2] ss:$0 sm:$0xff] }
  0x2a   :  { %1697 = vmatprep.subr.bf16.mxu1 %v1765_v46 }
  0x2b   :  { %832 = vmatmul.mubr.bf16.gmra.mrb[4].mxu0 %v1755_v40  ;;  %v1839_v40 = vld [vmem:[%s2313_s0 + $0x128] ss:$28 sps:$4 sm:$0xff]  }
  0x2c   :  { %929 = vmatmul.mubr.bf16.gmra.mrb[4].mxu1 %v1756_v41  ;;  %839 = vmatprep.mubr.bf16.mxu0 %v1759_v44  ;;  %v1840_v41 = vld [vmem:[%s2313_s0 + $0x1a0] ss:$28 sps:$4 sm:$0xff]  }
  0x2d   :  { %936 = vmatprep.mubr.bf16.mxu1 %v1761_v45  ;;  %1606 = vmatpush3.bf16.msra.mxu0 %v1766_v47 }
  0x2e   :  { %1705 = vmatpush3.bf16.msra.mxu1 %v1766_v47  ;;  %1607 = vmatprep.subr.bf16.mxu0 %v1773_v52 }
  0x2f   :  { %1698 = vmatprep.subr.bf16.mxu1 %v1773_v52 }
  0x31   :  { %1608 = vmatpush3.bf16.msra.mxu0 %v1774_v53 }
  0x32   :  { %1706 = vmatpush3.bf16.msra.mxu1 %v1774_v53  ;;  %1609 = vmatprep.subr.bf16.mxu0 %v1781_v54 }
  0x33   :  { %840 = vmatmul.mubr.bf16.gmra.mrb[8].mxu0 %v1763_v48  ;;  %1699 = vmatprep.subr.bf16.mxu1 %v1781_v54 }
  0x34   :  { %937 = vmatmul.mubr.bf16.gmra.mrb[8].mxu1 %v1764_v49  ;;  %847 = vmatprep.mubr.bf16.mxu0 %v1767_v50 }
  0x35   :  { %944 = vmatprep.mubr.bf16.mxu1 %v1769_v51  ;;  %1610 = vmatpush3.bf16.msra.mxu0 %v1782_v55 }
  0x36   :  { %1707 = vmatpush3.bf16.msra.mxu1 %v1782_v55  ;;  %1611 = vmatprep.subr.bf16.mxu0 %v1789_v60 }
  0x37   :  { %1700 = vmatprep.subr.bf16.mxu1 %v1789_v60 }
  0x39   :  { %1612 = vmatpush3.bf16.msra.mxu0 %v1790_v61 }
  0x3a   :  { %1708 = vmatpush3.bf16.msra.mxu1 %v1790_v61  ;;  %1613 = vmatprep.subr.bf16.mxu0 %v1797_v0 }
  0x3b   :  { %848 = vmatmul.mubr.bf16.gmra.mrb[12].mxu0 %v1771_v56  ;;  %1701 = vmatprep.subr.bf16.mxu1 %v1797_v0 }
  0x3c   :  { %945 = vmatmul.mubr.bf16.gmra.mrb[12].mxu1 %v1772_v57  ;;  %855 = vmatprep.mubr.bf16.mxu0 %v1775_v58 }
  0x3d   :  { %952 = vmatprep.mubr.bf16.mxu1 %v1777_v59  ;;  %1614 = vmatpush3.bf16.msra.mxu0 %v1798_v1 }
  0x3e   :  { %1709 = vmatpush3.bf16.msra.mxu1 %v1798_v1  ;;  %1615 = vmatprep.subr.bf16.mxu0 %v1805_v4 }
  0x3f   :  { %1702 = vmatprep.subr.bf16.mxu1 %v1805_v4 }
  0x41   :  { %1616 = vmatpush3.bf16.msra.mxu0 %v1806_v5 }
  0x42   :  { %1710 = vmatpush3.bf16.msra.mxu1 %v1806_v5 }
  0x43   :  { %856 = vmatmul.mubr.bf16.gmra.mrb[16].mxu0 %v1779_v62  ;;  %1675 = vmatprep.subr.bf16.mxu1 %v1813_v8 }
  0x44   :  { %953 = vmatmul.mubr.bf16.gmra.mrb[16].mxu1 %v1780_v63  ;;  %863 = vmatprep.mubr.bf16.mxu0 %v1783_v2 }
  0x45   :  { %960 = vmatprep.mubr.bf16.mxu1 %v1785_v3 }
  0x4b   :  { %864 = vmatmul.mubr.bf16.gmra.mrb[20].mxu0 %v1787_v6 }
  0x4c   :  { %961 = vmatmul.mubr.bf16.gmra.mrb[20].mxu1 %v1788_v7  ;;  %871 = vmatprep.mubr.bf16.mxu0 %v1791_v9 }
  0x4d   :  { %968 = vmatprep.mubr.bf16.mxu1 %v1793_v10 }
  0x53   :  { %872 = vmatmul.mubr.bf16.gmra.mrb[24].mxu0 %v1795_v11 }
  0x54   :  { %969 = vmatmul.mubr.bf16.gmra.mrb[24].mxu1 %v1796_v12  ;;  %879 = vmatprep.mubr.bf16.mxu0 %v1799_v13 }
  0x55   :  { %976 = vmatprep.mubr.bf16.mxu1 %v1801_v14 }
  0x5b   :  { %880 = vmatmul.mubr.bf16.gmra.mrb[28].mxu0 %v1803_v15 }
  0x5c   :  { %977 = vmatmul.mubr.bf16.gmra.mrb[28].mxu1 %v1804_v16  ;;  %1017 = vmatprep.mubr.bf16.mxu0 %v1809_v17 }
  0x5d   :  { %1065 = vmatprep.mubr.bf16.mxu1 %v1812_v18 }
  0x63   :  { %1018 = vmatmul.mubr.bf16.vlgmr.msra.gmra.mrb[32].mxu0 %v1807_v19 }
  0x64   :  { %1066 = vmatmul.mubr.bf16.vlgmr.msra.gmra.mrb[32].mxu1 %v1810_v20  ;;  %1025 = vmatprep.mubr.bf16.mxu0 %v1814_v21 }
  0x65   :  { %1676 = vmatpush3.bf16.msra.mxu1 %v1813_v8  ;;  %1073 = vmatprep.mubr.bf16.mxu1 %v1816_v22 }
  0x66   :  { %1677 = vmatprep.subr.bf16.mxu1 %v1820_v23 }
  0x69   :  { %1678 = vmatpush3.bf16.msra.mxu1 %v1820_v23 }
  0x6b   :  { %1026 = vmatmul.mubr.bf16.gmra.mrb[36].mxu0 %v1818_v24 }
  0x6c   :  { %1074 = vmatmul.mubr.bf16.gmra.mrb[36].mxu1 %v1819_v25  ;;  %1033 = vmatprep.mubr.bf16.mxu0 %v1821_v26 }
  0x6d   :  { %1679 = vmatprep.mubr.msk.bf16.mxu1 %vm766_vm0, %v1823_v27 }
  0x73   :  { %1034 = vmatmul.mubr.bf16.gmra.mrb[40].mxu0 %v1824_v28 }
  0x74   :  { %1680 = vmatmul.mubr.msk.bf16.vlgmr.msra.gmra.mrb[40].mxu1 %vm766_vm0, %v1825_v29  ;;  %1041 = vmatprep.mubr.bf16.mxu0 %v1826_v30 }
  0x75   :  { %1683 = vmatprep.mubr.msk.bf16.mxu1 %vm766_vm0, %v1828_v31 }
  0x7b   :  { %1042 = vmatmul.mubr.bf16.gmra.mrb[44].mxu0 %v1829_v32 }
  0x7c   :  { %1684 = vmatmul.mubr.msk.bf16.gmra.mrb[44].mxu1 %vm766_vm0, %v1830_v33  ;;  %1049 = vmatprep.mubr.bf16.mxu0 %v1831_v34 }
  0x7d   :  { %1687 = vmatprep.mubr.msk.bf16.mxu1 %vm766_vm0, %v1833_v35 }
  0x83   :  { %1050 = vmatmul.mubr.bf16.gmra.mrb[48].mxu0 %v1834_v36 }
  0x84   :  { %1688 = vmatmul.mubr.msk.bf16.gmra.mrb[48].mxu1 %vm766_vm0, %v1835_v37  ;;  %1057 = vmatprep.mubr.bf16.mxu0 %v1836_v38 }
  0x85   :  { %1691 = vmatprep.mubr.msk.bf16.mxu1 %vm766_vm0, %v1838_v39 }
  0x8b   :  { %1058 = vmatmul.mubr.bf16.gmra.mrb[52].mxu0 %v1839_v40 }
  0x8c   :  { %1692 = vmatmul.mubr.msk.bf16.gmra.mrb[52].mxu1 %vm766_vm0, %v1840_v41 }
  0xf6   :  { %v1489_v42 = vpop.f32.mrb[0].mxu0 }
  0xf7   :  { %v1490_v44 = vpop.f32.mrb[1].mxu0  ;;  %v1553_v45 = vpop.f32.mrb[0].mxu1 }
  0xf8   :  { %v1491_v46 = vadd.f32 %v1490_v44, %v1489_v42  ;;  %v1492_v47 = vpop.f32.mrb[2].mxu0  ;;  %v1554_v48 = vpop.f32.mrb[1].mxu1 }
  0xf9   :  { %v1493_v49 = vpop.f32.mrb[3].mxu0  ;;  %v1555_v50 = vadd.f32 %v1554_v48, %v1553_v45  ;;  %v1556_v51 = vpop.f32.mrb[2].mxu1 }
  0xfa   :  { %v826_v52 = vadd.f32 %v1491_v46, %v2222_v43  ;;  %v1494_v53 = vadd.f32 %v1493_v49, %v1492_v47  ;;  %v1557_v54 = vpop.f32.mrb[3].mxu1 }
  0xfb   :  { %v1558_v55 = vadd.f32 %v1557_v54, %v1556_v51 }
  0xfc   :  { %v829_v56 = vadd.f32 %v1494_v53, %v2222_v43  ;;  %v2226_v57 = vadd.f32 %v1555_v50, %v826_v52 }
  0xfe   :  { %v2228_v58 = vadd.f32 %v1558_v55, %v829_v56  ;;  %v1495_v59 = vpop.f32.mrb[4].mxu0 }
  0xff   :  { %v1496_v60 = vpop.f32.mrb[5].mxu0  ;;  %v1559_v61 = vpop.f32.mrb[4].mxu1 }
 0x100   :  { %v1497_v62 = vadd.f32 %v1496_v60, %v1495_v59  ;;  %v1498_v63 = vpop.f32.mrb[6].mxu0  ;;  %v1560_v0 = vpop.f32.mrb[5].mxu1 }
 0x101   :  { %v1499_v1 = vpop.f32.mrb[7].mxu0  ;;  %v1561_v2 = vadd.f32 %v1560_v0, %v1559_v61  ;;  %v1562_v3 = vpop.f32.mrb[6].mxu1 }
 0x102   :  { %v834_v4 = vadd.f32 %v1497_v62, %v2222_v43  ;;  %v1500_v5 = vadd.f32 %v1499_v1, %v1498_v63  ;;  %v1563_v6 = vpop.f32.mrb[7].mxu1 }
 0x103   :  { %v1564_v7 = vadd.f32 %v1563_v6, %v1562_v3 }
 0x104   :  { %v837_v8 = vadd.f32 %v1500_v5, %v2222_v43  ;;  %v2232_v9 = vadd.f32 %v1561_v2, %v834_v4 }
 0x106   :  { %v2234_v10 = vadd.f32 %v1564_v7, %v837_v8  ;;  %v1501_v11 = vpop.f32.mrb[8].mxu0 }
 0x107   :  { %v1502_v12 = vpop.f32.mrb[9].mxu0  ;;  %v1565_v13 = vpop.f32.mrb[8].mxu1 }
 0x108   :  { %v1503_v14 = vadd.f32 %v1502_v12, %v1501_v11  ;;  %v1504_v15 = vpop.f32.mrb[10].mxu0  ;;  %v1566_v16 = vpop.f32.mrb[9].mxu1 }
 0x109   :  { %v1505_v17 = vpop.f32.mrb[11].mxu0  ;;  %v1567_v18 = vadd.f32 %v1566_v16, %v1565_v13  ;;  %v1568_v19 = vpop.f32.mrb[10].mxu1 }
 0x10a   :  { %v842_v20 = vadd.f32 %v1503_v14, %v2222_v43  ;;  %v1506_v21 = vadd.f32 %v1505_v17, %v1504_v15  ;;  %v1569_v22 = vpop.f32.mrb[11].mxu1 }
 0x10b   :  { %v1570_v23 = vadd.f32 %v1569_v22, %v1568_v19 }
 0x10c   :  { %v845_v24 = vadd.f32 %v1506_v21, %v2222_v43  ;;  %v2238_v25 = vadd.f32 %v1567_v18, %v842_v20 }
 0x10e   :  { %v2240_v26 = vadd.f32 %v1570_v23, %v845_v24  ;;  %v1507_v27 = vpop.f32.mrb[12].mxu0 }
 0x10f   :  { %v1508_v28 = vpop.f32.mrb[13].mxu0  ;;  %v1571_v29 = vpop.f32.mrb[12].mxu1 }
 0x110   :  { %v1509_v30 = vadd.f32 %v1508_v28, %v1507_v27  ;;  %v1510_v31 = vpop.f32.mrb[14].mxu0  ;;  %v1572_v32 = vpop.f32.mrb[13].mxu1 }
 0x111   :  { %v1511_v33 = vpop.f32.mrb[15].mxu0  ;;  %v1573_v34 = vadd.f32 %v1572_v32, %v1571_v29  ;;  %v1574_v35 = vpop.f32.mrb[14].mxu1 }
 0x112   :  { %v850_v36 = vadd.f32 %v1509_v30, %v2222_v43  ;;  %v1512_v37 = vadd.f32 %v1511_v33, %v1510_v31  ;;  %v1575_v38 = vpop.f32.mrb[15].mxu1 }
 0x113   :  { %v1576_v39 = vadd.f32 %v1575_v38, %v1574_v35 }
 0x114   :  { %v853_v40 = vadd.f32 %v1512_v37, %v2222_v43  ;;  %v2244_v41 = vadd.f32 %v1573_v34, %v850_v36 }
 0x116   :  { %v2246_v42 = vadd.f32 %v1576_v39, %v853_v40  ;;  %v1513_v44 = vpop.f32.mrb[16].mxu0 }
 0x117   :  { %v1514_v45 = vpop.f32.mrb[17].mxu0  ;;  %v1577_v46 = vpop.f32.mrb[16].mxu1 }
 0x118   :  { %v1515_v47 = vadd.f32 %v1514_v45, %v1513_v44  ;;  %v1516_v48 = vpop.f32.mrb[18].mxu0  ;;  %v1578_v49 = vpop.f32.mrb[17].mxu1 }
 0x119   :  { %v1517_v50 = vpop.f32.mrb[19].mxu0  ;;  %v1579_v51 = vadd.f32 %v1578_v49, %v1577_v46  ;;  %v1580_v52 = vpop.f32.mrb[18].mxu1 }
 0x11a   :  { %v858_v53 = vadd.f32 %v1515_v47, %v2222_v43  ;;  %v1518_v54 = vadd.f32 %v1517_v50, %v1516_v48  ;;  %v1581_v55 = vpop.f32.mrb[19].mxu1 }
 0x11b   :  { %v1582_v56 = vadd.f32 %v1581_v55, %v1580_v52 }
 0x11c   :  { %v861_v59 = vadd.f32 %v1518_v54, %v2222_v43  ;;  %v2250_v60 = vadd.f32 %v1579_v51, %v858_v53 }
 0x11e   :  { %v2252_v61 = vadd.f32 %v1582_v56, %v861_v59  ;;  %v1519_v62 = vpop.f32.mrb[20].mxu0 }
 0x11f   :  { %v1520_v63 = vpop.f32.mrb[21].mxu0  ;;  %v1583_v0 = vpop.f32.mrb[20].mxu1 }
 0x120   :  { %v1521_v1 = vadd.f32 %v1520_v63, %v1519_v62  ;;  %v1522_v2 = vpop.f32.mrb[22].mxu0  ;;  %v1584_v3 = vpop.f32.mrb[21].mxu1 }
 0x121   :  { %v1523_v4 = vpop.f32.mrb[23].mxu0  ;;  %v1585_v5 = vadd.f32 %v1584_v3, %v1583_v0  ;;  %v1586_v6 = vpop.f32.mrb[22].mxu1 }
 0x122   :  { %v866_v7 = vadd.f32 %v1521_v1, %v2222_v43  ;;  %v1524_v8 = vadd.f32 %v1523_v4, %v1522_v2  ;;  %v1587_v11 = vpop.f32.mrb[23].mxu1 }
 0x123   :  { %v1588_v12 = vadd.f32 %v1587_v11, %v1586_v6 }
 0x124   :  { %v869_v13 = vadd.f32 %v1524_v8, %v2222_v43  ;;  %v2256_v14 = vadd.f32 %v1585_v5, %v866_v7 }
 0x126   :  { %v2258_v15 = vadd.f32 %v1588_v12, %v869_v13  ;;  %v1525_v16 = vpop.f32.mrb[24].mxu0 }
 0x127   :  { %v1526_v17 = vpop.f32.mrb[25].mxu0  ;;  %v1589_v18 = vpop.f32.mrb[24].mxu1 }
 0x128   :  { %v1527_v19 = vadd.f32 %v1526_v17, %v1525_v16  ;;  %v1528_v20 = vpop.f32.mrb[26].mxu0  ;;  %v1590_v21 = vpop.f32.mrb[25].mxu1 }
 0x129   :  { %v1529_v22 = vpop.f32.mrb[27].mxu0  ;;  %v1591_v23 = vadd.f32 %v1590_v21, %v1589_v18  ;;  %v1592_v24 = vpop.f32.mrb[26].mxu1 }
 0x12a   :  { %v874_v27 = vadd.f32 %v1527_v19, %v2222_v43  ;;  %v1530_v28 = vadd.f32 %v1529_v22, %v1528_v20  ;;  %v1593_v29 = vpop.f32.mrb[27].mxu1 }
 0x12b   :  { %v1594_v30 = vadd.f32 %v1593_v29, %v1592_v24 }
 0x12c   :  { %v877_v31 = vadd.f32 %v1530_v28, %v2222_v43  ;;  %v971_v32 = vadd.f32 %v1591_v23, %v874_v27 }
 0x12e   :  { %v974_v33 = vadd.f32 %v1594_v30, %v877_v31  ;;  %v1531_v34 = vpop.f32.mrb[28].mxu0 }
 0x12f   :  { %v1532_v35 = vpop.f32.mrb[29].mxu0  ;;  %v1595_v36 = vpop.f32.mrb[28].mxu1 }
 0x130   :  { %v1533_v37 = vadd.f32 %v1532_v35, %v1531_v34  ;;  %v1534_v38 = vpop.f32.mrb[30].mxu0  ;;  %v1596_v39 = vpop.f32.mrb[29].mxu1 }
 0x131   :  { %v1535_v40 = vpop.f32.mrb[31].mxu0  ;;  %v1597_v44 = vadd.f32 %v1596_v39, %v1595_v36  ;;  %v1598_v45 = vpop.f32.mrb[30].mxu1 }
 0x132   :  { %v882_v46 = vadd.f32 %v1533_v37, %v2222_v43  ;;  %v1536_v47 = vadd.f32 %v1535_v40, %v1534_v38  ;;  %v1599_v48 = vpop.f32.mrb[31].mxu1 }
 0x133   :  { %v1600_v49 = vadd.f32 %v1599_v48, %v1598_v45 }
 0x134   :  { %v885_v50 = vadd.f32 %v1536_v47, %v2222_v43  ;;  %v979_v51 = vadd.f32 %v1597_v44, %v882_v46 }
 0x136   :  { %v982_v52 = vadd.f32 %v1600_v49, %v885_v50  ;;  %v1617_v53 = vpop.f32.mrb[32].mxu0 }
 0x137   :  { %v1653_v54 = vpop.f32.mrb[32].mxu1  ;;  %v1618_v55 = vpop.f32.mrb[33].mxu0 }
 0x138   :  { %v1619_v56 = vadd.f32 %v1618_v55, %v1617_v53  ;;  %v1654_v59 = vpop.f32.mrb[33].mxu1  ;;  %v1620_v62 = vpop.f32.mrb[34].mxu0 }
 0x139   :  { %v1655_v63 = vadd.f32 %v1654_v59, %v1653_v54  ;;  %v1656_v0 = vpop.f32.mrb[34].mxu1  ;;  %v1621_v1 = vpop.f32.mrb[35].mxu0 }
 0x13a   :  { %v1622_v2 = vadd.f32 %v1621_v1, %v1620_v62  ;;  %v1657_v3 = vpop.f32.mrb[35].mxu1  ;;  %v1020_v4 = vadd.f32 %v1619_v56, %v2226_v57 }
 0x13b   :  { %v1658_v5 = vadd.f32 %v1657_v3, %v1656_v0  ;;  %v2265_v6 = vadd.f32 %v1655_v63, %v971_v32 }
 0x13c   :  { %v1023_v43 = vadd.f32 %v1622_v2, %v2228_v58 }
 0x13d   :  { %v2268_v7 = vadd.f32 %v1658_v5, %v974_v33 }
 0x13e   :  { %v1623_v8 = vpop.f32.mrb[36].mxu0 }
 0x13f   :  { %v1659_v11 = vpop.f32.mrb[36].mxu1  ;;  %v1624_v12 = vpop.f32.mrb[37].mxu0 }
 0x140   :  { %v1625_v13 = vadd.f32 %v1624_v12, %v1623_v8  ;;  %v1660_v16 = vpop.f32.mrb[37].mxu1  ;;  %v1626_v17 = vpop.f32.mrb[38].mxu0 }
 0x141   :  { %v1661_v18 = vadd.f32 %v1660_v16, %v1659_v11  ;;  %v1662_v19 = vpop.f32.mrb[38].mxu1  ;;  %v1627_v20 = vpop.f32.mrb[39].mxu0 }
 0x142   :  { %v1628_v21 = vadd.f32 %v1627_v20, %v1626_v17  ;;  %v1663_v22 = vpop.f32.mrb[39].mxu1  ;;  %v1028_v57 = vadd.f32 %v1625_v13, %v2232_v9 }
 0x143   :  { %v1664_v23 = vadd.f32 %v1663_v22, %v1662_v19  ;;  %v2271_v24 = vadd.f32 %v1661_v18, %v979_v51 }
 0x144   :  { %v1031_v58 = vadd.f32 %v1628_v21, %v2234_v10 }
 0x145   :  { %v2274_v27 = vadd.f32 %v1664_v23, %v982_v52 }
 0x146   :  { %v1629_v28 = vpop.f32.mrb[40].mxu0 }
 0x147   :  { %v1681_v29 = vpop.f32.mrb[40].mxu1  ;;  %v1630_v30 = vpop.f32.mrb[41].mxu0 }
 0x148   :  { %v1125_v31 = vadd.f32 %v1681_v29, %v1028_v57  ;;  %v1631_v32 = vadd.f32 %v1630_v30, %v1629_v28  ;;  %v1116_v33 = vpop.f32.mrb[41].mxu1  ;;  %v1632_v34 = vpop.f32.mrb[42].mxu0 }
 0x149   :  { %v1117_v35 = vadd.f32 %v1116_v33, %v1020_v4  ;;  %v1682_v36 = vpop.f32.mrb[42].mxu1  ;;  %v1633_v37 = vpop.f32.mrb[43].mxu0 }
 0x14a   :  { %1841 = vtanh.f32 %v1125_v31  ;;  %v1128_v38 = vadd.f32 %v1682_v36, %v1031_v58  ;;  %v1634_v9 = vadd.f32 %v1633_v37, %v1632_v34  ;;  %v1119_v39 = vpop.f32.mrb[43].mxu1  ;;  %v1036_v40 = vadd.f32 %v1631_v32, %v2238_v25 }
 0x14b   :  { %1843 = vtanh.f32 %v1117_v35  ;;  %v1120_v10 = vadd.f32 %v1119_v39, %v1023_v43 }
 0x14c   :  { %1845 = vtanh.f32 %v1128_v38  ;;  %v1039_v44 = vadd.f32 %v1634_v9, %v2240_v26 }
 0x14d   :  { %1847 = vtanh.f32 %v1120_v10 }
 0x14e   :  { %v1635_v45 = vpop.f32.mrb[44].mxu0 }
 0x14f   :  { %v1685_v46 = vpop.f32.mrb[44].mxu1  ;;  %v1636_v47 = vpop.f32.mrb[45].mxu0 }
 0x150   :  { %v1637_v48 = vadd.f32 %v1636_v47, %v1635_v45  ;;  %v1132_v49 = vpop.f32.mrb[45].mxu1  ;;  %v1638_v50 = vpop.f32.mrb[46].mxu0 }
 0x151   :  { %v1133_v51 = vadd.f32 %v1132_v49, %v1036_v40  ;;  %v1686_v52 = vpop.f32.mrb[46].mxu1  ;;  %v1639_v53 = vpop.f32.mrb[47].mxu0 }
 0x152   :  { %v1044_v54 = vadd.f32 %v1637_v48, %v2244_v41  ;;  %v1640_v55 = vadd.f32 %v1639_v53, %v1638_v50  ;;  %v1135_v56 = vpop.f32.mrb[47].mxu1 }
 0x153   :  { %v1136_v25 = vadd.f32 %v1135_v56, %v1039_v44  ;;  %1849 = vtanh.f32 %v1133_v51 }
 0x154   :  { %v1842_v59 = vpop.eup %1841  ;;  %v1141_v62 = vadd.f32 %v1685_v46, %v1044_v54  ;;  %v1047_v26 = vadd.f32 %v1640_v55, %v2246_v42 }
 0x155   :  { %v1844_v63 = vpop.eup %1843  ;;  %1851 = vtanh.f32 %v1136_v25 }
 0x156   :  { %v1846_v0 = vpop.eup %1845  ;;  %v1144_v1 = vadd.f32 %v1686_v52, %v1047_v26  ;;  %v1641_v2 = vpop.f32.mrb[48].mxu0  ;;  %1853 = vtanh.f32 %v1141_v62 }
 0x157   :  { %v1848_v3 = vpop.eup %1847  ;;  %v1434_v4 = vpack.c.bf16 %v1846_v0, %v1842_v59  ;;  %v1642_v5 = vpop.f32.mrb[49].mxu0 }
 0x158   :  { %v1689_v43 = vpop.f32.mrb[48].mxu1  ;;  %v1429_v8 = vpack.c.bf16 %v1848_v3, %v1844_v63  ;;  %1855 = vtanh.f32 %v1144_v1  ;;  %v1643_v41 = vadd.f32 %v1642_v5, %v1641_v2  ;;  %v1644_v11 = vpop.f32.mrb[50].mxu0 }
 0x159   :  { %v1148_v12 = vpop.f32.mrb[49].mxu1  ;;  %1466 = vst [vmem:[%s2315_s3 + $0x8] sm:$0xff] %v1434_v4   ;;  %v1645_v42 = vpop.f32.mrb[51].mxu0 }
 0x15a   :  { %v1690_v13 = vpop.f32.mrb[50].mxu1  ;;  %1430 = vst [vmem:[%s2315_s3] sm:$0xff] %v1429_v8   ;;  %v1646_v16 = vadd.f32 %v1645_v42, %v1644_v11  ;;  %v1052_v17 = vadd.f32 %v1643_v41, %v2250_v60 }
 0x15b   :  { %v1151_v18 = vpop.f32.mrb[51].mxu1 }
 0x15c   :  { %v1149_v19 = vadd.f32 %v1148_v12, %v1052_v17  ;;  %v1055_v20 = vadd.f32 %v1646_v16, %v2252_v61 }
 0x15d   :  { %v1850_v21 = vpop.eup %1849 }
 0x15e   :  { %v1152_v22 = vadd.f32 %v1151_v18, %v1055_v20  ;;  %v1647_v57 = vpop.f32.mrb[52].mxu0  ;;  %1857 = vtanh.f32 %v1149_v19 }
 0x15f   :  { %v1852_v23 = vpop.eup %1851  ;;  %v1693_v58 = vpop.f32.mrb[52].mxu1 }
 0x160   :  { %v1648_v28 = vpop.f32.mrb[53].mxu0  ;;  %v1439_v29 = vpack.c.bf16 %v1852_v23, %v1850_v21  ;;  %1859 = vtanh.f32 %v1152_v22  ;;  %v1173_v30 = vadd.f32 %v1693_v58, %v2271_v24  ;;  %v1164_v32 = vpop.f32.mrb[53].mxu1 }
 0x161   :  { %v1649_v31 = vadd.f32 %v1648_v28, %v1647_v57  ;;  %v1650_v33 = vpop.f32.mrb[54].mxu0  ;;  %v1854_v34 = vpop.eup %1853  ;;  %v1165_v60 = vadd.f32 %v1164_v32, %v2265_v6 }
 0x162   :  { %v1694_v35 = vpop.f32.mrb[54].mxu1  ;;  %v1651_v36 = vpop.f32.mrb[55].mxu0  ;;  %1467 = vst [vmem:[%s2315_s3 + $0x10] sm:$0xff] %v1439_v29   ;;  %1861 = vtanh.f32 %v1173_v30 }
 0x163   :  { %v1856_v61 = vpop.eup %1855  ;;  %v1060_v37 = vadd.f32 %v1649_v31, %v2256_v14  ;;  %v1176_v38 = vadd.f32 %v1694_v35, %v2274_v27  ;;  %v1652_v9 = vadd.f32 %v1651_v36, %v1650_v33  ;;  %v1167_v24 = vpop.f32.mrb[55].mxu1  ;;  %1863 = vtanh.f32 %v1165_v60 }
 0x164   :  { %v1444_v39 = vpack.c.bf16 %v1856_v61, %v1854_v34  ;;  %v1168_v40 = vadd.f32 %v1167_v24, %v2268_v7 }
 0x165   :  { %v1157_v10 = vadd.f32 %v1689_v43, %v1060_v37  ;;  %1865 = vtanh.f32 %v1176_v38  ;;  %v1063_v6 = vadd.f32 %v1652_v9, %v2258_v15 }
 0x166   :  { %1468 = vst [vmem:[%s2315_s3 + $0x18] sm:$0xff] %v1444_v39   ;;  %1867 = vtanh.f32 %v1168_v40 }
 0x167   :  { %v1160_v44 = vadd.f32 %v1690_v13, %v1063_v6  ;;  %1869 = vtanh.f32 %v1157_v10 }
 0x168   :  { %v1858_v14 = vpop.eup %1857 }
 0x169   :  { %1871 = vtanh.f32 %v1160_v44 }
 0x16a   :  { %v1860_v27 = vpop.eup %1859 }
 0x16b   :  { %v1449_v45 = vpack.c.bf16 %v1860_v27, %v1858_v14 }
 0x16c   :  { %v1862_v46 = vpop.eup %1861 }
 0x16d   :  { %v1864_v47 = vpop.eup %1863  ;;  %1469 = vst [vmem:[%s2315_s3 + $0x20] sm:$0xff] %v1449_v45  }
 0x16f   :  { %v1866_v7 = vpop.eup %1865 }
 0x170   :  { %v1868_v48 = vpop.eup %1867  ;;  %v1464_v15 = vpack.c.bf16 %v1866_v7, %v1862_v46 }
 0x171   :  { %v1459_v49 = vpack.c.bf16 %v1868_v48, %v1864_v47  ;;  %v1870_v50 = vpop.eup %1869 }
 0x172   :  { %1472 = vst [vmem:[%s2315_s3 + $0x38] sm:$0xff] %v1464_v15  }
 0x173   :  { %v1872_v51 = vpop.eup %1871  ;;  %1471 = vst [vmem:[%s2315_s3 + $0x30] sm:$0xff] %v1459_v49  }
 0x174   :  { %v1454_v52 = vpack.c.bf16 %v1872_v51, %v1870_v50 }
 0x176   :  { %1470 = vst [vmem:[%s2315_s3 + $0x28] sm:$0xff] %v1454_v52  }

// kernel: _lambda_.5
= control target key start
LH: loop header
LB: loop body
LE: loop exit
PB: predicated region body
PF: predicated region fallthrough
CT: control target
= control target key end

     0   :  { %s5688_s0 = inlined_call_operand.vmem [shape: bf16[32,1152], index: 0, kind: input, shape index: {}]   ;;  %s5689_s1 = inlined_call_operand.vmem [shape: bf16[1152,256], index: 1, kind: input, shape index: {}]   ;;  %s5690_s2 = inlined_call_operand.vmem [shape: f32[1,256], index: 2, kind: input, shape index: {}]   ;;  %s5691_s3 = inlined_call_operand.vmem [shape: bf16[128,128], index: 3, kind: input, shape index: {}]   ;;  %s5692_s4 = inlined_call_operand.vmem [shape: bf16[128,256], index: 4, kind: input, shape index: {}]   ;;  %s5693_s5 = inlined_call_operand.vmem [shape: f32[1,256], index: 5, kind: input, shape index: {}]   ;;  %s5694_s6 = inlined_call_operand.vmem [shape: bf16[512,32], index: 6, kind: input, shape index: {}]   ;;  %s5695_s7 = inlined_call_operand.vmem [shape: bf16[32,256], index: 7, kind: input, shape index: {}]   ;;  %s5696_s8 = inlined_call_operand.vmem [shape: f32[1,256], index: 8, kind: input, shape index: {}]   ;;  %s5697_s9 = inlined_call_operand.vmem [shape: bf16[2,32], index: 9, kind: input, shape index: {}]   ;;  %s5698_s10 = inlined_call_operand.vmem [shape: bf16[2,128], index: 10, kind: input, shape index: {}]   ;;  %s5699_s11 = inlined_call_operand.vmem [shape: bf16[2,512], index: 11, kind: input, shape index: {}]   ;;  %s5700_s12 = inlined_call_operand.vmem [shape: bf16[256,32], index: 12, kind: input, shape index: {}]   ;;  %s5701_s13 = inlined_call_operand.vmem [shape: f32[1,32], index: 13, kind: input, shape index: {}]   ;;  %s5702_s14 = inlined_call_operand.vmem [shape: bf16[256,32], index: 14, kind: input, shape index: {}]   ;;  %s5703_s15 = inlined_call_operand.vmem [shape: f32[1,32], index: 15, kind: input, shape index: {}]   ;;  %s5704_s16 = inlined_call_operand.vmem [shape: bf16[256,32], index: 16, kind: input, shape index: {}]   ;;  %s5705_s17 = inlined_call_operand.vmem [shape: f32[1,32], index: 17, kind: input, shape index: {}]   ;;  %s5706_s18 = inlined_call_operand.vmem [shape: bf16[32,4], index: 18, kind: input, shape index: {}]   ;;  %s5707_s19 = inlined_call_operand.vmem [shape: bf16[32,4], index: 19, kind: input, shape index: {}]   ;;  %s5708_s20 = inlined_call_operand.vmem [shape: bf16[32,4], index: 20, kind: input, shape index: {}]   ;;  %s5709_s21 = inlined_call_operand.vmem [shape: f32[1,4], index: 21, kind: input, shape index: {}]   ;;  %s5710_s22 = inlined_call_operand.hbm [shape: f32[2,4], index: 22, kind: output, shape index: {}]  }
   0x1   :  { %5716 = sst [smem:[#allocation5_spill]] %s5688_s0 }
   0x2   :  { %5717 = sst [smem:[#allocation6_spill]] %s5689_s1 }
   0x3   :  { %5718 = sst [smem:[#allocation7_spill]] %s5690_s2 }
   0x4   :  { %5719 = sst [smem:[#allocation8_spill]] %s5691_s3 }
   0x5   :  { %5720 = sst [smem:[#allocation9_spill]] %s5692_s4 }
   0x6   :  { %5721 = sst [smem:[#allocation10_spill]] %s5693_s5 }
   0x7   :  { %5722 = sst [smem:[#allocation11_spill]] %s5694_s6 }
   0x8   :  { %s5723_s29 = sld [smem:[#allocation6_spill]]  ;;  %s5724_s3 = sld [smem:[#allocation5_spill]] }
   0xe   :  { %v3989_v0 = vld [vmem:[%s5723_s29 + $0x4] ss:$8 sps:$4 sm:$0xff]   ;;  %v3991_v1 = vld [vmem:[%s5723_s29] ss:$8 sps:$4 sm:$0xff]   ;;  %v3992_v2 = vld [vmem:[%s5723_s29 + $0x14] ss:$8 sps:$4 sm:$0xff]  }
   0xf   :  { %1061 = vmatprep.subr.bf16.mxu0 %v3989_v0  ;;  %v3994_v3 = vld [vmem:[%s5723_s29 + $0x10] ss:$8 sps:$4 sm:$0xff]   ;;  %v3995_v4 = vld [vmem:[%s5723_s29 + $0x24] ss:$8 sps:$4 sm:$0xff]   ;;  %v3997_v5 = vld [vmem:[%s5723_s29 + $0x20] ss:$8 sps:$4 sm:$0xff]  }
  0x10   :  { %1062 = vmatpush1.bf16.msra.mxu0 %v3991_v1  ;;  %v3998_v6 = vld [vmem:[%s5723_s29 + $0x34] ss:$8 sps:$4 sm:$0xff]   ;;  %v4000_v7 = vld [vmem:[%s5723_s29 + $0x30] ss:$8 sps:$4 sm:$0xff]   ;;  %v4001_v8 = vld [vmem:[%s5723_s29 + $0x44] ss:$8 sps:$4 sm:$0xff]  }
  0x11   :  { %1063 = vmatprep.subr.bf16.mxu0 %v3992_v2  ;;  %v4003_v9 = vld [vmem:[%s5723_s29 + $0x40] ss:$8 sps:$4 sm:$0xff]   ;;  %v4004_v10 = vld [vmem:[%s5723_s29 + $0x54] ss:$8 sps:$4 sm:$0xff]   ;;  %v4006_v11 = vld [vmem:[%s5723_s29 + $0x50] ss:$8 sps:$4 sm:$0xff]  }
  0x12   :  { %v4007_v12 = vld [vmem:[%s5723_s29 + $0x64] ss:$8 sps:$4 sm:$0xff]   ;;  %v4009_v14 = vld [vmem:[%s5723_s29 + $0x60] ss:$8 sps:$4 sm:$0xff]   ;;  %v4010_v15 = vld [vmem:[%s5723_s29 + $0x74] ss:$8 sps:$4 sm:$0xff]  }
  0x13   :  { %v4039_v13 = vld [vmem:[%s5724_s3 + $0x4] ss:$36 sps:$4 sm:$0xff]   ;;  %v4012_v16 = vld [vmem:[%s5723_s29 + $0x70] ss:$8 sps:$4 sm:$0xff]   ;;  %v4016_v19 = vld [vmem:[%s5723_s29 + $0x94] ss:$8 sps:$4 sm:$0xff]  }
  0x14   :  { %1064 = vmatpush1.bf16.msra.mxu0 %v3994_v3  ;;  %1093 = vmatprep.mubr.bf16.mxu0 %v4039_v13  ;;  %v4013_v17 = vld [vmem:[%s5723_s29 + $0x84] ss:$8 sps:$4 sm:$0xff]   ;;  %v4015_v18 = vld [vmem:[%s5723_s29 + $0x80] ss:$8 sps:$4 sm:$0xff]   ;;  %v4018_v20 = vld [vmem:[%s5723_s29 + $0x90] ss:$8 sps:$4 sm:$0xff]  }
  0x15   :  { %1065 = vmatprep.subr.bf16.mxu0 %v3995_v4  ;;  %v4019_v21 = vld [vmem:[%s5723_s29 + $0xa4] ss:$8 sps:$4 sm:$0xff]   ;;  %v4021_v22 = vld [vmem:[%s5723_s29 + $0xa0] ss:$8 sps:$4 sm:$0xff]   ;;  %v4022_v23 = vld [vmem:[%s5723_s29 + $0xb4] ss:$8 sps:$4 sm:$0xff]  }
  0x16   :  { %v4024_v24 = vld [vmem:[%s5723_s29 + $0xb0] ss:$8 sps:$4 sm:$0xff]   ;;  %v4025_v25 = vld [vmem:[%s5723_s29 + $0xc4] ss:$8 sps:$4 sm:$0xff]   ;;  %v4027_v26 = vld [vmem:[%s5723_s29 + $0xc0] ss:$8 sps:$4 sm:$0xff]  }
  0x17   :  { %v4028_v27 = vld [vmem:[%s5723_s29 + $0xd4] ss:$8 sps:$4 sm:$0xff]   ;;  %v4030_v28 = vld [vmem:[%s5723_s29 + $0xd0] ss:$8 sps:$4 sm:$0xff]   ;;  %v4031_v29 = vld [vmem:[%s5723_s29 + $0xe4] ss:$8 sps:$4 sm:$0xff]  }
  0x18   :  { %1066 = vmatpush1.bf16.msra.mxu0 %v3997_v5  ;;  %v4033_v30 = vld [vmem:[%s5723_s29 + $0xe0] ss:$8 sps:$4 sm:$0xff]   ;;  %v4034_v31 = vld [vmem:[%s5723_s29 + $0xf4] ss:$8 sps:$4 sm:$0xff]   ;;  %v4036_v32 = vld [vmem:[%s5723_s29 + $0xf0] ss:$8 sps:$4 sm:$0xff]  }
  0x19   :  { %1067 = vmatprep.subr.bf16.mxu0 %v3998_v6  ;;  %v4042_v33 = vld [vmem:[%s5723_s29 + $0x104] ss:$8 sps:$4 sm:$0xff]   ;;  %v4040_v35 = vld [vmem:[%s5723_s29 + $0x100] ss:$8 sps:$4 sm:$0xff]   ;;  %v4045_v37 = vld [vmem:[%s5723_s29 + $0x114] ss:$8 sps:$4 sm:$0xff]  }
  0x1a   :  { %v4037_v34 = vld [vmem:[%s5724_s3] ss:$36 sps:$4 sm:$0xff]   ;;  %v4082_v36 = vld [vmem:[%s5724_s3 + $0x4c] ss:$36 sps:$4 sm:$0xff]   ;;  %v4051_v43 = vld [vmem:[%s5723_s29 + $0x134] ss:$8 sps:$4 sm:$0xff]  }
  0x1b   :  { %v4043_v38 = vld [vmem:[%s5723_s29 + $0x110] ss:$8 sps:$4 sm:$0xff]   ;;  %v4048_v39 = vld [vmem:[%s5723_s29 + $0x124] ss:$8 sps:$4 sm:$0xff]   ;;  %v4046_v41 = vld [vmem:[%s5723_s29 + $0x120] ss:$8 sps:$4 sm:$0xff]  }
  0x1c   :  { %1068 = vmatpush1.bf16.msra.mxu0 %v4000_v7  ;;  %v4087_v40 = vld [vmem:[%s5724_s3 + $0x48] ss:$36 sps:$4 sm:$0xff]   ;;  %v4049_v44 = vld [vmem:[%s5723_s29 + $0x130] ss:$8 sps:$4 sm:$0xff]   ;;  %v4057_v47 = vld [vmem:[%s5723_s29 + $0x154] ss:$8 sps:$4 sm:$0xff]  }
  0x1d   :  { %1069 = vmatprep.subr.bf16.mxu0 %v4001_v8  ;;  %v4093_v42 = vld [vmem:[%s5724_s3 + $0xc] ss:$36 sps:$4 sm:$0xff]   ;;  %v4052_v46 = vld [vmem:[%s5723_s29 + $0x140] ss:$8 sps:$4 sm:$0xff]   ;;  %v4063_v51 = vld [vmem:[%s5723_s29 + $0x174] ss:$8 sps:$4 sm:$0xff]  }
  0x1e   :  { %v4054_v45 = vld [vmem:[%s5723_s29 + $0x144] ss:$8 sps:$4 sm:$0xff]   ;;  %v4055_v48 = vld [vmem:[%s5723_s29 + $0x150] ss:$8 sps:$4 sm:$0xff]   ;;  %v4058_v50 = vld [vmem:[%s5723_s29 + $0x160] ss:$8 sps:$4 sm:$0xff]  }
  0x1f   :  { %v4060_v49 = vld [vmem:[%s5723_s29 + $0x164] ss:$8 sps:$4 sm:$0xff]   ;;  %v4061_v52 = vld [vmem:[%s5723_s29 + $0x170] ss:$8 sps:$4 sm:$0xff]   ;;  %v4064_v54 = vld [vmem:[%s5723_s29 + $0x180] ss:$8 sps:$4 sm:$0xff]  }
  0x20   :  { %1070 = vmatpush1.bf16.msra.mxu0 %v4003_v9  ;;  %v4066_v53 = vld [vmem:[%s5723_s29 + $0x184] ss:$8 sps:$4 sm:$0xff]   ;;  %v4069_v55 = vld [vmem:[%s5723_s29 + $0x194] ss:$8 sps:$4 sm:$0xff]   ;;  %v4067_v56 = vld [vmem:[%s5723_s29 + $0x190] ss:$8 sps:$4 sm:$0xff]  }
  0x21   :  { %1071 = vmatprep.subr.bf16.mxu0 %v4004_v10  ;;  %v4072_v57 = vld [vmem:[%s5723_s29 + $0x1a4] ss:$8 sps:$4 sm:$0xff]   ;;  %v4070_v58 = vld [vmem:[%s5723_s29 + $0x1a0] ss:$8 sps:$4 sm:$0xff]   ;;  %v4075_v59 = vld [vmem:[%s5723_s29 + $0x1b4] ss:$8 sps:$4 sm:$0xff]  }
  0x22   :  { %v4073_v60 = vld [vmem:[%s5723_s29 + $0x1b0] ss:$8 sps:$4 sm:$0xff]   ;;  %v4078_v61 = vld [vmem:[%s5723_s29 + $0x1c4] ss:$8 sps:$4 sm:$0xff]   ;;  %v4076_v62 = vld [vmem:[%s5723_s29 + $0x1c0] ss:$8 sps:$4 sm:$0xff]  }
  0x23   :  { %v4081_v63 = vld [vmem:[%s5723_s29 + $0x1d4] ss:$8 sps:$4 sm:$0xff]   ;;  %v4079_v0 = vld [vmem:[%s5723_s29 + $0x1d0] ss:$8 sps:$4 sm:$0xff]   ;;  %v4086_v1 = vld [vmem:[%s5723_s29 + $0x1e4] ss:$8 sps:$4 sm:$0xff]  }
  0x24   :  { %1072 = vmatpush1.bf16.msra.mxu0 %v4006_v11  ;;  %v4084_v2 = vld [vmem:[%s5723_s29 + $0x1e0] ss:$8 sps:$4 sm:$0xff]   ;;  %v4090_v3 = vld [vmem:[%s5723_s29 + $0x1f4] ss:$8 sps:$4 sm:$0xff]   ;;  %v4088_v4 = vld [vmem:[%s5723_s29 + $0x1f0] ss:$8 sps:$4 sm:$0xff]  }
  0x25   :  { %1073 = vmatprep.subr.bf16.mxu0 %v4007_v12  ;;  %v4096_v5 = vld [vmem:[%s5723_s29 + $0x204] ss:$8 sps:$4 sm:$0xff]   ;;  %v4094_v7 = vld [vmem:[%s5723_s29 + $0x200] ss:$8 sps:$4 sm:$0xff]   ;;  %v4136_v8 = vld [vmem:[%s5724_s3 + $0x54] ss:$36 sps:$4 sm:$0xff]  }
  0x26   :  { %v4091_v6 = vld [vmem:[%s5724_s3 + $0x8] ss:$36 sps:$4 sm:$0xff]   ;;  %v4099_v9 = vld [vmem:[%s5723_s29 + $0x214] ss:$8 sps:$4 sm:$0xff]   ;;  %v4097_v10 = vld [vmem:[%s5723_s29 + $0x210] ss:$8 sps:$4 sm:$0xff]  }
  0x27   :  { %v4102_v11 = vld [vmem:[%s5723_s29 + $0x224] ss:$8 sps:$4 sm:$0xff]   ;;  %v4141_v12 = vld [vmem:[%s5724_s3 + $0x50] ss:$36 sps:$4 sm:$0xff]   ;;  %v4100_v13 = vld [vmem:[%s5723_s29 + $0x220] ss:$8 sps:$4 sm:$0xff]  }
  0x28   :  { %1074 = vmatpush1.bf16.msra.mxu0 %v4009_v14  ;;  %v4105_v14 = vld [vmem:[%s5723_s29 + $0x234] ss:$8 sps:$4 sm:$0xff]  }
  0x29   :  { %1075 = vmatprep.subr.bf16.mxu0 %v4010_v15  ;;  %v4147_v15 = vld [vmem:[%s5724_s3 + $0x14] ss:$36 sps:$4 sm:$0xff]  }
  0x2c   :  { %1076 = vmatpush1.bf16.msra.mxu0 %v4012_v16  ;;  %v4103_v16 = vld [vmem:[%s5723_s29 + $0x230] ss:$8 sps:$4 sm:$0xff]  }
  0x2d   :  { %1077 = vmatprep.subr.bf16.mxu0 %v4013_v17  ;;  %v4108_v17 = vld [vmem:[%s5723_s29 + $0x244] ss:$8 sps:$4 sm:$0xff]  }
  0x30   :  { %1078 = vmatpush1.bf16.msra.mxu0 %v4015_v18  ;;  %v4106_v18 = vld [vmem:[%s5723_s29 + $0x240] ss:$8 sps:$4 sm:$0xff]  }
  0x31   :  { %1079 = vmatprep.subr.bf16.mxu0 %v4016_v19  ;;  %v4111_v19 = vld [vmem:[%s5723_s29 + $0x254] ss:$8 sps:$4 sm:$0xff]  }
  0x34   :  { %1080 = vmatpush1.bf16.msra.mxu0 %v4018_v20  ;;  %v4109_v20 = vld [vmem:[%s5723_s29 + $0x250] ss:$8 sps:$4 sm:$0xff]  }
  0x35   :  { %1081 = vmatprep.subr.bf16.mxu0 %v4019_v21  ;;  %v4114_v21 = vld [vmem:[%s5723_s29 + $0x264] ss:$8 sps:$4 sm:$0xff]  }
  0x38   :  { %1082 = vmatpush1.bf16.msra.mxu0 %v4021_v22  ;;  %v4112_v22 = vld [vmem:[%s5723_s29 + $0x260] ss:$8 sps:$4 sm:$0xff]  }
  0x39   :  { %1083 = vmatprep.subr.bf16.mxu0 %v4022_v23  ;;  %v4117_v23 = vld [vmem:[%s5723_s29 + $0x274] ss:$8 sps:$4 sm:$0xff]  }
  0x3c   :  { %1084 = vmatpush1.bf16.msra.mxu0 %v4024_v24  ;;  %v4115_v24 = vld [vmem:[%s5723_s29 + $0x270] ss:$8 sps:$4 sm:$0xff]  }
  0x3d   :  { %1085 = vmatprep.subr.bf16.mxu0 %v4025_v25  ;;  %v4120_v25 = vld [vmem:[%s5723_s29 + $0x284] ss:$8 sps:$4 sm:$0xff]  }
  0x40   :  { %1086 = vmatpush1.bf16.msra.mxu0 %v4027_v26  ;;  %v4118_v26 = vld [vmem:[%s5723_s29 + $0x280] ss:$8 sps:$4 sm:$0xff]  }
  0x41   :  { %1087 = vmatprep.subr.bf16.mxu0 %v4028_v27  ;;  %v4123_v27 = vld [vmem:[%s5723_s29 + $0x294] ss:$8 sps:$4 sm:$0xff]  }
  0x44   :  { %1088 = vmatpush1.bf16.msra.mxu0 %v4030_v28  ;;  %v4399_v28 = vmov 0  }
  0x45   :  { %1089 = vmatprep.subr.bf16.mxu0 %v4031_v29  ;;  %1375 = vmatprep.mubr.bf16.mxu1 %v4399_v28  ;;  %v4121_v29 = vld [vmem:[%s5723_s29 + $0x290] ss:$8 sps:$4 sm:$0xff]  }
  0x48   :  { %1090 = vmatpush1.bf16.msra.mxu0 %v4033_v30  ;;  %v4126_v30 = vld [vmem:[%s5723_s29 + $0x2a4] ss:$8 sps:$4 sm:$0xff]  }
  0x49   :  { %1091 = vmatprep.subr.bf16.mxu0 %v4034_v31  ;;  %v4124_v31 = vld [vmem:[%s5723_s29 + $0x2a0] ss:$8 sps:$4 sm:$0xff]  }
  0x4c   :  { %1092 = vmatpush1.bf16.msra.mxu0 %v4036_v32  ;;  %v4129_v32 = vld [vmem:[%s5723_s29 + $0x2b4] ss:$8 sps:$4 sm:$0xff]  }
  0x4d   :  { %1114 = vmatprep.subr.bf16.mxu0 %v4042_v33  ;;  %v4127_v33 = vld [vmem:[%s5723_s29 + $0x2b0] ss:$8 sps:$4 sm:$0xff]  }
  0x4f   :  { %1094 = vmatmul.mubr.bf16.vlgmr.msra.gmra.mrb[0].mxu0 %v4037_v34  ;;  %v4132_v34 = vld [vmem:[%s5723_s29 + $0x2c4] ss:$8 sps:$4 sm:$0xff]  }
  0x50   :  { %1115 = vmatpush1.bf16.msra.mxu0 %v4040_v35  ;;  %1103 = vmatprep.mubr.bf16.mxu0 %v4082_v36  ;;  %v4130_v35 = vld [vmem:[%s5723_s29 + $0x2c0] ss:$8 sps:$4 sm:$0xff]   ;;  %v4135_v36 = vld [vmem:[%s5723_s29 + $0x2d4] ss:$8 sps:$4 sm:$0xff]  }
  0x51   :  { %1116 = vmatprep.subr.bf16.mxu0 %v4045_v37  ;;  %v4133_v37 = vld [vmem:[%s5723_s29 + $0x2d0] ss:$8 sps:$4 sm:$0xff]  }
  0x54   :  { %1117 = vmatpush1.bf16.msra.mxu0 %v4043_v38 }
  0x55   :  { %1118 = vmatprep.subr.bf16.mxu0 %v4048_v39 }
  0x57   :  { %1104 = vmatmul.mubr.bf16.gmra.mrb[4].mxu0 %v4087_v40 }
  0x58   :  { %1119 = vmatpush1.bf16.msra.mxu0 %v4046_v41  ;;  %1146 = vmatprep.mubr.bf16.mxu0 %v4093_v42 }
  0x59   :  { %1120 = vmatprep.subr.bf16.mxu0 %v4051_v43 }
  0x5c   :  { %1121 = vmatpush1.bf16.msra.mxu0 %v4049_v44 }
  0x5d   :  { %1122 = vmatprep.subr.bf16.mxu0 %v4054_v45 }
  0x60   :  { %1123 = vmatpush1.bf16.msra.mxu0 %v4052_v46 }
  0x61   :  { %1124 = vmatprep.subr.bf16.mxu0 %v4057_v47 }
  0x64   :  { %1125 = vmatpush1.bf16.msra.mxu0 %v4055_v48 }
  0x65   :  { %1126 = vmatprep.subr.bf16.mxu0 %v4060_v49 }
  0x68   :  { %1127 = vmatpush1.bf16.msra.mxu0 %v4058_v50 }
  0x69   :  { %1128 = vmatprep.subr.bf16.mxu0 %v4063_v51 }
  0x6c   :  { %1129 = vmatpush1.bf16.msra.mxu0 %v4061_v52 }
  0x6d   :  { %1130 = vmatprep.subr.bf16.mxu0 %v4066_v53 }
  0x70   :  { %1131 = vmatpush1.bf16.msra.mxu0 %v4064_v54 }
  0x71   :  { %1132 = vmatprep.subr.bf16.mxu0 %v4069_v55 }
  0x74   :  { %1133 = vmatpush1.bf16.msra.mxu0 %v4067_v56 }
  0x75   :  { %1134 = vmatprep.subr.bf16.mxu0 %v4072_v57 }
  0x78   :  { %1135 = vmatpush1.bf16.msra.mxu0 %v4070_v58 }
  0x79   :  { %1136 = vmatprep.subr.bf16.mxu0 %v4075_v59 }
  0x7c   :  { %1137 = vmatpush1.bf16.msra.mxu0 %v4073_v60 }
  0x7d   :  { %1138 = vmatprep.subr.bf16.mxu0 %v4078_v61 }
  0x80   :  { %1139 = vmatpush1.bf16.msra.mxu0 %v4076_v62 }
  0x81   :  { %1140 = vmatprep.subr.bf16.mxu0 %v4081_v63 }
  0x84   :  { %1141 = vmatpush1.bf16.msra.mxu0 %v4079_v0 }
  0x85   :  { %1142 = vmatprep.subr.bf16.mxu0 %v4086_v1 }
  0x88   :  { %1143 = vmatpush1.bf16.msra.mxu0 %v4084_v2 }
  0x89   :  { %1144 = vmatprep.subr.bf16.mxu0 %v4090_v3 }
  0x8c   :  { %1145 = vmatpush1.bf16.msra.mxu0 %v4088_v4 }
  0x8d   :  { %1167 = vmatprep.subr.bf16.mxu0 %v4096_v5 }
  0x8f   :  { %1147 = vmatmul.mubr.bf16.vlgmr.msra.gmra.mrb[0].mxu0 %v4091_v6 }
  0x90   :  { %1168 = vmatpush1.bf16.msra.mxu0 %v4094_v7  ;;  %1156 = vmatprep.mubr.bf16.mxu0 %v4136_v8 }
  0x91   :  { %1169 = vmatprep.subr.bf16.mxu0 %v4099_v9 }
  0x94   :  { %1170 = vmatpush1.bf16.msra.mxu0 %v4097_v10 }
  0x95   :  { %1171 = vmatprep.subr.bf16.mxu0 %v4102_v11 }
  0x97   :  { %1157 = vmatmul.mubr.bf16.gmra.mrb[4].mxu0 %v4141_v12 }
  0x98   :  { %1172 = vmatpush1.bf16.msra.mxu0 %v4100_v13  ;;  %1199 = vmatprep.mubr.bf16.mxu0 %v4147_v15 }
  0x99   :  { %1173 = vmatprep.subr.bf16.mxu0 %v4105_v14 }
  0x9c   :  { %1174 = vmatpush1.bf16.msra.mxu0 %v4103_v16 }
  0x9d   :  { %1175 = vmatprep.subr.bf16.mxu0 %v4108_v17 }
  0xa0   :  { %1176 = vmatpush1.bf16.msra.mxu0 %v4106_v18 }
  0xa1   :  { %1177 = vmatprep.subr.bf16.mxu0 %v4111_v19 }
  0xa4   :  { %1178 = vmatpush1.bf16.msra.mxu0 %v4109_v20 }
  0xa5   :  { %1179 = vmatprep.subr.bf16.mxu0 %v4114_v21 }
  0xa8   :  { %1180 = vmatpush1.bf16.msra.mxu0 %v4112_v22 }
  0xa9   :  { %1181 = vmatprep.subr.bf16.mxu0 %v4117_v23 }
  0xac   :  { %1182 = vmatpush1.bf16.msra.mxu0 %v4115_v24 }
  0xad   :  { %1183 = vmatprep.subr.bf16.mxu0 %v4120_v25 }
  0xb0   :  { %1184 = vmatpush1.bf16.msra.mxu0 %v4118_v26 }
  0xb1   :  { %1185 = vmatprep.subr.bf16.mxu0 %v4123_v27 }
  0xb4   :  { %1186 = vmatpush1.bf16.msra.mxu0 %v4121_v29 }
  0xb5   :  { %1187 = vmatprep.subr.bf16.mxu0 %v4126_v30 }
  0xb8   :  { %1188 = vmatpush1.bf16.msra.mxu0 %v4124_v31 }
  0xb9   :  { %1189 = vmatprep.subr.bf16.mxu0 %v4129_v32 }
  0xbc   :  { %1190 = vmatpush1.bf16.msra.mxu0 %v4127_v33 }
  0xbd   :  { %1191 = vmatprep.subr.bf16.mxu0 %v4132_v34 }
  0xc0   :  { %1192 = vmatpush1.bf16.msra.mxu0 %v4130_v35 }
  0xc1   :  { %27 = vsyncpa [#allocation3], 0  ;;  %1193 = vmatprep.subr.bf16.mxu0 %v4135_v36  ;;  %v4140_v38 = vld [vmem:[%s5723_s29 + $0x2e4] ss:$8 sps:$4 sm:$0xff]   ;;  %v4138_v39 = vld [vmem:[%s5723_s29 + $0x2e0] ss:$8 sps:$4 sm:$0xff]   ;;  %v239_v36 = vlaneseq }
  0xc2   :  { %v4144_v40 = vld [vmem:[%s5723_s29 + $0x2f4] ss:$8 sps:$4 sm:$0xff]   ;;  %v4142_v41 = vld [vmem:[%s5723_s29 + $0x2f0] ss:$8 sps:$4 sm:$0xff]   ;;  %v4150_v42 = vld [vmem:[%s5723_s29 + $0x304] ss:$8 sps:$4 sm:$0xff]  }
  0xc3   :  { %v4145_v43 = vld [vmem:[%s5724_s3 + $0x10] ss:$36 sps:$4 sm:$0xff]   ;;  %v4148_v44 = vld [vmem:[%s5723_s29 + $0x300] ss:$8 sps:$4 sm:$0xff]   ;;  %v4156_v48 = vld [vmem:[%s5723_s29 + $0x324] ss:$8 sps:$4 sm:$0xff]  }
  0xc4   :  { %1194 = vmatpush1.bf16.msra.mxu0 %v4133_v37  ;;  %v4190_v45 = vld [vmem:[%s5724_s3 + $0x5c] ss:$36 sps:$4 sm:$0xff]   ;;  %v4151_v47 = vld [vmem:[%s5723_s29 + $0x310] ss:$8 sps:$4 sm:$0xff]   ;;  %v4162_v54 = vld [vmem:[%s5723_s29 + $0x344] ss:$8 sps:$4 sm:$0xff]  }
  0xc5   :  { %1195 = vmatprep.subr.bf16.mxu0 %v4140_v38  ;;  %v4153_v46 = vld [vmem:[%s5723_s29 + $0x314] ss:$8 sps:$4 sm:$0xff]   ;;  %v4154_v50 = vld [vmem:[%s5723_s29 + $0x320] ss:$8 sps:$4 sm:$0xff]   ;;  %v4157_v53 = vld [vmem:[%s5723_s29 + $0x330] ss:$8 sps:$4 sm:$0xff]  }
  0xc6   :  { %v4195_v49 = vld [vmem:[%s5724_s3 + $0x58] ss:$36 sps:$4 sm:$0xff]   ;;  %v4160_v55 = vld [vmem:[%s5723_s29 + $0x340] ss:$8 sps:$4 sm:$0xff]   ;;  %v4168_v58 = vld [vmem:[%s5723_s29 + $0x364] ss:$8 sps:$4 sm:$0xff]  }
  0xc7   :  { %v4201_v51 = vld [vmem:[%s5724_s3 + $0x1c] ss:$36 sps:$4 sm:$0xff]   ;;  %v4163_v57 = vld [vmem:[%s5723_s29 + $0x350] ss:$8 sps:$4 sm:$0xff]   ;;  %v4174_v62 = vld [vmem:[%s5723_s29 + $0x384] ss:$8 sps:$4 sm:$0xff]  }
  0xc8   :  { %1196 = vmatpush1.bf16.msra.mxu0 %v4138_v39  ;;  %v4159_v52 = vld [vmem:[%s5723_s29 + $0x334] ss:$8 sps:$4 sm:$0xff]   ;;  %v4166_v59 = vld [vmem:[%s5723_s29 + $0x360] ss:$8 sps:$4 sm:$0xff]   ;;  %v4169_v61 = vld [vmem:[%s5723_s29 + $0x370] ss:$8 sps:$4 sm:$0xff]  }
  0xc9   :  { %1197 = vmatprep.subr.bf16.mxu0 %v4144_v40  ;;  %v4165_v56 = vld [vmem:[%s5723_s29 + $0x354] ss:$8 sps:$4 sm:$0xff]   ;;  %v4172_v63 = vld [vmem:[%s5723_s29 + $0x380] ss:$8 sps:$4 sm:$0xff]   ;;  %v4175_v1 = vld [vmem:[%s5723_s29 + $0x390] ss:$8 sps:$4 sm:$0xff]  }
  0xca   :  { %v4171_v60 = vld [vmem:[%s5723_s29 + $0x374] ss:$8 sps:$4 sm:$0xff]   ;;  %v4180_v2 = vld [vmem:[%s5723_s29 + $0x3a4] ss:$8 sps:$4 sm:$0xff]   ;;  %v4178_v3 = vld [vmem:[%s5723_s29 + $0x3a0] ss:$8 sps:$4 sm:$0xff]  }
  0xcb   :  { %v4177_v0 = vld [vmem:[%s5723_s29 + $0x394] ss:$8 sps:$4 sm:$0xff]   ;;  %v4181_v5 = vld [vmem:[%s5723_s29 + $0x3b0] ss:$8 sps:$4 sm:$0xff]   ;;  %v4186_v6 = vld [vmem:[%s5723_s29 + $0x3c4] ss:$8 sps:$4 sm:$0xff]  }
  0xcc   :  { %1198 = vmatpush1.bf16.msra.mxu0 %v4142_v41  ;;  %v4183_v4 = vld [vmem:[%s5723_s29 + $0x3b4] ss:$8 sps:$4 sm:$0xff]   ;;  %v4184_v7 = vld [vmem:[%s5723_s29 + $0x3c0] ss:$8 sps:$4 sm:$0xff]   ;;  %v4187_v9 = vld [vmem:[%s5723_s29 + $0x3d0] ss:$8 sps:$4 sm:$0xff]  }
  0xcd   :  { %1220 = vmatprep.subr.bf16.mxu0 %v4150_v42  ;;  %v4189_v8 = vld [vmem:[%s5723_s29 + $0x3d4] ss:$8 sps:$4 sm:$0xff]   ;;  %v4194_v10 = vld [vmem:[%s5723_s29 + $0x3e4] ss:$8 sps:$4 sm:$0xff]   ;;  %v4192_v11 = vld [vmem:[%s5723_s29 + $0x3e0] ss:$8 sps:$4 sm:$0xff]  }
  0xce   :  { %v4198_v12 = vld [vmem:[%s5723_s29 + $0x3f4] ss:$8 sps:$4 sm:$0xff]   ;;  %v4196_v13 = vld [vmem:[%s5723_s29 + $0x3f0] ss:$8 sps:$4 sm:$0xff]   ;;  %v4204_v14 = vld [vmem:[%s5723_s29 + $0x404] ss:$8 sps:$4 sm:$0xff]  }
  0xcf   :  { %1200 = vmatmul.mubr.bf16.vlgmr.msra.gmra.mrb[0].mxu0 %v4145_v43  ;;  %v4199_v15 = vld [vmem:[%s5724_s3 + $0x18] ss:$36 sps:$4 sm:$0xff]   ;;  %v4202_v16 = vld [vmem:[%s5723_s29 + $0x400] ss:$8 sps:$4 sm:$0xff]   ;;  %v4210_v20 = vld [vmem:[%s5723_s29 + $0x424] ss:$8 sps:$4 sm:$0xff]  }
  0xd0   :  { %1221 = vmatpush1.bf16.msra.mxu0 %v4148_v44  ;;  %1209 = vmatprep.mubr.bf16.mxu0 %v4190_v45  ;;  %v4220_v17 = vld [vmem:[%s5724_s3 + $0x64] ss:$36 sps:$4 sm:$0xff]   ;;  %v4207_v18 = vld [vmem:[%s5723_s29 + $0x414] ss:$8 sps:$4 sm:$0xff]   ;;  %v4205_v19 = vld [vmem:[%s5723_s29 + $0x410] ss:$8 sps:$4 sm:$0xff]  }
  0xd1   :  { %1222 = vmatprep.subr.bf16.mxu0 %v4153_v46  ;;  %v4222_v21 = vld [vmem:[%s5724_s3 + $0x60] ss:$36 sps:$4 sm:$0xff]   ;;  %v4213_v23 = vld [vmem:[%s5723_s29 + $0x434] ss:$8 sps:$4 sm:$0xff]   ;;  %v4211_v24 = vld [vmem:[%s5723_s29 + $0x430] ss:$8 sps:$4 sm:$0xff]  }
  0xd2   :  { %v4208_v22 = vld [vmem:[%s5723_s29 + $0x420] ss:$8 sps:$4 sm:$0xff]   ;;  %v4216_v25 = vld [vmem:[%s5723_s29 + $0x444] ss:$8 sps:$4 sm:$0xff]   ;;  %v4219_v27 = vld [vmem:[%s5723_s29 + $0x454] ss:$8 sps:$4 sm:$0xff]  }
  0xd3   :  { %v4214_v26 = vld [vmem:[%s5723_s29 + $0x440] ss:$8 sps:$4 sm:$0xff]   ;;  %v4217_v29 = vld [vmem:[%s5723_s29 + $0x450] ss:$8 sps:$4 sm:$0xff]   ;;  %v4225_v30 = vld [vmem:[%s5723_s29 + $0x464] ss:$8 sps:$4 sm:$0xff]  }
  0xd4   :  { %1223 = vmatpush1.bf16.msra.mxu0 %v4151_v47  ;;  %v4223_v31 = vld [vmem:[%s5723_s29 + $0x460] ss:$8 sps:$4 sm:$0xff]   ;;  %v4228_v32 = vld [vmem:[%s5723_s29 + $0x474] ss:$8 sps:$4 sm:$0xff]   ;;  %v4226_v33 = vld [vmem:[%s5723_s29 + $0x470] ss:$8 sps:$4 sm:$0xff]  }
  0xd5   :  { %1224 = vmatprep.subr.bf16.mxu0 %v4156_v48  ;;  %v4229_v34 = vld [vmem:[%s5724_s3 + $0x20] ss:$36 sps:$4 sm:$0xff]   ;;  %v4230_v35 = vld [vmem:[%s5724_s3 + $0x68] ss:$36 sps:$4 sm:$0xff]   ;;  %v5008_v37 = vshrl.u32 %v239_v36, 7  ;;  %s5725_s2 = sld [smem:[#allocation7_spill]] }
  0xd6   :  { %s5726_s28 = sld [smem:[#allocation9_spill]]  ;;  %vm1339_vm0 = vcmask 261120   ;;  %s5727_s1 = sld [smem:[#allocation8_spill]]  ;;  %vm4402_vm1 = vmmov 0   ;;  %vm3499_vm2 = vcmask 25600  }
  0xd7   :  { %1210 = vmatmul.mubr.bf16.gmra.mrb[4].mxu0 %v4195_v49  ;;  %v5011_v38 = vsub.s32 0, %v5008_v37  ;;  %v5017_v40 = vsub.s32 1, %v5008_v37  ;;  %s5728_s24 = sld [smem:[#allocation10_spill]]  ;;  %s5729_s4 = sld [smem:[#allocation11_spill]] }
  0xd8   :  { %1225 = vmatpush1.bf16.msra.mxu0 %v4154_v50  ;;  %1252 = vmatprep.mubr.bf16.mxu0 %v4201_v51 }
  0xd9   :  { %1226 = vmatprep.subr.bf16.mxu0 %v4159_v52 }
  0xdb   :  { %v237_v39 = vld [vmem:[%s5725_s2] sm:$0x3] }
  0xdc   :  { %1227 = vmatpush1.bf16.msra.mxu0 %v4157_v53  ;;  %v242_v41 = vrot.slane %v237_v39, %v5011_v38  ;;  %v246_v42 = vrot.slane %v237_v39, %v5017_v40 }
  0xdd   :  { %1228 = vmatprep.subr.bf16.mxu0 %v4162_v54  ;;  %v1416_v39 = vld [vmem:[%s5728_s24] sm:$0x3] }
  0xe0   :  { %1229 = vmatpush1.bf16.msra.mxu0 %v4160_v55 }
  0xe1   :  { %1230 = vmatprep.subr.bf16.mxu0 %v4165_v56 }
  0xe4   :  { %1231 = vmatpush1.bf16.msra.mxu0 %v4163_v57 }
  0xe5   :  { %1232 = vmatprep.subr.bf16.mxu0 %v4168_v58 }
  0xe8   :  { %1233 = vmatpush1.bf16.msra.mxu0 %v4166_v59 }
  0xe9   :  { %1234 = vmatprep.subr.bf16.mxu0 %v4171_v60 }
  0xec   :  { %1235 = vmatpush1.bf16.msra.mxu0 %v4169_v61 }
  0xed   :  { %1236 = vmatprep.subr.bf16.mxu0 %v4174_v62 }
  0xf0   :  { %1237 = vmatpush1.bf16.msra.mxu0 %v4172_v63 }
  0xf1   :  { %1238 = vmatprep.subr.bf16.mxu0 %v4177_v0 }
  0xf4   :  { %1239 = vmatpush1.bf16.msra.mxu0 %v4175_v1 }
  0xf5   :  { %1240 = vmatprep.subr.bf16.mxu0 %v4180_v2 }
  0xf8   :  { %1241 = vmatpush1.bf16.msra.mxu0 %v4178_v3 }
  0xf9   :  { %1242 = vmatprep.subr.bf16.mxu0 %v4183_v4 }
  0xfc   :  { %1243 = vmatpush1.bf16.msra.mxu0 %v4181_v5 }
  0xfd   :  { %1244 = vmatprep.subr.bf16.mxu0 %v4186_v6 }
 0x100   :  { %1245 = vmatpush1.bf16.msra.mxu0 %v4184_v7  ;;  %v4233_v7 = vld [vmem:[%s5726_s28 + $0x4] ss:$8 sps:$4 sm:$0xff]  }
 0x101   :  { %1246 = vmatprep.subr.bf16.mxu0 %v4189_v8  ;;  %v1334_v8 = vld [vmem:[%s5697_s9] sm:$0x1] }
 0x104   :  { %1247 = vmatpush1.bf16.msra.mxu0 %v4187_v9  ;;  %v4231_v9 = vld [vmem:[%s5726_s28] ss:$8 sps:$4 sm:$0xff]  }
 0x105   :  { %1248 = vmatprep.subr.bf16.mxu0 %v4194_v10  ;;  %v4236_v10 = vld [vmem:[%s5726_s28 + $0x14] ss:$8 sps:$4 sm:$0xff]  }
 0x108   :  { %1249 = vmatpush1.bf16.msra.mxu0 %v4192_v11  ;;  %v4234_v11 = vld [vmem:[%s5726_s28 + $0x10] ss:$8 sps:$4 sm:$0xff]  }
 0x109   :  { %1250 = vmatprep.subr.bf16.mxu0 %v4198_v12  ;;  %v4239_v12 = vld [vmem:[%s5726_s28 + $0x24] ss:$8 sps:$4 sm:$0xff]  }
 0x10c   :  { %1251 = vmatpush1.bf16.msra.mxu0 %v4196_v13  ;;  %v4237_v13 = vld [vmem:[%s5726_s28 + $0x20] ss:$8 sps:$4 sm:$0xff]  }
 0x10d   :  { %1273 = vmatprep.subr.bf16.mxu0 %v4204_v14  ;;  %v4242_v14 = vld [vmem:[%s5726_s28 + $0x34] ss:$8 sps:$4 sm:$0xff]  }
 0x10f   :  { %1253 = vmatmul.mubr.bf16.vlgmr.msra.gmra.mrb[0].mxu0 %v4199_v15  ;;  %v4240_v15 = vld [vmem:[%s5726_s28 + $0x30] ss:$8 sps:$4 sm:$0xff]  }
 0x110   :  { %1274 = vmatpush1.bf16.msra.mxu0 %v4202_v16  ;;  %1262 = vmatprep.mubr.bf16.mxu0 %v4220_v17  ;;  %v4245_v16 = vld [vmem:[%s5726_s28 + $0x44] ss:$8 sps:$4 sm:$0xff]   ;;  %v4243_v17 = vld [vmem:[%s5726_s28 + $0x40] ss:$8 sps:$4 sm:$0xff]  }
 0x111   :  { %1275 = vmatprep.subr.bf16.mxu0 %v4207_v18  ;;  %v4248_v18 = vld [vmem:[%s5726_s28 + $0x54] ss:$8 sps:$4 sm:$0xff]  }
 0x114   :  { %1276 = vmatpush1.bf16.msra.mxu0 %v4205_v19  ;;  %v4246_v19 = vld [vmem:[%s5726_s28 + $0x50] ss:$8 sps:$4 sm:$0xff]  }
 0x115   :  { %1277 = vmatprep.subr.bf16.mxu0 %v4210_v20  ;;  %v4251_v20 = vld [vmem:[%s5726_s28 + $0x64] ss:$8 sps:$4 sm:$0xff]  }
 0x117   :  { %1263 = vmatmul.mubr.bf16.gmra.mrb[4].mxu0 %v4222_v21  ;;  %v4249_v21 = vld [vmem:[%s5726_s28 + $0x60] ss:$8 sps:$4 sm:$0xff]  }
 0x118   :  { %1278 = vmatpush1.bf16.msra.mxu0 %v4208_v22  ;;  %1305 = vmatprep.mubr.bf16.mxu0 %v4399_v28  ;;  %v4254_v22 = vld [vmem:[%s5726_s28 + $0x74] ss:$8 sps:$4 sm:$0xff]  }
 0x119   :  { %1279 = vmatprep.subr.bf16.mxu0 %v4213_v23  ;;  %v4252_v23 = vld [vmem:[%s5726_s28 + $0x70] ss:$8 sps:$4 sm:$0xff]  }
 0x11c   :  { %1280 = vmatpush1.bf16.msra.mxu0 %v4211_v24  ;;  %v4255_v24 = vld [vmem:[%s5727_s1] sm:$0xff]  }
 0x11d   :  { %1281 = vmatprep.subr.bf16.mxu0 %v4216_v25  ;;  %v4256_v25 = vld [vmem:[%s5727_s1 + $0x8] sm:$0xff]  }
 0x120   :  { %1282 = vmatpush1.bf16.msra.mxu0 %v4214_v26  ;;  %v4257_v26 = vld [vmem:[%s5727_s1 + $0x10] sm:$0xff]  }
 0x121   :  { %1283 = vmatprep.subr.bf16.mxu0 %v4219_v27  ;;  %v4258_v27 = vld [vmem:[%s5727_s1 + $0x18] sm:$0xff]  }
 0x124   :  { %1284 = vmatpush1.bf16.msra.mxu0 %v4217_v29  ;;  %v4259_v29 = vld [vmem:[%s5727_s1 + $0x20] sm:$0xff]  }
 0x125   :  { %1285 = vmatprep.subr.bf16.mxu0 %v4225_v30  ;;  %v4260_v30 = vld [vmem:[%s5727_s1 + $0x28] sm:$0xff]  }
 0x128   :  { %1286 = vmatpush1.bf16.msra.mxu0 %v4223_v31  ;;  %v4261_v31 = vld [vmem:[%s5727_s1 + $0x30] sm:$0xff]  }
 0x129   :  { %1287 = vmatprep.subr.bf16.mxu0 %v4228_v32  ;;  %v4262_v32 = vld [vmem:[%s5727_s1 + $0x38] sm:$0xff]  }
 0x12c   :  { %1288 = vmatpush1.bf16.msra.mxu0 %v4226_v33 }
 0x12f   :  { %1306 = vmatmul.mubr.bf16.vlgmr.msra.gmra.mrb[0].mxu0 %v4229_v34 }
 0x130   :  { %1315 = vmatprep.mubr.bf16.mxu0 %v4399_v28 }
 0x137   :  { %1316 = vmatmul.mubr.bf16.gmra.mrb[4].mxu0 %v4230_v35 }
 0x202   :  { %v1307_v43 = vpop.f32.mrb[0].mxu0 }
 0x203   :  { %v3944_v44 = vadd.f32 %v1307_v43, %v242_v41  ;;  %v1309_v45 = vpop.f32.mrb[1].mxu0 }
 0x204   :  { %v3945_v46 = vadd.f32 %v1309_v45, %v246_v42  ;;  %v1311_v47 = vpop.f32.mrb[2].mxu0 }
 0x205   :  { %4355 = vtanh.f32 %v3944_v44  ;;  %v3946_v48 = vadd.f32 %v1311_v47, %v242_v41  ;;  %v1313_v49 = vpop.f32.mrb[3].mxu0 }
 0x206   :  { %4357 = vtanh.f32 %v3945_v46  ;;  %v3947_v50 = vadd.f32 %v1313_v49, %v246_v42 }
 0x207   :  { %4359 = vtanh.f32 %v3946_v48 }
 0x208   :  { %4361 = vtanh.f32 %v3947_v50 }
 0x20a   :  { %v1317_v51 = vpop.f32.mrb[4].mxu0 }
 0x20b   :  { %v3948_v52 = vadd.f32 %v1317_v51, %v242_v41  ;;  %v1319_v53 = vpop.f32.mrb[5].mxu0 }
 0x20c   :  { %v3949_v54 = vadd.f32 %v1319_v53, %v246_v42  ;;  %v1321_v55 = vpop.f32.mrb[6].mxu0 }
 0x20d   :  { %4363 = vtanh.f32 %v3948_v52  ;;  %v3950_v56 = vadd.f32 %v1321_v55, %v242_v41  ;;  %v1323_v57 = vpop.f32.mrb[7].mxu0  ;;  %v5114_v41 = vrot.slane %v1416_v39, %v5011_v38 }
 0x20e   :  { %4365 = vtanh.f32 %v3949_v54  ;;  %v3951_v58 = vadd.f32 %v1323_v57, %v246_v42  ;;  %v5117_v42 = vrot.slane %v1416_v39, %v5017_v40 }
 0x20f   :  { %v4356_v59 = vpop.eup %4355  ;;  %4367 = vtanh.f32 %v3950_v56 }
 0x210   :  { %v4358_v60 = vpop.eup %4357  ;;  %4369 = vtanh.f32 %v3951_v58 }
 0x211   :  { %v4360_v61 = vpop.eup %4359 }
 0x212   :  { %v4362_v62 = vpop.eup %4361  ;;  %v1335_v63 = vpack.c.bf16 %v4360_v61, %v4356_v59 }
 0x213   :  { %v1336_v0 = vpack.c.bf16 %v4362_v62, %v4358_v60 }
 0x215   :  { %1343 = vmatprep.subr.bf16.mxu1 %v1336_v0 }
 0x216   :  { %1344 = vmatpush1.bf16.msra.mxu1 %v1335_v63 }
 0x217   :  { %v4364_v1 = vpop.eup %4363 }
 0x218   :  { %v4366_v2 = vpop.eup %4365 }
 0x219   :  { %v4368_v3 = vpop.eup %4367 }
 0x21a   :  { %v4370_v4 = vpop.eup %4369  ;;  %v1337_v5 = vpack.c.bf16 %v4368_v3, %v4364_v1 }
 0x21b   :  { %v1338_v6 = vpack.c.bf16 %v4370_v4, %v4366_v2 }
 0x21d   :  { %1345 = vmatprep.subr.bf16.mxu1 %v1338_v6 }
 0x21e   :  { %1346 = vmatpush1.bf16.msra.mxu1 %v1337_v5 }
 0x21f   :  { %1556 = vmatprep.subr.bf16.mxu1 %v4233_v7 }
 0x221   :  { %3690 = vmatmul.mubr.msk.bf16.vlgmr.msra.gmra.mrb[0].mxu1 %vm1339_vm0, %v1334_v8 }
 0x222   :  { %1557 = vmatpush1.bf16.msra.mxu1 %v4231_v9  ;;  %1588 = vmatprep.mubr.bf16.mxu1 %v4399_v28 }
 0x223   :  { %1558 = vmatprep.subr.bf16.mxu1 %v4236_v10 }
 0x226   :  { %1559 = vmatpush1.bf16.msra.mxu1 %v4234_v11 }
 0x227   :  { %1560 = vmatprep.subr.bf16.mxu1 %v4239_v12 }
 0x22a   :  { %1561 = vmatpush1.bf16.msra.mxu1 %v4237_v13 }
 0x22b   :  { %1562 = vmatprep.subr.bf16.mxu1 %v4242_v14 }
 0x22e   :  { %1563 = vmatpush1.bf16.msra.mxu1 %v4240_v15 }
 0x22f   :  { %1564 = vmatprep.subr.bf16.mxu1 %v4245_v16 }
 0x232   :  { %1565 = vmatpush1.bf16.msra.mxu1 %v4243_v17 }
 0x233   :  { %1566 = vmatprep.subr.bf16.mxu1 %v4248_v18 }
 0x236   :  { %1567 = vmatpush1.bf16.msra.mxu1 %v4246_v19 }
 0x237   :  { %1568 = vmatprep.subr.bf16.mxu1 %v4251_v20 }
 0x23a   :  { %1569 = vmatpush1.bf16.msra.mxu1 %v4249_v21 }
 0x23b   :  { %1570 = vmatprep.subr.bf16.mxu1 %v4254_v22 }
 0x23e   :  { %1571 = vmatpush1.bf16.msra.mxu1 %v4252_v23 }
 0x241   :  { %1589 = vmatmul.mubr.bf16.vlgmr.msra.gmra.mrb[4].mxu1 %v4255_v24 }
 0x242   :  { %1598 = vmatprep.mubr.bf16.mxu1 %v4399_v28 }
 0x249   :  { %1599 = vmatmul.mubr.bf16.gmra.mrb[8].mxu1 %v4256_v25 }
 0x24a   :  { %1608 = vmatprep.mubr.bf16.mxu1 %v4399_v28 }
 0x251   :  { %1609 = vmatmul.mubr.bf16.gmra.mrb[12].mxu1 %v4257_v26 }
 0x252   :  { %1618 = vmatprep.mubr.bf16.mxu1 %v4399_v28 }
 0x259   :  { %1619 = vmatmul.mubr.bf16.gmra.mrb[16].mxu1 %v4258_v27 }
 0x25a   :  { %1628 = vmatprep.mubr.bf16.mxu1 %v4399_v28 }
 0x261   :  { %1629 = vmatmul.mubr.bf16.gmra.mrb[20].mxu1 %v4259_v29 }
 0x262   :  { %1638 = vmatprep.mubr.bf16.mxu1 %v4399_v28 }
 0x269   :  { %1639 = vmatmul.mubr.bf16.gmra.mrb[24].mxu1 %v4260_v30 }
 0x26a   :  { %1648 = vmatprep.mubr.bf16.mxu1 %v4399_v28 }
 0x271   :  { %1649 = vmatmul.mubr.bf16.gmra.mrb[28].mxu1 %v4261_v31 }
 0x272   :  { %1658 = vmatprep.mubr.bf16.mxu1 %v4399_v28 }
 0x279   :  { %1659 = vmatmul.mubr.bf16.gmra.mrb[32].mxu1 %v4262_v32 }
 0x27a   :  { %1750 = vmatprep.mubr.bf16.mxu1 %v4399_v28 }
 0x2f4   :  { %v5106_v33 = vpop.f32.mrb[0].mxu1 }
 0x2f5   :  { %v5108_v34 = vpop.f32.mrb[1].mxu1 }
 0x2f6   :  { %v1381_v35 = vpop.f32.mrb[2].mxu1 }
 0x2f7   :  { %v1382_v36 = vpop.f32.mrb[3].mxu1 }
 0x314   :  { %v1590_v43 = vpop.f32.mrb[4].mxu1 }
 0x315   :  { %v1591_v44 = vadd.f32 %v1590_v43, %v5114_v41  ;;  %v1592_v45 = vpop.f32.mrb[5].mxu1 }
 0x316   :  { %v1593_v46 = vadd.f32 %v1592_v45, %v5117_v42  ;;  %v1594_v47 = vpop.f32.mrb[6].mxu1 }
 0x317   :  { %v1595_v48 = vadd.f32 %v1594_v47, %v5114_v41  ;;  %v1596_v49 = vpop.f32.mrb[7].mxu1  ;;  %v1669_v51 = vmax.f32 %v1591_v44, 0.0 }
 0x318   :  { %v1597_v50 = vadd.f32 %v1596_v49, %v5117_v42  ;;  %v1670_v53 = vmax.f32 %v1593_v46, 0.0 }
 0x319   :  { %v1671_v52 = vmax.f32 %v1595_v48, 0.0 }
 0x31a   :  { %v1672_v54 = vmax.f32 %v1597_v50, 0.0 }
 0x31b   :  { %v1702_v55 = vpack.c.bf16 %v1671_v52, %v1669_v51 }
 0x31c   :  { %v1703_v56 = vpack.c.bf16 %v1672_v54, %v1670_v53  ;;  %v1600_v57 = vpop.f32.mrb[8].mxu1 }
 0x31d   :  { %v1601_v58 = vadd.f32 %v1600_v57, %v5114_v41  ;;  %v1602_v59 = vpop.f32.mrb[9].mxu1 }
 0x31e   :  { %v1603_v60 = vadd.f32 %v1602_v59, %v5117_v42  ;;  %v1604_v61 = vpop.f32.mrb[10].mxu1  ;;  %1718 = vmatprep.subr.bf16.mxu1 %v1703_v56 }
 0x31f   :  { %v1605_v62 = vadd.f32 %v1604_v61, %v5114_v41  ;;  %v1606_v63 = vpop.f32.mrb[11].mxu1  ;;  %1719 = vmatpush1.bf16.msra.mxu1 %v1702_v55  ;;  %v1673_v1 = vmax.f32 %v1601_v58, 0.0 }
 0x320   :  { %v1607_v0 = vadd.f32 %v1606_v63, %v5117_v42  ;;  %v1674_v3 = vmax.f32 %v1603_v60, 0.0 }
 0x321   :  { %v1675_v2 = vmax.f32 %v1605_v62, 0.0 }
 0x322   :  { %v1676_v4 = vmax.f32 %v1607_v0, 0.0 }
 0x323   :  { %v1704_v5 = vpack.c.bf16 %v1675_v2, %v1673_v1 }
 0x324   :  { %v1705_v6 = vpack.c.bf16 %v1676_v4, %v1674_v3  ;;  %v1610_v7 = vpop.f32.mrb[12].mxu1 }
 0x325   :  { %v1611_v8 = vadd.f32 %v1610_v7, %v5114_v41  ;;  %v1612_v9 = vpop.f32.mrb[13].mxu1 }
 0x326   :  { %v1613_v10 = vadd.f32 %v1612_v9, %v5117_v42  ;;  %v1614_v11 = vpop.f32.mrb[14].mxu1  ;;  %1720 = vmatprep.subr.bf16.mxu1 %v1705_v6 }
 0x327   :  { %v1615_v12 = vadd.f32 %v1614_v11, %v5114_v41  ;;  %v1616_v13 = vpop.f32.mrb[15].mxu1  ;;  %1721 = vmatpush1.bf16.msra.mxu1 %v1704_v5  ;;  %v1677_v15 = vmax.f32 %v1611_v8, 0.0 }
 0x328   :  { %v1617_v14 = vadd.f32 %v1616_v13, %v5117_v42  ;;  %v1678_v17 = vmax.f32 %v1613_v10, 0.0 }
 0x329   :  { %v1679_v16 = vmax.f32 %v1615_v12, 0.0 }
 0x32a   :  { %v1680_v18 = vmax.f32 %v1617_v14, 0.0 }
 0x32b   :  { %v1706_v19 = vpack.c.bf16 %v1679_v16, %v1677_v15 }
 0x32c   :  { %v1707_v20 = vpack.c.bf16 %v1680_v18, %v1678_v17  ;;  %v1620_v21 = vpop.f32.mrb[16].mxu1 }
 0x32d   :  { %v1621_v22 = vadd.f32 %v1620_v21, %v5114_v41  ;;  %v1622_v23 = vpop.f32.mrb[17].mxu1 }
 0x32e   :  { %v1623_v24 = vadd.f32 %v1622_v23, %v5117_v42  ;;  %v1624_v25 = vpop.f32.mrb[18].mxu1  ;;  %1722 = vmatprep.subr.bf16.mxu1 %v1707_v20 }
 0x32f   :  { %v1625_v26 = vadd.f32 %v1624_v25, %v5114_v41  ;;  %v1626_v27 = vpop.f32.mrb[19].mxu1  ;;  %1723 = vmatpush1.bf16.msra.mxu1 %v1706_v19  ;;  %v1681_v30 = vmax.f32 %v1621_v22, 0.0 }
 0x330   :  { %v1627_v29 = vadd.f32 %v1626_v27, %v5117_v42  ;;  %v1682_v32 = vmax.f32 %v1623_v24, 0.0 }
 0x331   :  { %v1683_v31 = vmax.f32 %v1625_v26, 0.0 }
 0x332   :  { %v1684_v35 = vmax.f32 %v1627_v29, 0.0 }
 0x333   :  { %v1708_v36 = vpack.c.bf16 %v1683_v31, %v1681_v30 }
 0x334   :  { %v1709_v39 = vpack.c.bf16 %v1684_v35, %v1682_v32  ;;  %v1630_v43 = vpop.f32.mrb[20].mxu1 }
 0x335   :  { %v1631_v44 = vadd.f32 %v1630_v43, %v5114_v41  ;;  %v1632_v45 = vpop.f32.mrb[21].mxu1  ;;  %v4265_v43 = vld [vmem:[%s5695_s7 + $0x4] ss:$8 sps:$4 sm:$0xff]  }
 0x336   :  { %v1633_v46 = vadd.f32 %v1632_v45, %v5117_v42  ;;  %v1634_v47 = vpop.f32.mrb[22].mxu1  ;;  %1724 = vmatprep.subr.bf16.mxu1 %v1709_v39  ;;  %v4266_v45 = vld [vmem:[%s5695_s7 + $0x10] ss:$8 sps:$4 sm:$0xff]  }
 0x337   :  { %v1635_v48 = vadd.f32 %v1634_v47, %v5114_v41  ;;  %v1636_v49 = vpop.f32.mrb[23].mxu1  ;;  %1725 = vmatpush1.bf16.msra.mxu1 %v1708_v36  ;;  %v1685_v51 = vmax.f32 %v1631_v44, 0.0  ;;  %v4268_v44 = vld [vmem:[%s5695_s7 + $0x14] ss:$8 sps:$4 sm:$0xff]   ;;  %v4270_v47 = vld [vmem:[%s5729_s4 + $0x8] sm:$0xff]  }
 0x338   :  { %v1637_v50 = vadd.f32 %v1636_v49, %v5117_v42  ;;  %v1686_v53 = vmax.f32 %v1633_v46, 0.0  ;;  %v4269_v46 = vld [vmem:[%s5729_s4] sm:$0xff]   ;;  %v4272_v49 = vld [vmem:[%s5729_s4 + $0x18] sm:$0xff]  }
 0x339   :  { %v1687_v52 = vmax.f32 %v1635_v48, 0.0  ;;  %v4271_v48 = vld [vmem:[%s5729_s4 + $0x10] sm:$0xff]  }
 0x33a   :  { %v1688_v54 = vmax.f32 %v1637_v50, 0.0  ;;  %v4273_v50 = vld [vmem:[%s5729_s4 + $0x20] sm:$0xff]  }
 0x33b   :  { %v1710_v55 = vpack.c.bf16 %v1687_v52, %v1685_v51  ;;  %v4274_v51 = vld [vmem:[%s5729_s4 + $0x28] sm:$0xff]   ;;  %v4275_v52 = vld [vmem:[%s5729_s4 + $0x30] sm:$0xff]  }
 0x33c   :  { %v1711_v56 = vpack.c.bf16 %v1688_v54, %v1686_v53  ;;  %v1640_v57 = vpop.f32.mrb[24].mxu1  ;;  %v4276_v53 = vld [vmem:[%s5729_s4 + $0x38] sm:$0xff]   ;;  %v4277_v54 = vld [vmem:[%s5729_s4 + $0x40] sm:$0xff]  }
 0x33d   :  { %v1641_v58 = vadd.f32 %v1640_v57, %v5114_v41  ;;  %v1642_v59 = vpop.f32.mrb[25].mxu1  ;;  %v4280_v57 = vld [vmem:[%s5729_s4 + $0x58] sm:$0xff]  }
 0x33e   :  { %v1643_v60 = vadd.f32 %v1642_v59, %v5117_v42  ;;  %v1644_v61 = vpop.f32.mrb[26].mxu1  ;;  %1726 = vmatprep.subr.bf16.mxu1 %v1711_v56  ;;  %v4279_v56 = vld [vmem:[%s5729_s4 + $0x50] sm:$0xff]   ;;  %v4282_v59 = vld [vmem:[%s5729_s4 + $0x68] sm:$0xff]  }
 0x33f   :  { %v1645_v62 = vadd.f32 %v1644_v61, %v5114_v41  ;;  %v1646_v63 = vpop.f32.mrb[27].mxu1  ;;  %1727 = vmatpush1.bf16.msra.mxu1 %v1710_v55  ;;  %v1689_v1 = vmax.f32 %v1641_v58, 0.0  ;;  %v4278_v55 = vld [vmem:[%s5729_s4 + $0x48] sm:$0xff]   ;;  %v4281_v58 = vld [vmem:[%s5729_s4 + $0x60] sm:$0xff]   ;;  %v4284_v61 = vld [vmem:[%s5729_s4 + $0x78] sm:$0xff]  }
 0x340   :  { %v1647_v0 = vadd.f32 %v1646_v63, %v5117_v42  ;;  %v1690_v3 = vmax.f32 %v1643_v60, 0.0  ;;  %v4283_v60 = vld [vmem:[%s5729_s4 + $0x70] sm:$0xff]   ;;  %v4286_v63 = vld [vmem:[%s5729_s4 + $0x88] sm:$0xff]  }
 0x341   :  { %v1691_v2 = vmax.f32 %v1645_v62, 0.0  ;;  %v4285_v62 = vld [vmem:[%s5729_s4 + $0x80] sm:$0xff]  }
 0x342   :  { %v1692_v4 = vmax.f32 %v1647_v0, 0.0  ;;  %v4287_v0 = vld [vmem:[%s5729_s4 + $0x90] sm:$0xff]  }
 0x343   :  { %v1712_v5 = vpack.c.bf16 %v1691_v2, %v1689_v1  ;;  %v4288_v1 = vld [vmem:[%s5729_s4 + $0x98] sm:$0xff]   ;;  %v4289_v2 = vld [vmem:[%s5729_s4 + $0xa0] sm:$0xff]  }
 0x344   :  { %v1713_v6 = vpack.c.bf16 %v1692_v4, %v1690_v3  ;;  %v1650_v7 = vpop.f32.mrb[28].mxu1  ;;  %v4290_v3 = vld [vmem:[%s5729_s4 + $0xa8] sm:$0xff]   ;;  %v4291_v4 = vld [vmem:[%s5729_s4 + $0xb0] sm:$0xff]  }
 0x345   :  { %v1651_v8 = vadd.f32 %v1650_v7, %v5114_v41  ;;  %v1652_v9 = vpop.f32.mrb[29].mxu1  ;;  %v4294_v7 = vld [vmem:[%s5729_s4 + $0xc8] sm:$0xff]  }
 0x346   :  { %v1653_v10 = vadd.f32 %v1652_v9, %v5117_v42  ;;  %v1654_v11 = vpop.f32.mrb[30].mxu1  ;;  %1728 = vmatprep.subr.bf16.mxu1 %v1713_v6  ;;  %v4293_v6 = vld [vmem:[%s5729_s4 + $0xc0] sm:$0xff]  }
 0x347   :  { %v1655_v12 = vadd.f32 %v1654_v11, %v5114_v41  ;;  %v1656_v13 = vpop.f32.mrb[31].mxu1  ;;  %1729 = vmatpush1.bf16.msra.mxu1 %v1712_v5  ;;  %v1693_v15 = vmax.f32 %v1651_v8, 0.0  ;;  %v4292_v5 = vld [vmem:[%s5729_s4 + $0xb8] sm:$0xff]   ;;  %v4295_v11 = vld [vmem:[%s5729_s4 + $0xd0] sm:$0xff]  }
 0x348   :  { %v1657_v14 = vadd.f32 %v1656_v13, %v5117_v42  ;;  %v1694_v17 = vmax.f32 %v1653_v10, 0.0 }
 0x349   :  { %v1695_v16 = vmax.f32 %v1655_v12, 0.0  ;;  %v1829_v12 = vld [vmem:[%s5696_s8] sm:$0x3] }
 0x34a   :  { %v1696_v18 = vmax.f32 %v1657_v14, 0.0 }
 0x34b   :  { %v1714_v19 = vpack.c.bf16 %v1695_v16, %v1693_v15  ;;  %v5310_v16 = vrot.slane %v1829_v12, %v5011_v38  ;;  %v4296_v38 = vld [vmem:[%s5729_s4 + $0xd8] sm:$0xff]  }
 0x34c   :  { %v1715_v20 = vpack.c.bf16 %v1696_v18, %v1694_v17  ;;  %v1660_v21 = vpop.f32.mrb[32].mxu1  ;;  %v4400_v17 = vmov 1966171168  }
 0x34d   :  { %v1661_v22 = vadd.f32 %v1660_v21, %v5114_v41  ;;  %v1662_v23 = vpop.f32.mrb[33].mxu1  ;;  %v2673_v18 = vunpack.c.l.s4 %v4400_v17 }
 0x34e   :  { %v1663_v24 = vadd.f32 %v1662_v23, %v5117_v42  ;;  %v1664_v25 = vpop.f32.mrb[34].mxu1  ;;  %1730 = vmatprep.subr.bf16.mxu1 %v1715_v20 }
 0x34f   :  { %v1665_v26 = vadd.f32 %v1664_v25, %v5114_v41  ;;  %v1666_v27 = vpop.f32.mrb[35].mxu1  ;;  %1731 = vmatpush1.bf16.msra.mxu1 %v1714_v19  ;;  %v1697_v30 = vmax.f32 %v1661_v22, 0.0  ;;  %v1701_v41 = vld [vmem:[%s5698_s10] sm:$0x1]  ;;  %v5314_v19 = vrot.slane %v1829_v12, %v5017_v40  ;;  %v2674_v20 = vunpack.c.0.s8 %v2673_v18 }
 0x350   :  { %v1667_v29 = vadd.f32 %v1666_v27, %v5117_v42  ;;  %v1698_v32 = vmax.f32 %v1663_v24, 0.0  ;;  %v4263_v42 = vld [vmem:[%s5695_s7] ss:$8 sps:$4 sm:$0xff]  }
 0x351   :  { %v1699_v31 = vmax.f32 %v1665_v26, 0.0  ;;  %v3783_v22 = vld.sshfl [vmem:[%s5699_s11] sm:$0x33 pattern:$0x75316420]  ;;  %v2677_v26 = vsub.s32 %v2674_v20, %v5008_v37 }
 0x352   :  { %v1700_v35 = vmax.f32 %v1667_v29, 0.0  ;;  %v2671_v25 = vcombine.high %v3783_v22, %v3783_v22 }
 0x353   :  { %v1716_v36 = vpack.c.bf16 %v1699_v31, %v1697_v30 }
 0x354   :  { %v1717_v39 = vpack.c.bf16 %v1700_v35, %v1698_v32  ;;  %v5327_v31 = vrot.slane %v2671_v25, %v2677_v26  ;;  %v5330_v35 = vrot.slane %v3783_v22, %v2677_v26 }
 0x356   :  { %1732 = vmatprep.subr.bf16.mxu1 %v1717_v39  ;;  %2724 = vmatprep.mubr.bf16.mxu0 %v5327_v31 }
 0x357   :  { %1733 = vmatpush1.bf16.msra.mxu1 %v1716_v36 }
 0x358   :  { %2117 = vmatprep.subr.bf16.mxu1 %v4265_v43 }
 0x35a   :  { %1751 = vmatmul.mubr.bf16.vlgmr.msra.gmra.mrb[36].mxu1 %v1701_v41 }
 0x35b   :  { %2118 = vmatpush1.bf16.msra.mxu1 %v4263_v42  ;;  %2149 = vmatprep.mubr.bf16.mxu1 %v4399_v28 }
 0x35c   :  { %2119 = vmatprep.subr.bf16.mxu1 %v4268_v44 }
 0x35f   :  { %2120 = vmatpush1.bf16.msra.mxu1 %v4266_v45 }
 0x362   :  { %3751 = vmatmul.mubr.msk.bf16.vlgmr.msra.gmra.mrb[40].mxu1 %vm1339_vm0, %v4269_v46 }
 0x363   :  { %2159 = vmatprep.mubr.bf16.mxu1 %v4399_v28 }
 0x36a   :  { %3752 = vmatmul.mubr.msk.bf16.gmra.mrb[44].mxu1 %vm1339_vm0, %v4270_v47  ;;  %v4297_v47 = vld [vmem:[%s5729_s4 + $0xe0] sm:$0xff]  }
 0x36b   :  { %2169 = vmatprep.mubr.bf16.mxu1 %v4399_v28 }
 0x372   :  { %3753 = vmatmul.mubr.msk.bf16.gmra.mrb[48].mxu1 %vm1339_vm0, %v4271_v48 }
 0x373   :  { %2179 = vmatprep.mubr.bf16.mxu1 %v4399_v28 }
 0x37a   :  { %3754 = vmatmul.mubr.msk.bf16.gmra.mrb[52].mxu1 %vm1339_vm0, %v4272_v49 }
 0x37b   :  { %2189 = vmatprep.mubr.bf16.mxu1 %v4399_v28 }
 0x382   :  { %3755 = vmatmul.mubr.msk.bf16.gmra.mrb[56].mxu1 %vm1339_vm0, %v4273_v50 }
 0x383   :  { %2199 = vmatprep.mubr.bf16.mxu1 %v4399_v28 }
 0x38a   :  { %3756 = vmatmul.mubr.msk.bf16.gmra.mrb[60].mxu1 %vm1339_vm0, %v4274_v51 }
 0x38b   :  { %2209 = vmatprep.mubr.bf16.mxu1 %v4399_v28 }
 0x392   :  { %3757 = vmatmul.mubr.msk.bf16.gmra.mrb[64].mxu1 %vm1339_vm0, %v4275_v52 }
 0x393   :  { %2219 = vmatprep.mubr.bf16.mxu1 %v4399_v28 }
 0x39a   :  { %3758 = vmatmul.mubr.msk.bf16.gmra.mrb[68].mxu1 %vm1339_vm0, %v4276_v53 }
 0x39b   :  { %2229 = vmatprep.mubr.bf16.mxu1 %v4399_v28 }
 0x3a2   :  { %3759 = vmatmul.mubr.msk.bf16.gmra.mrb[72].mxu1 %vm1339_vm0, %v4277_v54 }
 0x3a3   :  { %2239 = vmatprep.mubr.bf16.mxu1 %v4399_v28 }
 0x3aa   :  { %3760 = vmatmul.mubr.msk.bf16.gmra.mrb[76].mxu1 %vm1339_vm0, %v4278_v55 }
 0x3ab   :  { %2249 = vmatprep.mubr.bf16.mxu1 %v4399_v28 }
 0x3b2   :  { %3761 = vmatmul.mubr.msk.bf16.gmra.mrb[80].mxu1 %vm1339_vm0, %v4279_v56 }
 0x3b3   :  { %2259 = vmatprep.mubr.bf16.mxu1 %v4399_v28 }
 0x3ba   :  { %3762 = vmatmul.mubr.msk.bf16.gmra.mrb[84].mxu1 %vm1339_vm0, %v4280_v57 }
 0x3bb   :  { %2269 = vmatprep.mubr.bf16.mxu1 %v4399_v28 }
 0x3c2   :  { %3763 = vmatmul.mubr.msk.bf16.gmra.mrb[88].mxu1 %vm1339_vm0, %v4281_v58 }
 0x3c3   :  { %2279 = vmatprep.mubr.bf16.mxu1 %v4399_v28 }
 0x3ca   :  { %3764 = vmatmul.mubr.msk.bf16.gmra.mrb[92].mxu1 %vm1339_vm0, %v4282_v59 }
 0x3cb   :  { %2289 = vmatprep.mubr.bf16.mxu1 %v4399_v28 }
 0x3d2   :  { %3765 = vmatmul.mubr.msk.bf16.gmra.mrb[96].mxu1 %vm1339_vm0, %v4283_v60 }
 0x3d3   :  { %2299 = vmatprep.mubr.bf16.mxu1 %v4399_v28 }
 0x3da   :  { %3766 = vmatmul.mubr.msk.bf16.gmra.mrb[100].mxu1 %vm1339_vm0, %v4284_v61 }
 0x3db   :  { %2309 = vmatprep.mubr.bf16.mxu1 %v4399_v28 }
 0x3e2   :  { %3767 = vmatmul.mubr.msk.bf16.gmra.mrb[104].mxu1 %vm1339_vm0, %v4285_v62  ;;  %v4298_v62 = vld [vmem:[%s5729_s4 + $0xe8] sm:$0xff]  }
 0x3e3   :  { %2319 = vmatprep.mubr.bf16.mxu1 %v4399_v28 }
 0x3ea   :  { %3768 = vmatmul.mubr.msk.bf16.gmra.mrb[108].mxu1 %vm1339_vm0, %v4286_v63 }
 0x3eb   :  { %2329 = vmatprep.mubr.bf16.mxu1 %v4399_v28 }
 0x3f2   :  { %3769 = vmatmul.mubr.msk.bf16.gmra.mrb[112].mxu1 %vm1339_vm0, %v4287_v0 }
 0x3f3   :  { %2339 = vmatprep.mubr.bf16.mxu1 %v4399_v28 }
 0x3fa   :  { %3770 = vmatmul.mubr.msk.bf16.gmra.mrb[116].mxu1 %vm1339_vm0, %v4288_v1 }
 0x3fb   :  { %2349 = vmatprep.mubr.bf16.mxu1 %v4399_v28 }
 0x402   :  { %3771 = vmatmul.mubr.msk.bf16.gmra.mrb[120].mxu1 %vm1339_vm0, %v4289_v2 }
 0x403   :  { %2359 = vmatprep.mubr.bf16.mxu1 %v4399_v28 }
 0x40a   :  { %3772 = vmatmul.mubr.msk.bf16.gmra.mrb[124].mxu1 %vm1339_vm0, %v4290_v3 }
 0x40b   :  { %2369 = vmatprep.mubr.bf16.mxu1 %v4399_v28 }
 0x412   :  { %3773 = vmatmul.mubr.msk.bf16.gmra.mrb[128].mxu1 %vm1339_vm0, %v4291_v4 }
 0x413   :  { %2379 = vmatprep.mubr.bf16.mxu1 %v4399_v28 }
 0x41a   :  { %3774 = vmatmul.mubr.msk.bf16.gmra.mrb[132].mxu1 %vm1339_vm0, %v4292_v5 }
 0x41b   :  { %2389 = vmatprep.mubr.bf16.mxu1 %v4399_v28 }
 0x422   :  { %3775 = vmatmul.mubr.msk.bf16.gmra.mrb[136].mxu1 %vm1339_vm0, %v4293_v6 }
 0x423   :  { %2399 = vmatprep.mubr.bf16.mxu1 %v4399_v28 }
 0x42a   :  { %3776 = vmatmul.mubr.msk.bf16.gmra.mrb[140].mxu1 %vm1339_vm0, %v4294_v7 }
 0x42b   :  { %2409 = vmatprep.mubr.bf16.mxu1 %v4399_v28 }
 0x42d   :  { %v1752_v8 = vpop.f32.mrb[36].mxu1 }
 0x42e   :  { %v5298_v9 = vadd.f32 %v1752_v8, %v5106_v33  ;;  %v1754_v10 = vpop.f32.mrb[37].mxu1 }
 0x42f   :  { %v5307_v13 = vadd.f32 %v1754_v10, %v5108_v34  ;;  %v1756_v14 = vpop.f32.mrb[38].mxu1 }
 0x430   :  { %v1757_v15 = vpop.f32.mrb[39].mxu1 }
 0x431   :  { %v4299_v15 = vld [vmem:[%s5729_s4 + $0xf0] sm:$0xff]  }
 0x432   :  { %3777 = vmatmul.mubr.msk.bf16.gmra.mrb[144].mxu1 %vm1339_vm0, %v4295_v11 }
 0x433   :  { %2419 = vmatprep.mubr.bf16.mxu1 %v4399_v28 }
 0x435   :  { %v2151_v21 = vpop.f32.mrb[40].mxu1 }
 0x436   :  { %v2152_v23 = vadd.f32 %v2151_v21, %v5310_v16  ;;  %v2153_v24 = vpop.f32.mrb[41].mxu1 }
 0x437   :  { %v2154_v40 = vadd.f32 %v2153_v24, %v5314_v19  ;;  %v2155_v27 = vpop.f32.mrb[42].mxu1 }
 0x438   :  { %v2156_v29 = vadd.f32 %v2155_v27, %v5310_v16  ;;  %v2157_v30 = vpop.f32.mrb[43].mxu1  ;;  %v2470_v36 = vmax.f32 %v2152_v23, 0.0 }
 0x439   :  { %v2158_v32 = vadd.f32 %v2157_v30, %v5314_v19  ;;  %v2471_v43 = vmax.f32 %v2154_v40, 0.0 }
 0x43a   :  { %v2472_v39 = vmax.f32 %v2156_v29, 0.0  ;;  %3778 = vmatmul.mubr.msk.bf16.gmra.mrb[148].mxu1 %vm1339_vm0, %v4296_v38 }
 0x43b   :  { %v2473_v37 = vmax.f32 %v2158_v32, 0.0  ;;  %2429 = vmatprep.mubr.bf16.mxu1 %v4399_v28  ;;  %v4300_v32 = vld [vmem:[%s5729_s4 + $0xf8] sm:$0xff]  }
 0x43c   :  { %v2599_v41 = vpack.c.bf16 %v2472_v39, %v2470_v36 }
 0x43d   :  { %v2600_v42 = vpack.c.bf16 %v2473_v37, %v2471_v43  ;;  %v2161_v44 = vpop.f32.mrb[44].mxu1 }
 0x43e   :  { %v2162_v45 = vadd.f32 %v2161_v44, %v5310_v16  ;;  %v2163_v46 = vpop.f32.mrb[45].mxu1 }
 0x43f   :  { %v2164_v48 = vadd.f32 %v2163_v46, %v5314_v19  ;;  %v2165_v49 = vpop.f32.mrb[46].mxu1  ;;  %2692 = vmatprep.subr.bf16.mxu0 %v2600_v42 }
 0x440   :  { %v2166_v50 = vadd.f32 %v2165_v49, %v5310_v16  ;;  %v2167_v51 = vpop.f32.mrb[47].mxu1  ;;  %2693 = vmatpush1.bf16.msra.mxu0 %v2599_v41  ;;  %v2474_v53 = vmax.f32 %v2162_v45, 0.0 }
 0x441   :  { %v2168_v52 = vadd.f32 %v2167_v51, %v5314_v19  ;;  %v2475_v55 = vmax.f32 %v2164_v48, 0.0 }
 0x442   :  { %v2476_v54 = vmax.f32 %v2166_v50, 0.0  ;;  %3779 = vmatmul.mubr.msk.bf16.gmra.mrb[152].mxu1 %vm1339_vm0, %v4297_v47 }
 0x443   :  { %v2477_v56 = vmax.f32 %v2168_v52, 0.0  ;;  %2439 = vmatprep.mubr.bf16.mxu1 %v4399_v28 }
 0x444   :  { %v2601_v57 = vpack.c.bf16 %v2476_v54, %v2474_v53 }
 0x445   :  { %v2602_v58 = vpack.c.bf16 %v2477_v56, %v2475_v55  ;;  %v2171_v59 = vpop.f32.mrb[48].mxu1 }
 0x446   :  { %v2172_v60 = vadd.f32 %v2171_v59, %v5310_v16  ;;  %v2173_v61 = vpop.f32.mrb[49].mxu1 }
 0x447   :  { %v2174_v63 = vadd.f32 %v2173_v61, %v5314_v19  ;;  %v2175_v0 = vpop.f32.mrb[50].mxu1  ;;  %2694 = vmatprep.subr.bf16.mxu0 %v2602_v58 }
 0x448   :  { %v2176_v1 = vadd.f32 %v2175_v0, %v5310_v16  ;;  %v2177_v2 = vpop.f32.mrb[51].mxu1  ;;  %2695 = vmatpush1.bf16.msra.mxu0 %v2601_v57  ;;  %v2478_v4 = vmax.f32 %v2172_v60, 0.0 }
 0x449   :  { %v2178_v3 = vadd.f32 %v2177_v2, %v5314_v19  ;;  %v2479_v6 = vmax.f32 %v2174_v63, 0.0 }
 0x44a   :  { %v2480_v5 = vmax.f32 %v2176_v1, 0.0  ;;  %3780 = vmatmul.mubr.msk.bf16.gmra.mrb[156].mxu1 %vm1339_vm0, %v4298_v62 }
 0x44b   :  { %v2481_v7 = vmax.f32 %v2178_v3, 0.0  ;;  %2449 = vmatprep.mubr.bf16.mxu1 %v4399_v28 }
 0x44c   :  { %v2603_v8 = vpack.c.bf16 %v2480_v5, %v2478_v4 }
 0x44d   :  { %v2604_v10 = vpack.c.bf16 %v2481_v7, %v2479_v6  ;;  %v2181_v11 = vpop.f32.mrb[52].mxu1 }
 0x44e   :  { %v2182_v12 = vadd.f32 %v2181_v11, %v5310_v16  ;;  %v2183_v14 = vpop.f32.mrb[53].mxu1 }
 0x44f   :  { %v2184_v17 = vadd.f32 %v2183_v14, %v5314_v19  ;;  %v2185_v18 = vpop.f32.mrb[54].mxu1  ;;  %2696 = vmatprep.subr.bf16.mxu0 %v2604_v10 }
 0x450   :  { %v2186_v20 = vadd.f32 %v2185_v18, %v5310_v16  ;;  %v2187_v21 = vpop.f32.mrb[55].mxu1  ;;  %2697 = vmatpush1.bf16.msra.mxu0 %v2603_v8  ;;  %v2482_v23 = vmax.f32 %v2182_v12, 0.0 }
 0x451   :  { %v2188_v22 = vadd.f32 %v2187_v21, %v5314_v19  ;;  %v2483_v38 = vmax.f32 %v2184_v17, 0.0 }
 0x452   :  { %v2484_v24 = vmax.f32 %v2186_v20, 0.0  ;;  %3781 = vmatmul.mubr.msk.bf16.gmra.mrb[160].mxu1 %vm1339_vm0, %v4299_v15 }
 0x453   :  { %v2485_v25 = vmax.f32 %v2188_v22, 0.0  ;;  %2459 = vmatprep.mubr.bf16.mxu1 %v4399_v28 }
 0x454   :  { %v2605_v26 = vpack.c.bf16 %v2484_v24, %v2482_v23 }
 0x455   :  { %v2606_v40 = vpack.c.bf16 %v2485_v25, %v2483_v38  ;;  %v2191_v27 = vpop.f32.mrb[56].mxu1 }
 0x456   :  { %v2192_v29 = vadd.f32 %v2191_v27, %v5310_v16  ;;  %v2193_v30 = vpop.f32.mrb[57].mxu1 }
 0x457   :  { %v2194_v36 = vadd.f32 %v2193_v30, %v5314_v19  ;;  %v2195_v39 = vpop.f32.mrb[58].mxu1  ;;  %2698 = vmatprep.subr.bf16.mxu0 %v2606_v40 }
 0x458   :  { %v2196_v43 = vadd.f32 %v2195_v39, %v5310_v16  ;;  %v2197_v37 = vpop.f32.mrb[59].mxu1  ;;  %2699 = vmatpush1.bf16.msra.mxu0 %v2605_v26  ;;  %v2486_v41 = vmax.f32 %v2192_v29, 0.0 }
 0x459   :  { %v2198_v28 = vadd.f32 %v2197_v37, %v5314_v19  ;;  %v2487_v44 = vmax.f32 %v2194_v36, 0.0 }
 0x45a   :  { %v2488_v42 = vmax.f32 %v2196_v43, 0.0  ;;  %3782 = vmatmul.mubr.msk.bf16.gmra.mrb[164].mxu1 %vm1339_vm0, %v4300_v32 }
 0x45b   :  { %v2489_v45 = vmax.f32 %v2198_v28, 0.0 }
 0x45c   :  { %v2607_v46 = vpack.c.bf16 %v2488_v42, %v2486_v41 }
 0x45d   :  { %v2608_v47 = vpack.c.bf16 %v2489_v45, %v2487_v44  ;;  %v2201_v48 = vpop.f32.mrb[60].mxu1 }
 0x45e   :  { %v2202_v49 = vadd.f32 %v2201_v48, %v5310_v16  ;;  %v2203_v50 = vpop.f32.mrb[61].mxu1 }
 0x45f   :  { %v2204_v51 = vadd.f32 %v2203_v50, %v5314_v19  ;;  %v2205_v52 = vpop.f32.mrb[62].mxu1  ;;  %2700 = vmatprep.subr.bf16.mxu0 %v2608_v47 }
 0x460   :  { %v2206_v53 = vadd.f32 %v2205_v52, %v5310_v16  ;;  %v2207_v54 = vpop.f32.mrb[63].mxu1  ;;  %2701 = vmatpush1.bf16.msra.mxu0 %v2607_v46  ;;  %v2490_v56 = vmax.f32 %v2202_v49, 0.0 }
 0x461   :  { %v2208_v55 = vadd.f32 %v2207_v54, %v5314_v19  ;;  %v2491_v58 = vmax.f32 %v2204_v51, 0.0 }
 0x462   :  { %v2492_v57 = vmax.f32 %v2206_v53, 0.0 }
 0x463   :  { %v2493_v59 = vmax.f32 %v2208_v55, 0.0 }
 0x464   :  { %v2609_v60 = vpack.c.bf16 %v2492_v57, %v2490_v56 }
 0x465   :  { %v2610_v61 = vpack.c.bf16 %v2493_v59, %v2491_v58  ;;  %v2211_v62 = vpop.f32.mrb[64].mxu1 }
 0x466   :  { %v2212_v63 = vadd.f32 %v2211_v62, %v5310_v16  ;;  %v2213_v0 = vpop.f32.mrb[65].mxu1 }
 0x467   :  { %v2214_v1 = vadd.f32 %v2213_v0, %v5314_v19  ;;  %v2215_v2 = vpop.f32.mrb[66].mxu1  ;;  %2702 = vmatprep.subr.bf16.mxu0 %v2610_v61 }
 0x468   :  { %v2216_v3 = vadd.f32 %v2215_v2, %v5310_v16  ;;  %v2217_v4 = vpop.f32.mrb[67].mxu1  ;;  %2703 = vmatpush1.bf16.msra.mxu0 %v2609_v60  ;;  %v2494_v6 = vmax.f32 %v2212_v63, 0.0 }
 0x469   :  { %v2218_v5 = vadd.f32 %v2217_v4, %v5314_v19  ;;  %v2495_v8 = vmax.f32 %v2214_v1, 0.0 }
 0x46a   :  { %v2496_v7 = vmax.f32 %v2216_v3, 0.0 }
 0x46b   :  { %v2497_v10 = vmax.f32 %v2218_v5, 0.0 }
 0x46c   :  { %v2611_v11 = vpack.c.bf16 %v2496_v7, %v2494_v6 }
 0x46d   :  { %v2612_v12 = vpack.c.bf16 %v2497_v10, %v2495_v8  ;;  %v2221_v14 = vpop.f32.mrb[68].mxu1 }
 0x46e   :  { %v2222_v15 = vadd.f32 %v2221_v14, %v5310_v16  ;;  %v2223_v17 = vpop.f32.mrb[69].mxu1 }
 0x46f   :  { %v2224_v18 = vadd.f32 %v2223_v17, %v5314_v19  ;;  %v2225_v20 = vpop.f32.mrb[70].mxu1  ;;  %2704 = vmatprep.subr.bf16.mxu0 %v2612_v12 }
 0x470   :  { %v2226_v21 = vadd.f32 %v2225_v20, %v5310_v16  ;;  %v2227_v22 = vpop.f32.mrb[71].mxu1  ;;  %2705 = vmatpush1.bf16.msra.mxu0 %v2611_v11  ;;  %v2498_v24 = vmax.f32 %v2222_v15, 0.0 }
 0x471   :  { %v2228_v23 = vadd.f32 %v2227_v22, %v5314_v19  ;;  %v2499_v25 = vmax.f32 %v2224_v18, 0.0 }
 0x472   :  { %v2500_v38 = vmax.f32 %v2226_v21, 0.0 }
 0x473   :  { %v2501_v26 = vmax.f32 %v2228_v23, 0.0 }
 0x474   :  { %v2613_v40 = vpack.c.bf16 %v2500_v38, %v2498_v24 }
 0x475   :  { %v2614_v27 = vpack.c.bf16 %v2501_v26, %v2499_v25  ;;  %v2231_v29 = vpop.f32.mrb[72].mxu1 }
 0x476   :  { %v2232_v30 = vadd.f32 %v2231_v29, %v5310_v16  ;;  %v2233_v32 = vpop.f32.mrb[73].mxu1 }
 0x477   :  { %v2234_v36 = vadd.f32 %v2233_v32, %v5314_v19  ;;  %v2235_v39 = vpop.f32.mrb[74].mxu1  ;;  %2706 = vmatprep.subr.bf16.mxu0 %v2614_v27 }
 0x478   :  { %v2236_v43 = vadd.f32 %v2235_v39, %v5310_v16  ;;  %v2237_v37 = vpop.f32.mrb[75].mxu1  ;;  %2707 = vmatpush1.bf16.msra.mxu0 %v2613_v40  ;;  %v2502_v41 = vmax.f32 %v2232_v30, 0.0 }
 0x479   :  { %v2238_v28 = vadd.f32 %v2237_v37, %v5314_v19  ;;  %v2503_v44 = vmax.f32 %v2234_v36, 0.0 }
 0x47a   :  { %v2504_v42 = vmax.f32 %v2236_v43, 0.0 }
 0x47b   :  { %v2505_v45 = vmax.f32 %v2238_v28, 0.0 }
 0x47c   :  { %v2615_v46 = vpack.c.bf16 %v2504_v42, %v2502_v41 }
 0x47d   :  { %v2616_v47 = vpack.c.bf16 %v2505_v45, %v2503_v44  ;;  %v2241_v48 = vpop.f32.mrb[76].mxu1 }
 0x47e   :  { %v2242_v49 = vadd.f32 %v2241_v48, %v5310_v16  ;;  %v2243_v50 = vpop.f32.mrb[77].mxu1 }
 0x47f   :  { %v2244_v51 = vadd.f32 %v2243_v50, %v5314_v19  ;;  %v2245_v52 = vpop.f32.mrb[78].mxu1  ;;  %2708 = vmatprep.subr.bf16.mxu0 %v2616_v47 }
 0x480   :  { %v2246_v53 = vadd.f32 %v2245_v52, %v5310_v16  ;;  %v2247_v54 = vpop.f32.mrb[79].mxu1  ;;  %2709 = vmatpush1.bf16.msra.mxu0 %v2615_v46  ;;  %v2506_v56 = vmax.f32 %v2242_v49, 0.0 }
 0x481   :  { %v2248_v55 = vadd.f32 %v2247_v54, %v5314_v19  ;;  %v2507_v58 = vmax.f32 %v2244_v51, 0.0 }
 0x482   :  { %v2508_v57 = vmax.f32 %v2246_v53, 0.0 }
 0x483   :  { %v2509_v59 = vmax.f32 %v2248_v55, 0.0 }
 0x484   :  { %v2617_v60 = vpack.c.bf16 %v2508_v57, %v2506_v56 }
 0x485   :  { %v2618_v61 = vpack.c.bf16 %v2509_v59, %v2507_v58  ;;  %v2251_v62 = vpop.f32.mrb[80].mxu1 }
 0x486   :  { %v2252_v63 = vadd.f32 %v2251_v62, %v5310_v16  ;;  %v2253_v0 = vpop.f32.mrb[81].mxu1 }
 0x487   :  { %v2254_v1 = vadd.f32 %v2253_v0, %v5314_v19  ;;  %v2255_v2 = vpop.f32.mrb[82].mxu1  ;;  %2710 = vmatprep.subr.bf16.mxu0 %v2618_v61 }
 0x488   :  { %v2256_v3 = vadd.f32 %v2255_v2, %v5310_v16  ;;  %v2257_v4 = vpop.f32.mrb[83].mxu1  ;;  %2711 = vmatpush1.bf16.msra.mxu0 %v2617_v60  ;;  %v2510_v6 = vmax.f32 %v2252_v63, 0.0 }
 0x489   :  { %v2258_v5 = vadd.f32 %v2257_v4, %v5314_v19  ;;  %v2511_v8 = vmax.f32 %v2254_v1, 0.0 }
 0x48a   :  { %v2512_v7 = vmax.f32 %v2256_v3, 0.0 }
 0x48b   :  { %v2513_v10 = vmax.f32 %v2258_v5, 0.0 }
 0x48c   :  { %v2619_v11 = vpack.c.bf16 %v2512_v7, %v2510_v6 }
 0x48d   :  { %v2620_v12 = vpack.c.bf16 %v2513_v10, %v2511_v8  ;;  %v2261_v14 = vpop.f32.mrb[84].mxu1 }
 0x48e   :  { %v2262_v15 = vadd.f32 %v2261_v14, %v5310_v16  ;;  %v2263_v17 = vpop.f32.mrb[85].mxu1 }
 0x48f   :  { %v2264_v18 = vadd.f32 %v2263_v17, %v5314_v19  ;;  %v2265_v20 = vpop.f32.mrb[86].mxu1  ;;  %2712 = vmatprep.subr.bf16.mxu0 %v2620_v12 }
 0x490   :  { %v2266_v21 = vadd.f32 %v2265_v20, %v5310_v16  ;;  %v2267_v22 = vpop.f32.mrb[87].mxu1  ;;  %2713 = vmatpush1.bf16.msra.mxu0 %v2619_v11  ;;  %v2514_v24 = vmax.f32 %v2262_v15, 0.0 }
 0x491   :  { %v2268_v23 = vadd.f32 %v2267_v22, %v5314_v19  ;;  %v2515_v25 = vmax.f32 %v2264_v18, 0.0 }
 0x492   :  { %v2516_v38 = vmax.f32 %v2266_v21, 0.0 }
 0x493   :  { %v2517_v26 = vmax.f32 %v2268_v23, 0.0 }
 0x494   :  { %v2621_v40 = vpack.c.bf16 %v2516_v38, %v2514_v24 }
 0x495   :  { %v2622_v27 = vpack.c.bf16 %v2517_v26, %v2515_v25  ;;  %v2271_v29 = vpop.f32.mrb[88].mxu1 }
 0x496   :  { %v2272_v30 = vadd.f32 %v2271_v29, %v5310_v16  ;;  %v2273_v32 = vpop.f32.mrb[89].mxu1 }
 0x497   :  { %v2274_v36 = vadd.f32 %v2273_v32, %v5314_v19  ;;  %v2275_v39 = vpop.f32.mrb[90].mxu1  ;;  %2714 = vmatprep.subr.bf16.mxu0 %v2622_v27 }
 0x498   :  { %v2276_v43 = vadd.f32 %v2275_v39, %v5310_v16  ;;  %v2277_v37 = vpop.f32.mrb[91].mxu1  ;;  %2715 = vmatpush1.bf16.msra.mxu0 %v2621_v40  ;;  %v2518_v41 = vmax.f32 %v2272_v30, 0.0  ;;  %v4301_v30 = vld [vmem:[%s5700_s12 + $0x40] sm:$0xff]  }
 0x499   :  { %v2278_v28 = vadd.f32 %v2277_v37, %v5314_v19  ;;  %v2519_v44 = vmax.f32 %v2274_v36, 0.0 }
 0x49a   :  { %v2520_v42 = vmax.f32 %v2276_v43, 0.0 }
 0x49b   :  { %v2521_v45 = vmax.f32 %v2278_v28, 0.0 }
 0x49c   :  { %v2623_v46 = vpack.c.bf16 %v2520_v42, %v2518_v41  ;;  %v4302_v41 = vld [vmem:[%s5700_s12] sm:$0xff]   ;;  %v2687_v42 = vcombine.high %v5327_v31, %v5327_v31  ;;  %v4304_v31 = vld [vmem:[%s5700_s12 + $0x8] sm:$0xff]  }
 0x49d   :  { %v2624_v47 = vpack.c.bf16 %v2521_v45, %v2519_v44  ;;  %v2281_v48 = vpop.f32.mrb[92].mxu1  ;;  %v4303_v45 = vld [vmem:[%s5700_s12 + $0x48] sm:$0xff]  }
 0x49e   :  { %v2282_v49 = vadd.f32 %v2281_v48, %v5310_v16  ;;  %v2283_v50 = vpop.f32.mrb[93].mxu1  ;;  %2765 = vmatprep.mubr.bf16.mxu1 %v2687_v42 }
 0x49f   :  { %v2284_v51 = vadd.f32 %v2283_v50, %v5314_v19  ;;  %v2285_v52 = vpop.f32.mrb[94].mxu1  ;;  %2716 = vmatprep.subr.bf16.mxu0 %v2624_v47 }
 0x4a0   :  { %v2286_v53 = vadd.f32 %v2285_v52, %v5310_v16  ;;  %v2287_v54 = vpop.f32.mrb[95].mxu1  ;;  %2717 = vmatpush1.bf16.msra.mxu0 %v2623_v46  ;;  %v2522_v56 = vmax.f32 %v2282_v49, 0.0  ;;  %v2777_v46 = vpack.c.bf16 %v5108_v34, %v5108_v34  ;;  %v4305_v34 = vld [vmem:[%s5700_s12 + $0x50] sm:$0xff]  }
 0x4a1   :  { %v2288_v55 = vadd.f32 %v2287_v54, %v5314_v19  ;;  %v2523_v58 = vmax.f32 %v2284_v51, 0.0 }
 0x4a2   :  { %v2524_v57 = vmax.f32 %v2286_v53, 0.0 }
 0x4a3   :  { %v2525_v59 = vmax.f32 %v2288_v55, 0.0 }
 0x4a4   :  { %v2625_v60 = vpack.c.bf16 %v2524_v57, %v2522_v56 }
 0x4a5   :  { %v2626_v61 = vpack.c.bf16 %v2525_v59, %v2523_v58  ;;  %v2291_v62 = vpop.f32.mrb[96].mxu1 }
 0x4a6   :  { %v2292_v63 = vadd.f32 %v2291_v62, %v5310_v16  ;;  %v2293_v0 = vpop.f32.mrb[97].mxu1  ;;  %v4307_v62 = vld [vmem:[%s5700_s12 + $0x58] sm:$0xff]  }
 0x4a7   :  { %v2294_v1 = vadd.f32 %v2293_v0, %v5314_v19  ;;  %v2295_v2 = vpop.f32.mrb[98].mxu1  ;;  %2718 = vmatprep.subr.bf16.mxu0 %v2626_v61 }
 0x4a8   :  { %v2296_v3 = vadd.f32 %v2295_v2, %v5310_v16  ;;  %v2297_v4 = vpop.f32.mrb[99].mxu1  ;;  %2719 = vmatpush1.bf16.msra.mxu0 %v2625_v60  ;;  %v2526_v6 = vmax.f32 %v2292_v63, 0.0  ;;  %v4306_v60 = vld [vmem:[%s5700_s12 + $0x10] sm:$0xff]  }
 0x4a9   :  { %v2298_v5 = vadd.f32 %v2297_v4, %v5314_v19  ;;  %v2527_v8 = vmax.f32 %v2294_v1, 0.0  ;;  %v4308_v4 = vld [vmem:[%s5700_s12 + $0x18] sm:$0xff]  }
 0x4aa   :  { %v2528_v7 = vmax.f32 %v2296_v3, 0.0 }
 0x4ab   :  { %v2529_v10 = vmax.f32 %v2298_v5, 0.0 }
 0x4ac   :  { %v2627_v11 = vpack.c.bf16 %v2528_v7, %v2526_v6  ;;  %v4309_v6 = vld [vmem:[%s5700_s12 + $0x60] sm:$0xff]  }
 0x4ad   :  { %v2628_v12 = vpack.c.bf16 %v2529_v10, %v2527_v8  ;;  %v2301_v14 = vpop.f32.mrb[100].mxu1 }
 0x4ae   :  { %v2302_v15 = vadd.f32 %v2301_v14, %v5310_v16  ;;  %v2303_v17 = vpop.f32.mrb[101].mxu1  ;;  %v4310_v14 = vld [vmem:[%s5700_s12 + $0x20] sm:$0xff]  }
 0x4af   :  { %v2304_v18 = vadd.f32 %v2303_v17, %v5314_v19  ;;  %v2305_v20 = vpop.f32.mrb[102].mxu1  ;;  %2720 = vmatprep.subr.bf16.mxu0 %v2628_v12 }
 0x4b0   :  { %v2306_v21 = vadd.f32 %v2305_v20, %v5310_v16  ;;  %v2307_v22 = vpop.f32.mrb[103].mxu1  ;;  %2721 = vmatpush1.bf16.msra.mxu0 %v2627_v11  ;;  %v2530_v24 = vmax.f32 %v2302_v15, 0.0 }
 0x4b1   :  { %v2308_v23 = vadd.f32 %v2307_v22, %v5314_v19  ;;  %v2531_v25 = vmax.f32 %v2304_v18, 0.0  ;;  %v4311_v18 = vld [vmem:[%s5700_s12 + $0x68] sm:$0xff]  }
 0x4b2   :  { %v2532_v38 = vmax.f32 %v2306_v21, 0.0 }
 0x4b3   :  { %v2533_v26 = vmax.f32 %v2308_v23, 0.0 }
 0x4b4   :  { %v2629_v40 = vpack.c.bf16 %v2532_v38, %v2530_v24  ;;  %v4312_v38 = vld [vmem:[%s5700_s12 + $0x28] sm:$0xff]  }
 0x4b5   :  { %v2630_v27 = vpack.c.bf16 %v2533_v26, %v2531_v25  ;;  %v2311_v29 = vpop.f32.mrb[104].mxu1  ;;  %v4313_v26 = vld [vmem:[%s5700_s12 + $0x70] sm:$0xff]  }
 0x4b6   :  { %v2312_v32 = vadd.f32 %v2311_v29, %v5310_v16  ;;  %v2313_v36 = vpop.f32.mrb[105].mxu1 }
 0x4b7   :  { %v2314_v39 = vadd.f32 %v2313_v36, %v5314_v19  ;;  %v2315_v43 = vpop.f32.mrb[106].mxu1  ;;  %2722 = vmatprep.subr.bf16.mxu0 %v2630_v27 }
 0x4b8   :  { %v2316_v37 = vadd.f32 %v2315_v43, %v5310_v16  ;;  %v2317_v28 = vpop.f32.mrb[107].mxu1  ;;  %2723 = vmatpush1.bf16.msra.mxu0 %v2629_v40  ;;  %v2534_v47 = vmax.f32 %v2312_v32, 0.0 }
 0x4b9   :  { %v2318_v44 = vadd.f32 %v2317_v28, %v5314_v19  ;;  %3845 = vmatprep.subr.bf16.mxu0 %v4301_v30  ;;  %v2535_v49 = vmax.f32 %v2314_v39, 0.0  ;;  %v4314_v39 = vld [vmem:[%s5700_s12 + $0x30] sm:$0xff]   ;;  %v4315_v28 = vld [vmem:[%s5700_s12 + $0x78] sm:$0xff]  }
 0x4ba   :  { %v2536_v48 = vmax.f32 %v2316_v37, 0.0 }
 0x4bb   :  { %v2537_v50 = vmax.f32 %v2318_v44, 0.0  ;;  %2725 = vmatmul.mubr.bf16.vlgmr.msra.gmra.mrb[8].mxu0 %v5330_v35 }
 0x4bc   :  { %v2631_v51 = vpack.c.bf16 %v2536_v48, %v2534_v47  ;;  %3846 = vmatpush3.bf16.msra.mxu0 %v4302_v41  ;;  %2945 = vmatprep.mubr.bf16.mxu0 %v2777_v46  ;;  %v4316_v47 = vld [vmem:[%s5700_s12 + $0x38] sm:$0xff]  }
 0x4bd   :  { %v2632_v52 = vpack.c.bf16 %v2537_v50, %v2535_v49  ;;  %3847 = vmatprep.subr.bf16.mxu0 %v4303_v45  ;;  %v2321_v53 = vpop.f32.mrb[108].mxu1 }
 0x4be   :  { %v2322_v54 = vadd.f32 %v2321_v53, %v5310_v16  ;;  %v2323_v55 = vpop.f32.mrb[109].mxu1 }
 0x4bf   :  { %2733 = vmatprep.subr.bf16.mxu1 %v2632_v52  ;;  %v2324_v56 = vadd.f32 %v2323_v55, %v5314_v19  ;;  %v2325_v57 = vpop.f32.mrb[110].mxu1  ;;  %v2776_v55 = vpack.c.bf16 %v5106_v33, %v5106_v33 }
 0x4c0   :  { %2734 = vmatpush1.bf16.msra.mxu1 %v2631_v51  ;;  %3848 = vmatpush3.bf16.msra.mxu0 %v4304_v31  ;;  %v2326_v58 = vadd.f32 %v2325_v57, %v5310_v16  ;;  %v2327_v59 = vpop.f32.mrb[111].mxu1  ;;  %v2538_v63 = vmax.f32 %v2322_v54, 0.0 }
 0x4c1   :  { %3849 = vmatprep.subr.bf16.mxu0 %v4305_v34  ;;  %v2328_v61 = vadd.f32 %v2327_v59, %v5314_v19  ;;  %v2539_v1 = vmax.f32 %v2324_v56, 0.0 }
 0x4c2   :  { %v2540_v0 = vmax.f32 %v2326_v58, 0.0 }
 0x4c3   :  { %v2541_v2 = vmax.f32 %v2328_v61, 0.0 }
 0x4c4   :  { %v2633_v3 = vpack.c.bf16 %v2540_v0, %v2538_v63  ;;  %3850 = vmatpush3.bf16.msra.mxu0 %v4306_v60 }
 0x4c5   :  { %v2634_v5 = vpack.c.bf16 %v2541_v2, %v2539_v1  ;;  %3851 = vmatprep.subr.bf16.mxu0 %v4307_v62  ;;  %v2331_v7 = vpop.f32.mrb[112].mxu1 }
 0x4c6   :  { %v2332_v8 = vadd.f32 %v2331_v7, %v5310_v16  ;;  %v2333_v10 = vpop.f32.mrb[113].mxu1 }
 0x4c7   :  { %2735 = vmatprep.subr.bf16.mxu1 %v2634_v5  ;;  %v2334_v11 = vadd.f32 %v2333_v10, %v5314_v19  ;;  %v2335_v12 = vpop.f32.mrb[114].mxu1 }
 0x4c8   :  { %3852 = vmatpush3.bf16.msra.mxu0 %v4308_v4  ;;  %2736 = vmatpush1.bf16.msra.mxu1 %v2633_v3  ;;  %v2336_v15 = vadd.f32 %v2335_v12, %v5310_v16  ;;  %v2337_v17 = vpop.f32.mrb[115].mxu1  ;;  %v2542_v21 = vmax.f32 %v2332_v8, 0.0 }
 0x4c9   :  { %3853 = vmatprep.subr.bf16.mxu0 %v4309_v6  ;;  %v2338_v20 = vadd.f32 %v2337_v17, %v5314_v19  ;;  %v2543_v23 = vmax.f32 %v2334_v11, 0.0 }
 0x4ca   :  { %v2544_v22 = vmax.f32 %v2336_v15, 0.0 }
 0x4cb   :  { %v2545_v24 = vmax.f32 %v2338_v20, 0.0 }
 0x4cc   :  { %3854 = vmatpush3.bf16.msra.mxu0 %v4310_v14  ;;  %v2635_v25 = vpack.c.bf16 %v2544_v22, %v2542_v21 }
 0x4cd   :  { %3855 = vmatprep.subr.bf16.mxu0 %v4311_v18  ;;  %v2636_v40 = vpack.c.bf16 %v2545_v24, %v2543_v23  ;;  %v2341_v27 = vpop.f32.mrb[116].mxu1 }
 0x4ce   :  { %v2342_v29 = vadd.f32 %v2341_v27, %v5310_v16  ;;  %v2343_v30 = vpop.f32.mrb[117].mxu1 }
 0x4cf   :  { %2737 = vmatprep.subr.bf16.mxu1 %v2636_v40  ;;  %v2344_v32 = vadd.f32 %v2343_v30, %v5314_v19  ;;  %v2345_v36 = vpop.f32.mrb[118].mxu1 }
 0x4d0   :  { %3856 = vmatpush3.bf16.msra.mxu0 %v4312_v38  ;;  %2738 = vmatpush1.bf16.msra.mxu1 %v2635_v25  ;;  %v2346_v43 = vadd.f32 %v2345_v36, %v5310_v16  ;;  %v2347_v37 = vpop.f32.mrb[119].mxu1  ;;  %v2546_v42 = vmax.f32 %v2342_v29, 0.0 }
 0x4d1   :  { %3857 = vmatprep.subr.bf16.mxu0 %v4313_v26  ;;  %v2348_v41 = vadd.f32 %v2347_v37, %v5314_v19  ;;  %v2547_v45 = vmax.f32 %v2344_v32, 0.0 }
 0x4d2   :  { %v2548_v44 = vmax.f32 %v2346_v43, 0.0 }
 0x4d3   :  { %v2549_v46 = vmax.f32 %v2348_v41, 0.0 }
 0x4d4   :  { %3858 = vmatpush3.bf16.msra.mxu0 %v4314_v39  ;;  %v2637_v48 = vpack.c.bf16 %v2548_v44, %v2546_v42 }
 0x4d5   :  { %3859 = vmatprep.subr.bf16.mxu0 %v4315_v28  ;;  %v2638_v49 = vpack.c.bf16 %v2549_v46, %v2547_v45  ;;  %v2351_v50 = vpop.f32.mrb[120].mxu1 }
 0x4d6   :  { %v2352_v51 = vadd.f32 %v2351_v50, %v5310_v16  ;;  %v2353_v31 = vpop.f32.mrb[121].mxu1 }
 0x4d7   :  { %2739 = vmatprep.subr.bf16.mxu1 %v2638_v49  ;;  %v2354_v52 = vadd.f32 %v2353_v31, %v5314_v19  ;;  %v2355_v53 = vpop.f32.mrb[122].mxu1 }
 0x4d8   :  { %3860 = vmatpush3.bf16.msra.mxu0 %v4316_v47  ;;  %2740 = vmatpush1.bf16.msra.mxu1 %v2637_v48  ;;  %v2356_v34 = vadd.f32 %v2355_v53, %v5310_v16  ;;  %v2357_v54 = vpop.f32.mrb[123].mxu1  ;;  %v2550_v57 = vmax.f32 %v2352_v51, 0.0 }
 0x4d9   :  { %v2358_v56 = vadd.f32 %v2357_v54, %v5314_v19  ;;  %v2551_v59 = vmax.f32 %v2354_v52, 0.0 }
 0x4da   :  { %v2552_v58 = vmax.f32 %v2356_v34, 0.0 }
 0x4db   :  { %2946 = vmatmul.mubr.bf16.vlgmr.msra.gmra.mrb[12].mxu0 %v2776_v55  ;;  %v2553_v60 = vmax.f32 %v2358_v56, 0.0 }
 0x4dc   :  { %v2639_v61 = vpack.c.bf16 %v2552_v58, %v2550_v57 }
 0x4dd   :  { %v2640_v62 = vpack.c.bf16 %v2553_v60, %v2551_v59  ;;  %v2361_v63 = vpop.f32.mrb[124].mxu1 }
 0x4de   :  { %v2362_v0 = vadd.f32 %v2361_v63, %v5310_v16  ;;  %v2363_v1 = vpop.f32.mrb[125].mxu1 }
 0x4df   :  { %2741 = vmatprep.subr.bf16.mxu1 %v2640_v62  ;;  %v2364_v2 = vadd.f32 %v2363_v1, %v5314_v19  ;;  %v2365_v3 = vpop.f32.mrb[126].mxu1 }
 0x4e0   :  { %2742 = vmatpush1.bf16.msra.mxu1 %v2639_v61  ;;  %v2366_v33 = vadd.f32 %v2365_v3, %v5310_v16  ;;  %v2367_v4 = vpop.f32.mrb[127].mxu1  ;;  %v2554_v6 = vmax.f32 %v2362_v0, 0.0 }
 0x4e1   :  { %v2368_v5 = vadd.f32 %v2367_v4, %v5314_v19  ;;  %v2555_v8 = vmax.f32 %v2364_v2, 0.0 }
 0x4e2   :  { %v2556_v7 = vmax.f32 %v2366_v33, 0.0 }
 0x4e3   :  { %v2557_v10 = vmax.f32 %v2368_v5, 0.0 }
 0x4e4   :  { %v2641_v11 = vpack.c.bf16 %v2556_v7, %v2554_v6 }
 0x4e5   :  { %v2642_v12 = vpack.c.bf16 %v2557_v10, %v2555_v8  ;;  %v2371_v14 = vpop.f32.mrb[128].mxu1 }
 0x4e6   :  { %v2372_v15 = vadd.f32 %v2371_v14, %v5310_v16  ;;  %v2373_v17 = vpop.f32.mrb[129].mxu1 }
 0x4e7   :  { %v2374_v18 = vadd.f32 %v2373_v17, %v5314_v19  ;;  %v2375_v20 = vpop.f32.mrb[130].mxu1  ;;  %2743 = vmatprep.subr.bf16.mxu1 %v2642_v12 }
 0x4e8   :  { %v2376_v21 = vadd.f32 %v2375_v20, %v5310_v16  ;;  %v2377_v22 = vpop.f32.mrb[131].mxu1  ;;  %2744 = vmatpush1.bf16.msra.mxu1 %v2641_v11  ;;  %v2558_v24 = vmax.f32 %v2372_v15, 0.0 }
 0x4e9   :  { %v2378_v23 = vadd.f32 %v2377_v22, %v5314_v19  ;;  %v2559_v25 = vmax.f32 %v2374_v18, 0.0 }
 0x4ea   :  { %v2560_v38 = vmax.f32 %v2376_v21, 0.0 }
 0x4eb   :  { %v2561_v26 = vmax.f32 %v2378_v23, 0.0 }
 0x4ec   :  { %v2643_v40 = vpack.c.bf16 %v2560_v38, %v2558_v24 }
 0x4ed   :  { %v2644_v27 = vpack.c.bf16 %v2561_v26, %v2559_v25  ;;  %v2381_v29 = vpop.f32.mrb[132].mxu1 }
 0x4ee   :  { %v2382_v30 = vadd.f32 %v2381_v29, %v5310_v16  ;;  %v2383_v32 = vpop.f32.mrb[133].mxu1 }
 0x4ef   :  { %v2384_v36 = vadd.f32 %v2383_v32, %v5314_v19  ;;  %v2385_v39 = vpop.f32.mrb[134].mxu1  ;;  %2745 = vmatprep.subr.bf16.mxu1 %v2644_v27 }
 0x4f0   :  { %v2386_v43 = vadd.f32 %v2385_v39, %v5310_v16  ;;  %v2387_v37 = vpop.f32.mrb[135].mxu1  ;;  %2746 = vmatpush1.bf16.msra.mxu1 %v2643_v40  ;;  %v2562_v41 = vmax.f32 %v2382_v30, 0.0 }
 0x4f1   :  { %v2388_v28 = vadd.f32 %v2387_v37, %v5314_v19  ;;  %v2563_v44 = vmax.f32 %v2384_v36, 0.0 }
 0x4f2   :  { %v2564_v42 = vmax.f32 %v2386_v43, 0.0 }
 0x4f3   :  { %v2565_v45 = vmax.f32 %v2388_v28, 0.0 }
 0x4f4   :  { %v2645_v46 = vpack.c.bf16 %v2564_v42, %v2562_v41 }
 0x4f5   :  { %v2646_v47 = vpack.c.bf16 %v2565_v45, %v2563_v44  ;;  %v2391_v48 = vpop.f32.mrb[136].mxu1 }
 0x4f6   :  { %v2392_v49 = vadd.f32 %v2391_v48, %v5310_v16  ;;  %v2393_v50 = vpop.f32.mrb[137].mxu1 }
 0x4f7   :  { %v2394_v51 = vadd.f32 %v2393_v50, %v5314_v19  ;;  %v2395_v31 = vpop.f32.mrb[138].mxu1  ;;  %2747 = vmatprep.subr.bf16.mxu1 %v2646_v47 }
 0x4f8   :  { %v2396_v52 = vadd.f32 %v2395_v31, %v5310_v16  ;;  %v2397_v53 = vpop.f32.mrb[139].mxu1  ;;  %2748 = vmatpush1.bf16.msra.mxu1 %v2645_v46  ;;  %v2566_v54 = vmax.f32 %v2392_v49, 0.0 }
 0x4f9   :  { %v2398_v34 = vadd.f32 %v2397_v53, %v5314_v19  ;;  %v2567_v56 = vmax.f32 %v2394_v51, 0.0 }
 0x4fa   :  { %v2568_v55 = vmax.f32 %v2396_v52, 0.0 }
 0x4fb   :  { %v2569_v57 = vmax.f32 %v2398_v34, 0.0 }
 0x4fc   :  { %v2647_v58 = vpack.c.bf16 %v2568_v55, %v2566_v54 }
 0x4fd   :  { %v2648_v59 = vpack.c.bf16 %v2569_v57, %v2567_v56  ;;  %v2401_v60 = vpop.f32.mrb[140].mxu1 }
 0x4fe   :  { %v2402_v61 = vadd.f32 %v2401_v60, %v5310_v16  ;;  %v2403_v62 = vpop.f32.mrb[141].mxu1 }
 0x4ff   :  { %v2404_v63 = vadd.f32 %v2403_v62, %v5314_v19  ;;  %v2405_v0 = vpop.f32.mrb[142].mxu1  ;;  %2749 = vmatprep.subr.bf16.mxu1 %v2648_v59 }
 0x500   :  { %v2406_v1 = vadd.f32 %v2405_v0, %v5310_v16  ;;  %v2407_v2 = vpop.f32.mrb[143].mxu1  ;;  %2750 = vmatpush1.bf16.msra.mxu1 %v2647_v58  ;;  %v2570_v33 = vmax.f32 %v2402_v61, 0.0 }
 0x501   :  { %v2408_v3 = vadd.f32 %v2407_v2, %v5314_v19  ;;  %v2571_v5 = vmax.f32 %v2404_v63, 0.0 }
 0x502   :  { %v2572_v4 = vmax.f32 %v2406_v1, 0.0 }
 0x503   :  { %v2573_v6 = vmax.f32 %v2408_v3, 0.0 }
 0x504   :  { %v2649_v7 = vpack.c.bf16 %v2572_v4, %v2570_v33 }
 0x505   :  { %v2650_v8 = vpack.c.bf16 %v2573_v6, %v2571_v5  ;;  %v2411_v10 = vpop.f32.mrb[144].mxu1 }
 0x506   :  { %v2412_v11 = vadd.f32 %v2411_v10, %v5310_v16  ;;  %v2413_v12 = vpop.f32.mrb[145].mxu1 }
 0x507   :  { %v2414_v14 = vadd.f32 %v2413_v12, %v5314_v19  ;;  %v2415_v15 = vpop.f32.mrb[146].mxu1  ;;  %2751 = vmatprep.subr.bf16.mxu1 %v2650_v8 }
 0x508   :  { %v2416_v17 = vadd.f32 %v2415_v15, %v5310_v16  ;;  %v2417_v18 = vpop.f32.mrb[147].mxu1  ;;  %2752 = vmatpush1.bf16.msra.mxu1 %v2649_v7  ;;  %v2574_v21 = vmax.f32 %v2412_v11, 0.0 }
 0x509   :  { %v2418_v20 = vadd.f32 %v2417_v18, %v5314_v19  ;;  %v2575_v23 = vmax.f32 %v2414_v14, 0.0 }
 0x50a   :  { %v2576_v22 = vmax.f32 %v2416_v17, 0.0 }
 0x50b   :  { %v2577_v24 = vmax.f32 %v2418_v20, 0.0 }
 0x50c   :  { %v2651_v38 = vpack.c.bf16 %v2576_v22, %v2574_v21 }
 0x50d   :  { %v2652_v25 = vpack.c.bf16 %v2577_v24, %v2575_v23  ;;  %v2421_v26 = vpop.f32.mrb[148].mxu1 }
 0x50e   :  { %v2422_v40 = vadd.f32 %v2421_v26, %v5310_v16  ;;  %v2423_v27 = vpop.f32.mrb[149].mxu1 }
 0x50f   :  { %v2424_v29 = vadd.f32 %v2423_v27, %v5314_v19  ;;  %v2425_v30 = vpop.f32.mrb[150].mxu1  ;;  %2753 = vmatprep.subr.bf16.mxu1 %v2652_v25 }
 0x510   :  { %v2426_v32 = vadd.f32 %v2425_v30, %v5310_v16  ;;  %v2427_v36 = vpop.f32.mrb[151].mxu1  ;;  %2754 = vmatpush1.bf16.msra.mxu1 %v2651_v38  ;;  %v2578_v43 = vmax.f32 %v2422_v40, 0.0 }
 0x511   :  { %v2428_v39 = vadd.f32 %v2427_v36, %v5314_v19  ;;  %v2579_v28 = vmax.f32 %v2424_v29, 0.0 }
 0x512   :  { %v2580_v37 = vmax.f32 %v2426_v32, 0.0 }
 0x513   :  { %v2581_v41 = vmax.f32 %v2428_v39, 0.0 }
 0x514   :  { %v2653_v42 = vpack.c.bf16 %v2580_v37, %v2578_v43 }
 0x515   :  { %v2654_v44 = vpack.c.bf16 %v2581_v41, %v2579_v28  ;;  %v2431_v45 = vpop.f32.mrb[152].mxu1  ;;  %v4317_v41 = vld [vmem:[%s5702_s14 + $0x40] sm:$0xff]  }
 0x516   :  { %v2432_v46 = vadd.f32 %v2431_v45, %v5310_v16  ;;  %v2433_v47 = vpop.f32.mrb[153].mxu1  ;;  %v4318_v45 = vld [vmem:[%s5702_s14] sm:$0xff]  }
 0x517   :  { %v2434_v48 = vadd.f32 %v2433_v47, %v5314_v19  ;;  %v2435_v49 = vpop.f32.mrb[154].mxu1  ;;  %2755 = vmatprep.subr.bf16.mxu1 %v2654_v44  ;;  %v2686_v44 = vcombine.high %v5330_v35, %v5330_v35  ;;  %v4336_v47 = vld [vmem:[%s5704_s16 + $0x8] sm:$0xff]   ;;  %v2955_v35 = vpack.c.bf16 %v5307_v13, %v5307_v13 }
 0x518   :  { %v2436_v50 = vadd.f32 %v2435_v49, %v5310_v16  ;;  %v2437_v51 = vpop.f32.mrb[155].mxu1  ;;  %2756 = vmatpush1.bf16.msra.mxu1 %v2653_v42  ;;  %v2582_v52 = vmax.f32 %v2432_v46, 0.0  ;;  %v4333_v42 = vld [vmem:[%s5704_s16 + $0x40] sm:$0xff]   ;;  %v4319_v46 = vld [vmem:[%s5702_s14 + $0x48] sm:$0xff]  }
 0x519   :  { %v2438_v31 = vadd.f32 %v2437_v51, %v5314_v19  ;;  %v2583_v34 = vmax.f32 %v2434_v48, 0.0  ;;  %3889 = vmatprep.subr.bf16.mxu0 %v4333_v42  ;;  %v4337_v48 = vld [vmem:[%s5704_s16 + $0x50] sm:$0xff]   ;;  %v4320_v49 = vld [vmem:[%s5702_s14 + $0x8] sm:$0xff]  }
 0x51a   :  { %v2584_v53 = vmax.f32 %v2436_v50, 0.0  ;;  %v4321_v50 = vld [vmem:[%s5702_s14 + $0x50] sm:$0xff]  }
 0x51b   :  { %v2585_v54 = vmax.f32 %v2438_v31, 0.0  ;;  %v4338_v51 = vld [vmem:[%s5704_s16 + $0x10] sm:$0xff]   ;;  %v4339_v31 = vld [vmem:[%s5704_s16 + $0x58] sm:$0xff]  }
 0x51c   :  { %v2655_v55 = vpack.c.bf16 %v2584_v53, %v2582_v52  ;;  %v4322_v52 = vld [vmem:[%s5702_s14 + $0x10] sm:$0xff]   ;;  %v4323_v53 = vld [vmem:[%s5702_s14 + $0x58] sm:$0xff]  }
 0x51d   :  { %v2656_v56 = vpack.c.bf16 %v2585_v54, %v2583_v34  ;;  %v2441_v57 = vpop.f32.mrb[156].mxu1  ;;  %v4340_v34 = vld [vmem:[%s5704_s16 + $0x18] sm:$0xff]   ;;  %v4341_v54 = vld [vmem:[%s5704_s16 + $0x60] sm:$0xff]  }
 0x51e   :  { %v2442_v58 = vadd.f32 %v2441_v57, %v5310_v16  ;;  %v2443_v59 = vpop.f32.mrb[157].mxu1  ;;  %v4342_v57 = vld [vmem:[%s5704_s16 + $0x20] sm:$0xff]  }
 0x51f   :  { %v2444_v60 = vadd.f32 %v2443_v59, %v5314_v19  ;;  %v2445_v61 = vpop.f32.mrb[158].mxu1  ;;  %2757 = vmatprep.subr.bf16.mxu1 %v2656_v56  ;;  %v4325_v56 = vld [vmem:[%s5702_s14 + $0x60] sm:$0xff]  }
 0x520   :  { %v2446_v62 = vadd.f32 %v2445_v61, %v5310_v16  ;;  %v2447_v63 = vpop.f32.mrb[159].mxu1  ;;  %2758 = vmatpush1.bf16.msra.mxu1 %v2655_v55  ;;  %v2586_v1 = vmax.f32 %v2442_v58, 0.0  ;;  %v4324_v55 = vld [vmem:[%s5702_s14 + $0x18] sm:$0xff]   ;;  %v4343_v58 = vld [vmem:[%s5704_s16 + $0x68] sm:$0xff]   ;;  %v4326_v59 = vld [vmem:[%s5702_s14 + $0x20] sm:$0xff]  }
 0x521   :  { %v2448_v0 = vadd.f32 %v2447_v63, %v5314_v19  ;;  %v2587_v3 = vmax.f32 %v2444_v60, 0.0  ;;  %v4327_v60 = vld [vmem:[%s5702_s14 + $0x68] sm:$0xff]   ;;  %v4329_v63 = vld [vmem:[%s5702_s14 + $0x70] sm:$0xff]  }
 0x522   :  { %v2588_v2 = vmax.f32 %v2446_v62, 0.0  ;;  %v4344_v61 = vld [vmem:[%s5704_s16 + $0x28] sm:$0xff]  }
 0x523   :  { %v2589_v33 = vmax.f32 %v2448_v0, 0.0  ;;  %v4328_v62 = vld [vmem:[%s5702_s14 + $0x28] sm:$0xff]   ;;  %v4330_v0 = vld [vmem:[%s5702_s14 + $0x30] sm:$0xff]  }
 0x524   :  { %v2657_v4 = vpack.c.bf16 %v2588_v2, %v2586_v1  ;;  %v4331_v1 = vld [vmem:[%s5702_s14 + $0x78] sm:$0xff]  }
 0x525   :  { %v2658_v5 = vpack.c.bf16 %v2589_v33, %v2587_v3  ;;  %v2451_v6 = vpop.f32.mrb[160].mxu1  ;;  %v4332_v2 = vld [vmem:[%s5702_s14 + $0x38] sm:$0xff]   ;;  %v2954_v3 = vpack.c.bf16 %v5298_v9, %v5298_v9  ;;  %v4345_v33 = vld [vmem:[%s5704_s16 + $0x70] sm:$0xff]  }
 0x526   :  { %v2452_v7 = vadd.f32 %v2451_v6, %v5310_v16  ;;  %v2453_v8 = vpop.f32.mrb[161].mxu1 }
 0x527   :  { %v2454_v10 = vadd.f32 %v2453_v8, %v5314_v19  ;;  %v2455_v11 = vpop.f32.mrb[162].mxu1  ;;  %2759 = vmatprep.subr.bf16.mxu1 %v2658_v5  ;;  %v4346_v5 = vld [vmem:[%s5704_s16 + $0x30] sm:$0xff]  }
 0x528   :  { %v2456_v12 = vadd.f32 %v2455_v11, %v5310_v16  ;;  %v2457_v14 = vpop.f32.mrb[163].mxu1  ;;  %2760 = vmatpush1.bf16.msra.mxu1 %v2657_v4  ;;  %v2590_v17 = vmax.f32 %v2452_v7, 0.0  ;;  %v4348_v11 = vld [vmem:[%s5704_s16 + $0x38] sm:$0xff]  }
 0x529   :  { %v2458_v15 = vadd.f32 %v2457_v14, %v5314_v19  ;;  %v2591_v20 = vmax.f32 %v2454_v10, 0.0  ;;  %v4347_v10 = vld [vmem:[%s5704_s16 + $0x78] sm:$0xff]  }
 0x52a   :  { %v2592_v18 = vmax.f32 %v2456_v12, 0.0  ;;  %v4401_v12 = vmov 0.0  }
 0x52b   :  { %v2593_v21 = vmax.f32 %v2458_v15, 0.0 }
 0x52c   :  { %v2659_v22 = vpack.c.bf16 %v2592_v18, %v2590_v17  ;;  %v4351_v17 = vld [vmem:[%s5707_s19] sm:$0xff]  }
 0x52d   :  { %v2660_v23 = vpack.c.bf16 %v2593_v21, %v2591_v20  ;;  %v2461_v24 = vpop.f32.mrb[164].mxu1 }
 0x52e   :  { %v2462_v38 = vadd.f32 %v2461_v24, %v5310_v16  ;;  %v2463_v25 = vpop.f32.mrb[165].mxu1 }
 0x52f   :  { %v2464_v26 = vadd.f32 %v2463_v25, %v5314_v19  ;;  %v2465_v40 = vpop.f32.mrb[166].mxu1  ;;  %2761 = vmatprep.subr.bf16.mxu1 %v2660_v23 }
 0x530   :  { %v2466_v27 = vadd.f32 %v2465_v40, %v5310_v16  ;;  %v2467_v29 = vpop.f32.mrb[167].mxu1  ;;  %2762 = vmatpush1.bf16.msra.mxu1 %v2659_v22  ;;  %v2594_v32 = vmax.f32 %v2462_v38, 0.0  ;;  %v4334_v16 = vld [vmem:[%s5704_s16] sm:$0xff]   ;;  %v4352_v22 = vld [vmem:[%s5707_s19 + $0x8] sm:$0xff]  }
 0x531   :  { %v2468_v30 = vadd.f32 %v2467_v29, %v5314_v19  ;;  %v2595_v39 = vmax.f32 %v2464_v26, 0.0  ;;  %v4335_v19 = vld [vmem:[%s5704_s16 + $0x48] sm:$0xff]   ;;  %3890 = vmatpush3.bf16.msra.mxu0 %v4334_v16  ;;  %v3784_v29 = vld [vmem:[%s5701_s13] ss:$0 sm:$0xff] }
 0x532   :  { %v2596_v36 = vmax.f32 %v2466_v27, 0.0  ;;  %3891 = vmatprep.subr.bf16.mxu0 %v4335_v19 }
 0x533   :  { %v2597_v43 = vmax.f32 %v2468_v30, 0.0 }
 0x534   :  { %v2661_v37 = vpack.c.bf16 %v2596_v36, %v2594_v32  ;;  %v4349_v36 = vld [vmem:[%s5708_s20] sm:$0xff]  }
 0x535   :  { %v2662_v28 = vpack.c.bf16 %v2597_v43, %v2595_v39  ;;  %3892 = vmatpush3.bf16.msra.mxu0 %v4336_v47 }
 0x536   :  { %3893 = vmatprep.subr.bf16.mxu0 %v4337_v48  ;;  %v4354_v48 = vld [vmem:[%s5706_s18 + $0x8] sm:$0xff]  }
 0x537   :  { %2763 = vmatprep.subr.bf16.mxu1 %v2662_v28 }
 0x538   :  { %2764 = vmatpush1.bf16.msra.mxu1 %v2661_v37 }
 0x539   :  { %3867 = vmatprep.subr.bf16.mxu1 %v4317_v41  ;;  %3894 = vmatpush3.bf16.msra.mxu0 %v4338_v51  ;;  %v3801_v41 = vld [vmem:[%s5703_s15] ss:$0 sm:$0xff] }
 0x53a   :  { %3895 = vmatprep.subr.bf16.mxu0 %v4339_v31 }
 0x53b   :  { %2766 = vmatmul.mubr.bf16.vlgmr.msra.gmra.mrb[168].mxu1 %v2686_v44 }
 0x53c   :  { %3868 = vmatpush3.bf16.msra.mxu1 %v4318_v45  ;;  %3123 = vmatprep.mubr.bf16.mxu1 %v2955_v35  ;;  %v4353_v35 = vld [vmem:[%s5706_s18] sm:$0xff]  }
 0x53d   :  { %3869 = vmatprep.subr.bf16.mxu1 %v4319_v46  ;;  %3896 = vmatpush3.bf16.msra.mxu0 %v4340_v34 }
 0x53e   :  { %3897 = vmatprep.subr.bf16.mxu0 %v4341_v54 }
 0x540   :  { %3870 = vmatpush3.bf16.msra.mxu1 %v4320_v49 }
 0x541   :  { %3871 = vmatprep.subr.bf16.mxu1 %v4321_v50  ;;  %3898 = vmatpush3.bf16.msra.mxu0 %v4342_v57  ;;  %v3818_v50 = vld [vmem:[%s5705_s17] ss:$0 sm:$0xff] }
 0x542   :  { %3899 = vmatprep.subr.bf16.mxu0 %v4343_v58 }
 0x544   :  { %3872 = vmatpush3.bf16.msra.mxu1 %v4322_v52 }
 0x545   :  { %3873 = vmatprep.subr.bf16.mxu1 %v4323_v53  ;;  %3900 = vmatpush3.bf16.msra.mxu0 %v4344_v61 }
 0x546   :  { %3901 = vmatprep.subr.bf16.mxu0 %v4345_v33  ;;  %v3844_v33 = vld [vmem:[%s5709_s21] ss:$0 sm:$0xff]  ;;  %s4403_s21 = smov [#allocation2]  }
 0x547   :  { %s3520_s10 = sshll.u32 %s4403_s21, 4  ;;  %s3521_s10 = int_to_ptr.vmem [resolvable:$true] %s3520_s10 }
 0x548   :  { %3874 = vmatpush3.bf16.msra.mxu1 %v4324_v55  ;;  %s4375_s0 = scalar_lea.vmem %s3521_s10, 32  ;;  %p4380_p1 = scmp.lt.s32.totalorder %s3521_s10, %s3521_s10 }
 0x549   :  { %3875 = vmatprep.subr.bf16.mxu1 %v4325_v56  ;;  %3902 = vmatpush3.bf16.msra.mxu0 %v4346_v5  ;;  %p4376_p0 = scmp.ne.s32.totalorder %s3521_s10, %s4375_s0  ;;  %p4381_p2 = scmp.lt.s32.totalorder %s4375_s0, %s4375_s0 }
 0x54a   :  { %3903 = vmatprep.subr.bf16.mxu0 %v4347_v10 }
 0x54b   :  { %p4382_p3 = por %p4381_p2, %p4380_p1 }
 0x54c   :  { %3876 = vmatpush3.bf16.msra.mxu1 %v4326_v59 }
 0x54d   :  { %3877 = vmatprep.subr.bf16.mxu1 %v4327_v60  ;;  %3904 = vmatpush3.bf16.msra.mxu0 %v4348_v11  ;;  %p4383_p4 = pnand %p4382_p3, %p4376_p0 }
 0x54e   :  { %3936 = vmatprep.subr.bf16.mxu0 %v4401_v12 }
 0x550   :  { %3878 = vmatpush3.bf16.msra.mxu1 %v4328_v62 }
 0x551   :  { %3879 = vmatprep.subr.bf16.mxu1 %v4329_v63 }
 0x554   :  { %3880 = vmatpush3.bf16.msra.mxu1 %v4330_v0 }
 0x555   :  { %3881 = vmatprep.subr.bf16.mxu1 %v4331_v1 }
 0x558   :  { %3882 = vmatpush3.bf16.msra.mxu1 %v4332_v2 }
 0x559   :  { %3920 = vmatprep.subr.bf16.mxu1 %v4401_v12 }
 0x55b   :  { %3124 = vmatmul.mubr.bf16.vlgmr.msra.gmra.mrb[172].mxu1 %v2954_v3 }
 0x55c   :  { %3924 = vmatprep.mubr.msk.bf16.mxu1 %vm4402_vm1, %v4401_v12  ;;  %3921 = vmatpush3.bf16.msra.mxu1 %v4351_v17 }
 0x55d   :  { %3922 = vmatprep.subr.bf16.mxu1 %v4401_v12 }
 0x560   :  { %3923 = vmatpush3.bf16.msra.mxu1 %v4352_v22 }
 0x561   :  { %3928 = vmatprep.subr.bf16.mxu1 %v4401_v12 }
 0x58e   :  { %v2726_v4 = vpop.f32.mrb[8].mxu0 }
 0x58f   :  { %v2728_v6 = vpop.f32.mrb[9].mxu0 }
 0x590   :  { %v2730_v7 = vpop.f32.mrb[10].mxu0 }
 0x591   :  { %v2731_v8 = vpop.f32.mrb[11].mxu0 }
 0x5ae   :  { %v3861_v14 = vpop.f32.mrb[12].mxu0 }
 0x5af   :  { %v3862_v15 = vpop.f32.mrb[13].mxu0 }
 0x5b0   :  { %v3863_v18 = vadd.f32 %v3862_v15, %v3861_v14  ;;  %v3864_v20 = vpop.f32.mrb[14].mxu0 }
 0x5b1   :  { %v3865_v21 = vpop.f32.mrb[15].mxu0 }
 0x5b2   :  { %v2948_v39 = vadd.f32 %v3863_v18, %v3784_v29 }
 0x5b4   :  { %v2953_v37 = vmax.f32 %v2948_v39, 0.0 }
 0x60e   :  { %v2767_v23 = vpop.f32.mrb[168].mxu1 }
 0x60f   :  { %v2768_v24 = vadd.f32 %v2767_v23, %v2726_v4  ;;  %v2769_v38 = vpop.f32.mrb[169].mxu1 }
 0x610   :  { %v2770_v25 = vadd.f32 %v2769_v38, %v2728_v6  ;;  %v2771_v26 = vpop.f32.mrb[170].mxu1 }
 0x611   :  { %v2774_v40 = vadd.f32 %v2768_v24, %v5298_v9  ;;  %v2772_v27 = vpop.f32.mrb[171].mxu1  ;;  %v4350_v9 = vld [vmem:[%s5708_s20 + $0x8] sm:$0xff]  }
 0x612   :  { %v2775_v30 = vadd.f32 %v2770_v25, %v5307_v13  ;;  %v3430_v13 = vpack.c.bf16 %v2953_v37, %v2953_v37 }
 0x613   :  { %v3132_v43 = vpack.c.bf16 %v2774_v40, %v2774_v40 }
 0x614   :  { %v3133_v32 = vpack.c.bf16 %v2775_v30, %v2775_v30 }
 0x616   :  { %3301 = vmatprep.mubr.bf16.mxu0 %v3133_v32 }
 0x617   :  { %3302 = vmatmul.mubr.bf16.vlgmr.msra.gmra.mrb[16].mxu0 %v3132_v43 }
 0x618   :  { %3937 = vmatpush3.bf16.msra.mxu0 %v4349_v36  ;;  %3940 = vmatprep.mubr.msk.bf16.mxu0 %vm4402_vm1, %v4401_v12 }
 0x619   :  { %3938 = vmatprep.subr.bf16.mxu0 %v4401_v12 }
 0x61c   :  { %3939 = vmatpush3.bf16.msra.mxu0 %v4350_v9 }
 0x61f   :  { %3941 = vmatmul.mubr.msk.bf16.vlgmr.msra.gmra.mrb[20].mxu0 %vm1339_vm0, %v3430_v13 }
 0x62e   :  { %v3883_v28 = vpop.f32.mrb[172].mxu1 }
 0x62f   :  { %v3884_v42 = vpop.f32.mrb[173].mxu1 }
 0x630   :  { %v3885_v16 = vadd.f32 %v3884_v42, %v3883_v28  ;;  %v3886_v19 = vpop.f32.mrb[174].mxu1 }
 0x631   :  { %v3887_v44 = vpop.f32.mrb[175].mxu1 }
 0x632   :  { %v3126_v45 = vadd.f32 %v3885_v16, %v3801_v41 }
 0x634   :  { %v3131_v46 = vmax.f32 %v3126_v45, 0.0 }
 0x636   :  { %v3315_v47 = vpack.c.bf16 %v3131_v46, %v3131_v46 }
 0x638   :  { %3925 = vmatmul.mubr.msk.bf16.vlgmr.msra.gmra.mrb[176].mxu1 %vm1339_vm0, %v3315_v47 }
 0x639   :  { %3932 = vmatprep.mubr.msk.bf16.mxu1 %vm4402_vm1, %v4401_v12  ;;  %3929 = vmatpush3.bf16.msra.mxu1 %v4353_v35 }
 0x63a   :  { %3930 = vmatprep.subr.bf16.mxu1 %v4401_v12 }
 0x63d   :  { %3931 = vmatpush3.bf16.msra.mxu1 %v4354_v48 }
 0x6ea   :  { %v3905_v49 = vpop.f32.mrb[16].mxu0 }
 0x6eb   :  { %v3906_v51 = vpop.f32.mrb[17].mxu0 }
 0x6ec   :  { %v3907_v31 = vadd.f32 %v3906_v51, %v3905_v49  ;;  %v3908_v52 = vpop.f32.mrb[18].mxu0 }
 0x6ed   :  { %v3909_v53 = vpop.f32.mrb[19].mxu0 }
 0x6ee   :  { %v3304_v34 = vadd.f32 %v3907_v31, %v3818_v50 }
 0x6f0   :  { %v3309_v54 = vmax.f32 %v3304_v34, 0.0 }
 0x6f2   :  { %v3310_v55 = vpack.c.bf16 %v3309_v54, %v3309_v54  ;;  %v3484_v56 = vpop.f32.mrb[20].mxu0 }
 0x6f3   :  { %v3942_v57 = vpop.f32.mrb[21].mxu0 }
 0x6f4   :  { %3933 = vmatmul.mubr.msk.bf16.vlgmr.msra.gmra.mrb[180].mxu1 %vm1339_vm0, %v3310_v55  ;;  %v3487_v58 = vpop.f32.mrb[22].mxu0 }
 0x6f5   :  { %v3943_v59 = vpop.f32.mrb[23].mxu0 }
 0x70b   :  { %v3369_v60 = vpop.f32.mrb[176].mxu1 }
 0x70c   :  { %v3926_v61 = vpop.f32.mrb[177].mxu1 }
 0x70d   :  { %v3372_v62 = vpop.f32.mrb[178].mxu1 }
 0x70e   :  { %v3927_v63 = vpop.f32.mrb[179].mxu1 }
 0x7c7   :  { %v3424_v0 = vpop.f32.mrb[180].mxu1 }
 0x7c8   :  { %v3425_v1 = vadd.f32 %v3424_v0, %v3369_v60  ;;  %v3934_v2 = vpop.f32.mrb[181].mxu1 }
 0x7c9   :  { %v3427_v3 = vpop.f32.mrb[182].mxu1 }
 0x7ca   :  { %v3490_v4 = vadd.f32 %v3484_v56, %v3425_v1  ;;  %v3935_v5 = vpop.f32.mrb[183].mxu1 }
 0x7cc   :  { %v3498_v6 = vadd.f32 %v3844_v33, %v3490_v4 }
 0x7ce   :  { %v3500_v7 = vsel %vm3499_vm2, %v3498_v6, -inf }
 0x7cf   :  { %3501 = vmax.xlane.f32.xlu0 %v3500_v7 }
 0x85c   :  { %v3502_v8 = vpop.xlane.xlu0 %3501 }
 0x85d   :  { %v3503_v10 = vsub.f32 %v3498_v6, %v3502_v8 }
 0x85f   :  { %v3504_v11 = vmul.f32 1.442695, %v3503_v10 }
 0x861   :  { %4371 = vpow2.f32 %v3504_v11 }
 0x86b   :  { %v4372_v12 = vpop.eup %4371 }
 0x86c   :  { %v3506_v14 = vsel %vm3499_vm2, %v4372_v12, 0.0 }
 0x86d   :  { %3507 = vadd.xlane.f32.xlu0 %v3506_v14 }
 0x8fa   :  { %v3508_v15 = vpop.xlane.xlu0 %3507 }
 0x8fb   :  { %4373 = vlog2.f32 %v3508_v15 }
 0x905   :  { %v4374_v17 = vpop.eup %4373 }
 0x906   :  { %v3510_v18 = vmul.f32 0.6931472, %v4374_v17 }
 0x908   :  { %v3511_v20 = vadd.f32 %v3510_v18, %v3502_v8 }
 0x90a   :  { %v3512_v21 = vsub.f32 %v3498_v6, %v3511_v20 }
 0x90c   :  { %3513 = vst.msk [vmem:[#allocation2] sm:$0x3] %vm3499_vm2, %v3512_v21 }
 0x90d   :  { %4386 = shalt.err (!%p4383_p4)
}
 0x90e   :  { %s4387_s8 = scalar_lea.hbm %s5710_s22, 32 }
 0x90f   :  { %p4388_p5 = scmp.ne.s32.totalorder %s5710_s22, %s4387_s8  ;;  %p4391_p6 = scmp.lt.u32.totalorder %s4387_s8, %s5710_s22 }
 0x911   :  { %p4393_p7 = pnand %p4391_p6, %p4388_p5 }
 0x913   :  { %4396 = shalt.err (!%p4393_p7)
}
 0x914   :  { %3523 = dma.vmem_to_hbm [thread:$0]  %s3521_s10, 32, %s5710_s22, [#allocation3]  }
 0x915   :  { %4397 = dma.done.wait [#allocation3], 32  }
 0x916   :  { %4398 = vsyncadd [#allocation3], 4294967264 }
 0x917   :  { %3527 = vsyncpa [#allocation3], 1 }

</bundles_post_ra>
